<compile_context>
chip_gen: v7x
topology: tpu7x:2x2x1
jax: 0.10.0
libtpu: 0.0.40
codegen_flags: <defaults>
</compile_context>

<pallas_src>
import functools

import jax
import jax.numpy as jnp
import numpy as np
from jax.experimental import pallas as pl
from jax.experimental.pallas import tpu as pltpu


# ----------------------------------------------------------------------------
# Kernel: WS-conv3x3 (pre-standardized weights) -> GroupNorm -> SiLU
#         [+ optional fused residual epilogue]
# ----------------------------------------------------------------------------
def conv_block_kernel(*refs, h, w, groups, eps, residual, mm_dtype):
    if residual == "conv":
        (x_ref, w_ref, b_ref, gamma_ref, beta_ref, mask_ref,
         xr_ref, wr_ref, br_ref, o_ref) = refs
    elif residual == "identity":
        (x_ref, w_ref, b_ref, gamma_ref, beta_ref, mask_ref,
         xr_ref, o_ref) = refs
    else:
        (x_ref, w_ref, b_ref, gamma_ref, beta_ref, mask_ref, o_ref) = refs

    hw = h * w
    c_in = x_ref.shape[-1]
    c_out = b_ref.shape[-1]

    # --- im2col in VMEM: nine shifted views of the zero-padded input block ---
    cols = []
    for dy in range(3):
        for dx in range(3):
            tap = x_ref[0, dy:dy + h, dx:dx + w, :]              # (h, w, c_in)
            cols.append(tap.reshape(hw, c_in))
    patches = jnp.concatenate(cols, axis=-1).astype(mm_dtype)    # (hw, 9*c_in)

    # --- 3x3 conv (weights already standardized in the wrapper): one MXU matmul
    acc = jnp.dot(patches, w_ref[...],
                  preferred_element_type=jnp.float32)            # (hw, c_out) f32
    acc = acc + b_ref[...]

    # --- GroupNorm: sum over HW first, fold channels -> groups with the mask ---
    cnt = float((c_out // groups) * hw)
    g_sum = jnp.dot(jnp.sum(acc, axis=0, keepdims=True), mask_ref[...],
                    preferred_element_type=jnp.float32)          # (1, c_out)
    mean = g_sum * (1.0 / cnt)                                   # per-channel group mean
    d = acc - mean
    g_ssq = jnp.dot(jnp.sum(d * d, axis=0, keepdims=True), mask_ref[...],
                    preferred_element_type=jnp.float32)          # centered 2nd pass
    inv = jax.lax.rsqrt(g_ssq * (1.0 / cnt) + eps)
    y = d * inv * gamma_ref[...] + beta_ref[...]

    # --- SiLU ---
    y = y * jax.nn.sigmoid(y)

    # --- fused residual epilogue ---
    if residual == "conv":
        r = jnp.dot(xr_ref[0].astype(mm_dtype), wr_ref[...],
                    preferred_element_type=jnp.float32)
        y = y + r + br_ref[...]
    elif residual == "identity":
        y = y + xr_ref[0].astype(jnp.float32)

    o_ref[0] = y.astype(o_ref.dtype)


# ----------------------------------------------------------------------------
# Wrapper: parameter prep (hoisted), padding, pallas_call
# ----------------------------------------------------------------------------
def conv_block(x_nhwc, w_oihw, b, gamma, beta, *, groups=8, eps=1e-5,
               residual=None, x_res=None, w_res=None, b_res=None,
               matmul_dtype=None, vmem_limit_bytes=32 * 1024 * 1024):
    n, h, wd, c_in = x_nhwc.shape
    c_out = w_oihw.shape[0]
    hw = h * wd
    mm_dtype = jnp.dtype(matmul_dtype) if matmul_dtype is not None else x_nhwc.dtype

    # -- hoisted per-call parameter prep (NOT per grid step) -------------------
    # Weight standardization over (i, kh, kw) per output channel; matches the
    # module's `(w - mean) / (var + eps).rsqrt()` (i.e. multiply by the std).
    wf = w_oihw.astype(jnp.float32)
    w_mean = jnp.mean(wf, axis=(1, 2, 3), keepdims=True)
    w_var = jnp.mean((wf - w_mean) ** 2, axis=(1, 2, 3), keepdims=True)  # unbiased=False
    w_std = (wf - w_mean) * jnp.sqrt(w_var + eps)
    # (o, i, kh, kw) -> (kh, kw, i, o) -> (9*c_in, c_out); rows ordered (kh, kw, i)
    w2d = jnp.transpose(w_std, (2, 3, 1, 0)).reshape(9 * c_in, c_out).astype(mm_dtype)

    # Same-group mask for folding per-channel sums into group sums.
    gid = np.repeat(np.arange(groups), c_out // groups)
    mask = jnp.asarray((gid[:, None] == gid[None, :]).astype(np.float32))

    # Pad once (halo only) — no 9x tap duplication in HBM.
    xp = jnp.pad(x_nhwc, ((0, 0), (1, 1), (1, 1), (0, 0)))

    inputs = [xp, w2d,
              b.reshape(1, c_out).astype(jnp.float32),
              gamma.reshape(1, c_out).astype(jnp.float32),
              beta.reshape(1, c_out).astype(jnp.float32),
              mask]
    in_specs = [
        pl.BlockSpec((1, h + 2, wd + 2, c_in), lambda i: (i, 0, 0, 0)),
        pl.BlockSpec((9 * c_in, c_out), lambda i: (0, 0)),
        pl.BlockSpec((1, c_out), lambda i: (0, 0)),
        pl.BlockSpec((1, c_out), lambda i: (0, 0)),
        pl.BlockSpec((1, c_out), lambda i: (0, 0)),
        pl.BlockSpec((c_out, c_out), lambda i: (0, 0)),
    ]
    if residual == "conv":
        c_res = x_res.shape[-1]
        inputs += [x_res, w_res.astype(mm_dtype),
                   b_res.reshape(1, c_out).astype(jnp.float32)]
        in_specs += [pl.BlockSpec((1, hw, c_res), lambda i: (i, 0, 0)),
                     pl.BlockSpec((c_res, c_out), lambda i: (0, 0)),
                     pl.BlockSpec((1, c_out), lambda i: (0, 0))]
    elif residual == "identity":
        inputs += [x_res]
        in_specs += [pl.BlockSpec((1, hw, x_res.shape[-1]), lambda i: (i, 0, 0))]

    kern = functools.partial(conv_block_kernel, h=h, w=wd, groups=groups,
                             eps=eps, residual=residual, mm_dtype=mm_dtype)
    out = pl.pallas_call(
        kern,
        out_shape=jax.ShapeDtypeStruct((n, hw, c_out), x_nhwc.dtype),
        grid_spec=pltpu.PrefetchScalarGridSpec(
            num_scalar_prefetch=0,
            grid=(n,),
            in_specs=in_specs,
            out_specs=pl.BlockSpec((1, hw, c_out), lambda i: (i, 0, 0)),
        ),
        compiler_params=pltpu.CompilerParams(
            dimension_semantics=("parallel",),
            vmem_limit_bytes=vmem_limit_bytes),
    )(*inputs)
    return out.reshape(n, h, wd, c_out)


def res_conv_block(x_nchw, params, *, groups=8, matmul_dtype=None):
    """Residual forward: res(x) + ConvBlock(ConvBlock(x)). NCHW in/out."""
    n, c_in, h, w = x_nchw.shape
    c_out = params["w1"].shape[0]
    x_nhwc = jnp.transpose(x_nchw, (0, 2, 3, 1))

    # First ConvBlock.
    y = conv_block(x_nhwc, params["w1"], params["b1"], params["g1"], params["be1"],
                   groups=groups, matmul_dtype=matmul_dtype)

    # Second ConvBlock with the residual path fused into its epilogue.
    if c_in != c_out:
        residual = "conv"
        w_res = jnp.transpose(params["wres"][:, :, 0, 0], (1, 0))   # (c_in, c_out)
        b_res = params["bres"]
    else:
        residual = "identity"   # plain add, no identity-eye matmul
        w_res = None
        b_res = None

    out = conv_block(y, params["w2"], params["b2"], params["g2"], params["be2"],
                     groups=groups, matmul_dtype=matmul_dtype,
                     residual=residual, x_res=x_nhwc.reshape(n, h * w, c_in),
                     w_res=w_res, b_res=b_res)                       # (N, H, W, c_out)
    return jnp.transpose(out, (0, 3, 1, 2))


# ----------------------------------------------------------------------------
# Pure-JAX reference (mirrors the module) for the sanity check
# ----------------------------------------------------------------------------
def ref_forward(x, params, groups=8):
    eps = 1e-5

    def ws_conv(x, w, b):
        mean = jnp.mean(w, axis=(1, 2, 3), keepdims=True)
        var = jnp.mean((w - mean) ** 2, axis=(1, 2, 3), keepdims=True)
        w_std = (w - mean) * jnp.sqrt(var + eps)   # matches `/ (var+eps).rsqrt()`
        y = jax.lax.conv_general_dilated(
            x, w_std, window_strides=(1, 1), padding=((1, 1), (1, 1)),
            dimension_numbers=("NCHW", "OIHW", "NCHW"))
        return y + b[None, :, None, None]

    def gn(x, gamma, beta):
        n, c, h, w = x.shape
        xg = x.reshape(n, groups, c // groups, h, w)
        mean = jnp.mean(xg, axis=(2, 3, 4), keepdims=True)
        var = jnp.mean((xg - mean) ** 2, axis=(2, 3, 4), keepdims=True)
        xn = ((xg - mean) / jnp.sqrt(var + eps)).reshape(n, c, h, w)
        return xn * gamma[None, :, None, None] + beta[None, :, None, None]

    silu = lambda v: v * jax.nn.sigmoid(v)
    y = silu(gn(ws_conv(x, params["w1"], params["b1"]), params["g1"], params["be1"]))
    y = silu(gn(ws_conv(y, params["w2"], params["b2"]), params["g2"], params["be2"]))
    if "wres" in params:
        res = jax.lax.conv_general_dilated(
            x, params["wres"], (1, 1), ((0, 0), (0, 0)),
            dimension_numbers=("NCHW", "OIHW", "NCHW")) + params["bres"][None, :, None, None]
    else:
        res = x
    return res + y


# ----------------------------------------------------------------------------
if __name__ == "__main__":
    def make_params(key, c_in, c_out, with_res):
        ks = jax.random.split(key, 10)
        f32 = jnp.float32
        p = {
            "w1": 0.1 * jax.random.normal(ks[0], (c_out, c_in, 3, 3), f32),
            "b1": 0.1 * jax.random.normal(ks[1], (c_out,), f32),
            "g1": 1.0 + 0.1 * jax.random.normal(ks[2], (c_out,), f32),
            "be1": 0.1 * jax.random.normal(ks[3], (c_out,), f32),
            "w2": 0.1 * jax.random.normal(ks[4], (c_out, c_out, 3, 3), f32),
            "b2": 0.1 * jax.random.normal(ks[5], (c_out,), f32),
            "g2": 1.0 + 0.1 * jax.random.normal(ks[6], (c_out,), f32),
            "be2": 0.1 * jax.random.normal(ks[7], (c_out,), f32),
        }
        if with_res:
            p["wres"] = 0.1 * jax.random.normal(ks[8], (c_out, c_in, 1, 1), f32)
            p["bres"] = 0.1 * jax.random.normal(ks[9], (c_out,), f32)
        return p

    key = jax.random.PRNGKey(0)
    k1, k2, k3, k4 = jax.random.split(key, 4)

    # Config A: channel-changing residual (fused 1x1 conv path), f32 matmuls.
    N, C_IN, C_OUT, H, W, G = 2, 4, 16, 16, 16, 8
    params_a = make_params(k1, C_IN, C_OUT, with_res=True)
    x_a = jax.random.normal(k2, (N, C_IN, H, W), jnp.float32)

    fwd_f32 = jax.jit(functools.partial(res_conv_block, groups=G))
    out = jax.block_until_ready(fwd_f32(x_a, params_a))
    ref = jax.block_until_ready(ref_forward(x_a, params_a, groups=G))
    np.testing.assert_allclose(np.asarray(out), np.asarray(ref), rtol=1e-3, atol=1e-3)

    # Same config, bf16 MXU operands with f32 accumulation (looser tolerance).
    fwd_bf16 = jax.jit(functools.partial(res_conv_block, groups=G,
                                         matmul_dtype=jnp.bfloat16))
    out_bf16 = jax.block_until_ready(fwd_bf16(x_a, params_a))
    np.testing.assert_allclose(np.asarray(out_bf16), np.asarray(ref),
                               rtol=5e-2, atol=5e-2)

    # Config B: c_in == c_out -> identity residual fused as a plain add.
    params_b = make_params(k3, 16, 16, with_res=False)
    x_b = jax.random.normal(k4, (2, 16, H, W), jnp.float32)
    fwd_b = jax.jit(functools.partial(res_conv_block, groups=G))
    out_b = jax.block_until_ready(fwd_b(x_b, params_b))
    ref_b = jax.block_until_ready(ref_forward(x_b, params_b, groups=G))
    np.testing.assert_allclose(np.asarray(out_b), np.asarray(ref_b),
                               rtol=1e-3, atol=1e-3)

    print("KERNEL_OK")
</pallas_src>

<mosaic_0001>
module attributes {stable_mosaic.version = 11 : i64} {
  func.func @conv_block_kernel(%arg0: i32, %arg1: memref<1x18x18x4xf32, #tpu.memory_space<vmem>>, %arg2: memref<36x16xf32, #tpu.memory_space<vmem>>, %arg3: memref<1x16xf32, #tpu.memory_space<vmem>>, %arg4: memref<1x16xf32, #tpu.memory_space<vmem>>, %arg5: memref<1x16xf32, #tpu.memory_space<vmem>>, %arg6: memref<16x16xf32, #tpu.memory_space<vmem>>, %arg7: memref<1x256x16xf32, #tpu.memory_space<vmem>>) attributes {dimension_semantics = [#tpu.dimension_semantics<parallel>], iteration_bounds = array<i64: 2>, scalar_prefetch = 0 : i64, scratch_operands = 0 : i64, tpu.core_type = #tpu.core_type<tc>, window_params = [{transform_indices = @transform_0, window_bounds = array<i64: 1, 18, 18, 4>}, {pipeline_mode = #tpu.pipeline_mode<synchronous>, transform_indices = @transform_1, window_bounds = array<i64: 36, 16>}, {pipeline_mode = #tpu.pipeline_mode<synchronous>, transform_indices = @transform_2, window_bounds = array<i64: 1, 16>}, {pipeline_mode = #tpu.pipeline_mode<synchronous>, transform_indices = @transform_3, window_bounds = array<i64: 1, 16>}, {pipeline_mode = #tpu.pipeline_mode<synchronous>, transform_indices = @transform_4, window_bounds = array<i64: 1, 16>}, {pipeline_mode = #tpu.pipeline_mode<synchronous>, transform_indices = @transform_5, window_bounds = array<i64: 16, 16>}, {transform_indices = @transform_6, window_bounds = array<i64: 1, 256, 16>}]} {
    %c0 = arith.constant 0 : index
    %c0_0 = arith.constant 0 : index
    %c0_1 = arith.constant 0 : index
    %c0_2 = arith.constant 0 : index
    %0 = vector.load %arg1[%c0, %c0_0, %c0_1, %c0_2] : memref<1x18x18x4xf32, #tpu.memory_space<vmem>>, vector<1x16x16x4xf32>
    %1 = vector.shape_cast %0 : vector<1x16x16x4xf32> to vector<16x16x4xf32>
    %2 = vector.shape_cast %1 : vector<16x16x4xf32> to vector<256x4xf32>
    %c0_3 = arith.constant 0 : index
    %c0_4 = arith.constant 0 : index
    %c1 = arith.constant 1 : index
    %c0_5 = arith.constant 0 : index
    %3 = vector.load %arg1[%c0_3, %c0_4, %c1, %c0_5] : memref<1x18x18x4xf32, #tpu.memory_space<vmem>>, vector<1x16x16x4xf32>
    %4 = vector.shape_cast %3 : vector<1x16x16x4xf32> to vector<16x16x4xf32>
    %5 = vector.shape_cast %4 : vector<16x16x4xf32> to vector<256x4xf32>
    %c0_6 = arith.constant 0 : index
    %c0_7 = arith.constant 0 : index
    %c2 = arith.constant 2 : index
    %c0_8 = arith.constant 0 : index
    %6 = vector.load %arg1[%c0_6, %c0_7, %c2, %c0_8] : memref<1x18x18x4xf32, #tpu.memory_space<vmem>>, vector<1x16x16x4xf32>
    %7 = vector.shape_cast %6 : vector<1x16x16x4xf32> to vector<16x16x4xf32>
    %8 = vector.shape_cast %7 : vector<16x16x4xf32> to vector<256x4xf32>
    %c0_9 = arith.constant 0 : index
    %c1_10 = arith.constant 1 : index
    %c0_11 = arith.constant 0 : index
    %c0_12 = arith.constant 0 : index
    %9 = vector.load %arg1[%c0_9, %c1_10, %c0_11, %c0_12] : memref<1x18x18x4xf32, #tpu.memory_space<vmem>>, vector<1x16x16x4xf32>
    %10 = vector.shape_cast %9 : vector<1x16x16x4xf32> to vector<16x16x4xf32>
    %11 = vector.shape_cast %10 : vector<16x16x4xf32> to vector<256x4xf32>
    %c0_13 = arith.constant 0 : index
    %c1_14 = arith.constant 1 : index
    %c1_15 = arith.constant 1 : index
    %c0_16 = arith.constant 0 : index
    %12 = vector.load %arg1[%c0_13, %c1_14, %c1_15, %c0_16] : memref<1x18x18x4xf32, #tpu.memory_space<vmem>>, vector<1x16x16x4xf32>
    %13 = vector.shape_cast %12 : vector<1x16x16x4xf32> to vector<16x16x4xf32>
    %14 = vector.shape_cast %13 : vector<16x16x4xf32> to vector<256x4xf32>
    %c0_17 = arith.constant 0 : index
    %c1_18 = arith.constant 1 : index
    %c2_19 = arith.constant 2 : index
    %c0_20 = arith.constant 0 : index
    %15 = vector.load %arg1[%c0_17, %c1_18, %c2_19, %c0_20] : memref<1x18x18x4xf32, #tpu.memory_space<vmem>>, vector<1x16x16x4xf32>
    %16 = vector.shape_cast %15 : vector<1x16x16x4xf32> to vector<16x16x4xf32>
    %17 = vector.shape_cast %16 : vector<16x16x4xf32> to vector<256x4xf32>
    %c0_21 = arith.constant 0 : index
    %c2_22 = arith.constant 2 : index
    %c0_23 = arith.constant 0 : index
    %c0_24 = arith.constant 0 : index
    %18 = vector.load %arg1[%c0_21, %c2_22, %c0_23, %c0_24] : memref<1x18x18x4xf32, #tpu.memory_space<vmem>>, vector<1x16x16x4xf32>
    %19 = vector.shape_cast %18 : vector<1x16x16x4xf32> to vector<16x16x4xf32>
    %20 = vector.shape_cast %19 : vector<16x16x4xf32> to vector<256x4xf32>
    %c0_25 = arith.constant 0 : index
    %c2_26 = arith.constant 2 : index
    %c1_27 = arith.constant 1 : index
    %c0_28 = arith.constant 0 : index
    %21 = vector.load %arg1[%c0_25, %c2_26, %c1_27, %c0_28] : memref<1x18x18x4xf32, #tpu.memory_space<vmem>>, vector<1x16x16x4xf32>
    %22 = vector.shape_cast %21 : vector<1x16x16x4xf32> to vector<16x16x4xf32>
    %23 = vector.shape_cast %22 : vector<16x16x4xf32> to vector<256x4xf32>
    %c0_29 = arith.constant 0 : index
    %c2_30 = arith.constant 2 : index
    %c2_31 = arith.constant 2 : index
    %c0_32 = arith.constant 0 : index
    %24 = vector.load %arg1[%c0_29, %c2_30, %c2_31, %c0_32] : memref<1x18x18x4xf32, #tpu.memory_space<vmem>>, vector<1x16x16x4xf32>
    %25 = vector.shape_cast %24 : vector<1x16x16x4xf32> to vector<16x16x4xf32>
    %26 = vector.shape_cast %25 : vector<16x16x4xf32> to vector<256x4xf32>
    %27 = tpu.concatenate %2, %5, %8, %11, %14, %17, %20, %23, %26 in 1 : vector<256x4xf32>, vector<256x4xf32>, vector<256x4xf32>, vector<256x4xf32>, vector<256x4xf32>, vector<256x4xf32>, vector<256x4xf32>, vector<256x4xf32>, vector<256x4xf32> -> vector<256x36xf32>
    %c0_33 = arith.constant 0 : index
    %c0_34 = arith.constant 0 : index
    %28 = vector.load %arg2[%c0_33, %c0_34] : memref<36x16xf32, #tpu.memory_space<vmem>>, vector<36x16xf32>
    %cst = arith.constant dense<0.000000e+00> : vector<256x16xf32>
    %29 = tpu.matmul %27, %28, %cst {dimension_numbers = #tpu.dot_dimension_numbers<[1], [0], [0], [1], [0, 0, 1, 1], [], []>} : vector<256x36xf32>, vector<36x16xf32>, vector<256x16xf32> -> vector<256x16xf32>
    %c0_35 = arith.constant 0 : index
    %c0_36 = arith.constant 0 : index
    %30 = vector.load %arg3[%c0_35, %c0_36] : memref<1x16xf32, #tpu.memory_space<vmem>>, vector<1x16xf32>
    %31 = vector.broadcast %30 : vector<1x16xf32> to vector<256x16xf32>
    %32 = arith.addf %29, %31 : vector<256x16xf32>
    %cst_37 = arith.constant dense<0.000000e+00> : vector<16xf32>
    %33 = vector.multi_reduction <add>, %32, %cst_37 [0] : vector<256x16xf32> to vector<16xf32>
    %34 = vector.shape_cast %33 : vector<16xf32> to vector<1x16xf32>
    %c0_38 = arith.constant 0 : index
    %c0_39 = arith.constant 0 : index
    %35 = vector.load %arg6[%c0_38, %c0_39] : memref<16x16xf32, #tpu.memory_space<vmem>>, vector<16x16xf32>
    %cst_40 = arith.constant dense<0.000000e+00> : vector<1x16xf32>
    %36 = tpu.matmul %34, %35, %cst_40 {dimension_numbers = #tpu.dot_dimension_numbers<[1], [0], [0], [1], [0, 0, 1, 1], [], []>} : vector<1x16xf32>, vector<16x16xf32>, vector<1x16xf32> -> vector<1x16xf32>
    %cst_41 = arith.constant 0.001953125 : f32
    %37 = vector.broadcast %cst_41 : f32 to vector<1x16xf32>
    %38 = arith.mulf %36, %37 : vector<1x16xf32>
    %39 = vector.broadcast %38 : vector<1x16xf32> to vector<256x16xf32>
    %40 = arith.subf %32, %39 : vector<256x16xf32>
    %41 = arith.mulf %40, %40 : vector<256x16xf32>
    %cst_42 = arith.constant dense<0.000000e+00> : vector<16xf32>
    %42 = vector.multi_reduction <add>, %41, %cst_42 [0] : vector<256x16xf32> to vector<16xf32>
    %43 = vector.shape_cast %42 : vector<16xf32> to vector<1x16xf32>
    %c0_43 = arith.constant 0 : index
    %c0_44 = arith.constant 0 : index
    %44 = vector.load %arg6[%c0_43, %c0_44] : memref<16x16xf32, #tpu.memory_space<vmem>>, vector<16x16xf32>
    %cst_45 = arith.constant dense<0.000000e+00> : vector<1x16xf32>
    %45 = tpu.matmul %43, %44, %cst_45 {dimension_numbers = #tpu.dot_dimension_numbers<[1], [0], [0], [1], [0, 0, 1, 1], [], []>} : vector<1x16xf32>, vector<16x16xf32>, vector<1x16xf32> -> vector<1x16xf32>
    %cst_46 = arith.constant 0.001953125 : f32
    %46 = vector.broadcast %cst_46 : f32 to vector<1x16xf32>
    %47 = arith.mulf %45, %46 : vector<1x16xf32>
    %cst_47 = arith.constant 9.99999974E-6 : f32
    %48 = vector.broadcast %cst_47 : f32 to vector<1x16xf32>
    %49 = arith.addf %47, %48 : vector<1x16xf32>
    %50 = math.rsqrt %49 : vector<1x16xf32>
    %51 = vector.broadcast %50 : vector<1x16xf32> to vector<256x16xf32>
    %52 = arith.mulf %40, %51 : vector<256x16xf32>
    %c0_48 = arith.constant 0 : index
    %c0_49 = arith.constant 0 : index
    %53 = vector.load %arg4[%c0_48, %c0_49] : memref<1x16xf32, #tpu.memory_space<vmem>>, vector<1x16xf32>
    %54 = vector.broadcast %53 : vector<1x16xf32> to vector<256x16xf32>
    %55 = arith.mulf %52, %54 : vector<256x16xf32>
    %c0_50 = arith.constant 0 : index
    %c0_51 = arith.constant 0 : index
    %56 = vector.load %arg5[%c0_50, %c0_51] : memref<1x16xf32, #tpu.memory_space<vmem>>, vector<1x16xf32>
    %57 = vector.broadcast %56 : vector<1x16xf32> to vector<256x16xf32>
    %58 = arith.addf %55, %57 : vector<256x16xf32>
    %59 = arith.negf %58 : vector<256x16xf32>
    %60 = math.exp %59 : vector<256x16xf32>
    %cst_52 = arith.constant 1.000000e+00 : f32
    %61 = vector.broadcast %cst_52 : f32 to vector<256x16xf32>
    %62 = arith.addf %61, %60 : vector<256x16xf32>
    %63 = arith.divf %61, %62 : vector<256x16xf32>
    %64 = arith.mulf %58, %63 : vector<256x16xf32>
    %c0_53 = arith.constant 0 : index
    %c0_54 = arith.constant 0 : index
    %c0_55 = arith.constant 0 : index
    %65 = vector.load %arg7[%c0_53, %c0_54, %c0_55] : memref<1x256x16xf32, #tpu.memory_space<vmem>>, vector<1x256x16xf32>
    %66 = vector.shape_cast %65 : vector<1x256x16xf32> to vector<256x16xf32>
    %67 = vector.shape_cast %64 : vector<256x16xf32> to vector<1x256x16xf32>
    tpu.vector_store %arg7[%c0_53, %c0_54, %c0_55], %67 {strides = array<i32>} : memref<1x256x16xf32, #tpu.memory_space<vmem>>, vector<1x256x16xf32>,
    return
  }
  func.func @transform_0(%arg0: i32) -> (i32, i32, i32, i32) {
    %c0_i32 = arith.constant 0 : i32
    %c0_i32_0 = arith.constant 0 : i32
    %c0_i32_1 = arith.constant 0 : i32
    %c0_i32_2 = arith.constant 0 : i32
    return %arg0, %c0_i32, %c0_i32_0, %c0_i32_1 : i32, i32, i32, i32
  }
  func.func @transform_1(%arg0: i32) -> (i32, i32) {
    %c0_i32 = arith.constant 0 : i32
    %c0_i32_0 = arith.constant 0 : i32
    %c0_i32_1 = arith.constant 0 : i32
    return %c0_i32, %c0_i32_0 : i32, i32
  }
  func.func @transform_2(%arg0: i32) -> (i32, i32) {
    %c0_i32 = arith.constant 0 : i32
    %c0_i32_0 = arith.constant 0 : i32
    %c0_i32_1 = arith.constant 0 : i32
    return %c0_i32, %c0_i32_0 : i32, i32
  }
  func.func @transform_3(%arg0: i32) -> (i32, i32) {
    %c0_i32 = arith.constant 0 : i32
    %c0_i32_0 = arith.constant 0 : i32
    %c0_i32_1 = arith.constant 0 : i32
    return %c0_i32, %c0_i32_0 : i32, i32
  }
  func.func @transform_4(%arg0: i32) -> (i32, i32) {
    %c0_i32 = arith.constant 0 : i32
    %c0_i32_0 = arith.constant 0 : i32
    %c0_i32_1 = arith.constant 0 : i32
    return %c0_i32, %c0_i32_0 : i32, i32
  }
  func.func @transform_5(%arg0: i32) -> (i32, i32) {
    %c0_i32 = arith.constant 0 : i32
    %c0_i32_0 = arith.constant 0 : i32
    %c0_i32_1 = arith.constant 0 : i32
    return %c0_i32, %c0_i32_0 : i32, i32
  }
  func.func @transform_6(%arg0: i32) -> (i32, i32, i32) {
    %c0_i32 = arith.constant 0 : i32
    %c0_i32_0 = arith.constant 0 : i32
    %c0_i32_1 = arith.constant 0 : i32
    return %arg0, %c0_i32, %c0_i32_0 : i32, i32, i32
  }
}

module attributes {stable_mosaic.version = 11 : i64} {
  func.func @conv_block_kernel(%arg0: i32, %arg1: memref<1x18x18x16xf32, #tpu.memory_space<vmem>>, %arg2: memref<144x16xf32, #tpu.memory_space<vmem>>, %arg3: memref<1x16xf32, #tpu.memory_space<vmem>>, %arg4: memref<1x16xf32, #tpu.memory_space<vmem>>, %arg5: memref<1x16xf32, #tpu.memory_space<vmem>>, %arg6: memref<16x16xf32, #tpu.memory_space<vmem>>, %arg7: memref<1x256x4xf32, #tpu.memory_space<vmem>>, %arg8: memref<4x16xf32, #tpu.memory_space<vmem>>, %arg9: memref<1x16xf32, #tpu.memory_space<vmem>>, %arg10: memref<1x256x16xf32, #tpu.memory_space<vmem>>) attributes {dimension_semantics = [#tpu.dimension_semantics<parallel>], iteration_bounds = array<i64: 2>, scalar_prefetch = 0 : i64, scratch_operands = 0 : i64, tpu.core_type = #tpu.core_type<tc>, window_params = [{transform_indices = @transform_0, window_bounds = array<i64: 1, 18, 18, 16>}, {pipeline_mode = #tpu.pipeline_mode<synchronous>, transform_indices = @transform_1, window_bounds = array<i64: 144, 16>}, {pipeline_mode = #tpu.pipeline_mode<synchronous>, transform_indices = @transform_2, window_bounds = array<i64: 1, 16>}, {pipeline_mode = #tpu.pipeline_mode<synchronous>, transform_indices = @transform_3, window_bounds = array<i64: 1, 16>}, {pipeline_mode = #tpu.pipeline_mode<synchronous>, transform_indices = @transform_4, window_bounds = array<i64: 1, 16>}, {pipeline_mode = #tpu.pipeline_mode<synchronous>, transform_indices = @transform_5, window_bounds = array<i64: 16, 16>}, {transform_indices = @transform_6, window_bounds = array<i64: 1, 256, 4>}, {pipeline_mode = #tpu.pipeline_mode<synchronous>, transform_indices = @transform_7, window_bounds = array<i64: 4, 16>}, {pipeline_mode = #tpu.pipeline_mode<synchronous>, transform_indices = @transform_8, window_bounds = array<i64: 1, 16>}, {transform_indices = @transform_9, window_bounds = array<i64: 1, 256, 16>}]} {
    %c0 = arith.constant 0 : index
    %c0_0 = arith.constant 0 : index
    %c0_1 = arith.constant 0 : index
    %c0_2 = arith.constant 0 : index
    %0 = vector.load %arg1[%c0, %c0_0, %c0_1, %c0_2] : memref<1x18x18x16xf32, #tpu.memory_space<vmem>>, vector<1x16x16x16xf32>
    %1 = vector.shape_cast %0 : vector<1x16x16x16xf32> to vector<16x16x16xf32>
    %2 = vector.shape_cast %1 : vector<16x16x16xf32> to vector<256x16xf32>
    %c0_3 = arith.constant 0 : index
    %c0_4 = arith.constant 0 : index
    %c1 = arith.constant 1 : index
    %c0_5 = arith.constant 0 : index
    %3 = vector.load %arg1[%c0_3, %c0_4, %c1, %c0_5] : memref<1x18x18x16xf32, #tpu.memory_space<vmem>>, vector<1x16x16x16xf32>
    %4 = vector.shape_cast %3 : vector<1x16x16x16xf32> to vector<16x16x16xf32>
    %5 = vector.shape_cast %4 : vector<16x16x16xf32> to vector<256x16xf32>
    %c0_6 = arith.constant 0 : index
    %c0_7 = arith.constant 0 : index
    %c2 = arith.constant 2 : index
    %c0_8 = arith.constant 0 : index
    %6 = vector.load %arg1[%c0_6, %c0_7, %c2, %c0_8] : memref<1x18x18x16xf32, #tpu.memory_space<vmem>>, vector<1x16x16x16xf32>
    %7 = vector.shape_cast %6 : vector<1x16x16x16xf32> to vector<16x16x16xf32>
    %8 = vector.shape_cast %7 : vector<16x16x16xf32> to vector<256x16xf32>
    %c0_9 = arith.constant 0 : index
    %c1_10 = arith.constant 1 : index
    %c0_11 = arith.constant 0 : index
    %c0_12 = arith.constant 0 : index
    %9 = vector.load %arg1[%c0_9, %c1_10, %c0_11, %c0_12] : memref<1x18x18x16xf32, #tpu.memory_space<vmem>>, vector<1x16x16x16xf32>
    %10 = vector.shape_cast %9 : vector<1x16x16x16xf32> to vector<16x16x16xf32>
    %11 = vector.shape_cast %10 : vector<16x16x16xf32> to vector<256x16xf32>
    %c0_13 = arith.constant 0 : index
    %c1_14 = arith.constant 1 : index
    %c1_15 = arith.constant 1 : index
    %c0_16 = arith.constant 0 : index
    %12 = vector.load %arg1[%c0_13, %c1_14, %c1_15, %c0_16] : memref<1x18x18x16xf32, #tpu.memory_space<vmem>>, vector<1x16x16x16xf32>
    %13 = vector.shape_cast %12 : vector<1x16x16x16xf32> to vector<16x16x16xf32>
    %14 = vector.shape_cast %13 : vector<16x16x16xf32> to vector<256x16xf32>
    %c0_17 = arith.constant 0 : index
    %c1_18 = arith.constant 1 : index
    %c2_19 = arith.constant 2 : index
    %c0_20 = arith.constant 0 : index
    %15 = vector.load %arg1[%c0_17, %c1_18, %c2_19, %c0_20] : memref<1x18x18x16xf32, #tpu.memory_space<vmem>>, vector<1x16x16x16xf32>
    %16 = vector.shape_cast %15 : vector<1x16x16x16xf32> to vector<16x16x16xf32>
    %17 = vector.shape_cast %16 : vector<16x16x16xf32> to vector<256x16xf32>
    %c0_21 = arith.constant 0 : index
    %c2_22 = arith.constant 2 : index
    %c0_23 = arith.constant 0 : index
    %c0_24 = arith.constant 0 : index
    %18 = vector.load %arg1[%c0_21, %c2_22, %c0_23, %c0_24] : memref<1x18x18x16xf32, #tpu.memory_space<vmem>>, vector<1x16x16x16xf32>
    %19 = vector.shape_cast %18 : vector<1x16x16x16xf32> to vector<16x16x16xf32>
    %20 = vector.shape_cast %19 : vector<16x16x16xf32> to vector<256x16xf32>
    %c0_25 = arith.constant 0 : index
    %c2_26 = arith.constant 2 : index
    %c1_27 = arith.constant 1 : index
    %c0_28 = arith.constant 0 : index
    %21 = vector.load %arg1[%c0_25, %c2_26, %c1_27, %c0_28] : memref<1x18x18x16xf32, #tpu.memory_space<vmem>>, vector<1x16x16x16xf32>
    %22 = vector.shape_cast %21 : vector<1x16x16x16xf32> to vector<16x16x16xf32>
    %23 = vector.shape_cast %22 : vector<16x16x16xf32> to vector<256x16xf32>
    %c0_29 = arith.constant 0 : index
    %c2_30 = arith.constant 2 : index
    %c2_31 = arith.constant 2 : index
    %c0_32 = arith.constant 0 : index
    %24 = vector.load %arg1[%c0_29, %c2_30, %c2_31, %c0_32] : memref<1x18x18x16xf32, #tpu.memory_space<vmem>>, vector<1x16x16x16xf32>
    %25 = vector.shape_cast %24 : vector<1x16x16x16xf32> to vector<16x16x16xf32>
    %26 = vector.shape_cast %25 : vector<16x16x16xf32> to vector<256x16xf32>
    %27 = tpu.concatenate %2, %5, %8, %11, %14, %17, %20, %23, %26 in 1 : vector<256x16xf32>, vector<256x16xf32>, vector<256x16xf32>, vector<256x16xf32>, vector<256x16xf32>, vector<256x16xf32>, vector<256x16xf32>, vector<256x16xf32>, vector<256x16xf32> -> vector<256x144xf32>
    %c0_33 = arith.constant 0 : index
    %c0_34 = arith.constant 0 : index
    %28 = vector.load %arg2[%c0_33, %c0_34] : memref<144x16xf32, #tpu.memory_space<vmem>>, vector<144x16xf32>
    %cst = arith.constant dense<0.000000e+00> : vector<256x16xf32>
    %29 = tpu.matmul %27, %28, %cst {dimension_numbers = #tpu.dot_dimension_numbers<[1], [0], [0], [1], [0, 0, 1, 1], [], []>} : vector<256x144xf32>, vector<144x16xf32>, vector<256x16xf32> -> vector<256x16xf32>
    %c0_35 = arith.constant 0 : index
    %c0_36 = arith.constant 0 : index
    %30 = vector.load %arg3[%c0_35, %c0_36] : memref<1x16xf32, #tpu.memory_space<vmem>>, vector<1x16xf32>
    %31 = vector.broadcast %30 : vector<1x16xf32> to vector<256x16xf32>
    %32 = arith.addf %29, %31 : vector<256x16xf32>
    %cst_37 = arith.constant dense<0.000000e+00> : vector<16xf32>
    %33 = vector.multi_reduction <add>, %32, %cst_37 [0] : vector<256x16xf32> to vector<16xf32>
    %34 = vector.shape_cast %33 : vector<16xf32> to vector<1x16xf32>
    %c0_38 = arith.constant 0 : index
    %c0_39 = arith.constant 0 : index
    %35 = vector.load %arg6[%c0_38, %c0_39] : memref<16x16xf32, #tpu.memory_space<vmem>>, vector<16x16xf32>
    %cst_40 = arith.constant dense<0.000000e+00> : vector<1x16xf32>
    %36 = tpu.matmul %34, %35, %cst_40 {dimension_numbers = #tpu.dot_dimension_numbers<[1], [0], [0], [1], [0, 0, 1, 1], [], []>} : vector<1x16xf32>, vector<16x16xf32>, vector<1x16xf32> -> vector<1x16xf32>
    %cst_41 = arith.constant 0.001953125 : f32
    %37 = vector.broadcast %cst_41 : f32 to vector<1x16xf32>
    %38 = arith.mulf %36, %37 : vector<1x16xf32>
    %39 = vector.broadcast %38 : vector<1x16xf32> to vector<256x16xf32>
    %40 = arith.subf %32, %39 : vector<256x16xf32>
    %41 = arith.mulf %40, %40 : vector<256x16xf32>
    %cst_42 = arith.constant dense<0.000000e+00> : vector<16xf32>
    %42 = vector.multi_reduction <add>, %41, %cst_42 [0] : vector<256x16xf32> to vector<16xf32>
    %43 = vector.shape_cast %42 : vector<16xf32> to vector<1x16xf32>
    %c0_43 = arith.constant 0 : index
    %c0_44 = arith.constant 0 : index
    %44 = vector.load %arg6[%c0_43, %c0_44] : memref<16x16xf32, #tpu.memory_space<vmem>>, vector<16x16xf32>
    %cst_45 = arith.constant dense<0.000000e+00> : vector<1x16xf32>
    %45 = tpu.matmul %43, %44, %cst_45 {dimension_numbers = #tpu.dot_dimension_numbers<[1], [0], [0], [1], [0, 0, 1, 1], [], []>} : vector<1x16xf32>, vector<16x16xf32>, vector<1x16xf32> -> vector<1x16xf32>
    %cst_46 = arith.constant 0.001953125 : f32
    %46 = vector.broadcast %cst_46 : f32 to vector<1x16xf32>
    %47 = arith.mulf %45, %46 : vector<1x16xf32>
    %cst_47 = arith.constant 9.99999974E-6 : f32
    %48 = vector.broadcast %cst_47 : f32 to vector<1x16xf32>
    %49 = arith.addf %47, %48 : vector<1x16xf32>
    %50 = math.rsqrt %49 : vector<1x16xf32>
    %51 = vector.broadcast %50 : vector<1x16xf32> to vector<256x16xf32>
    %52 = arith.mulf %40, %51 : vector<256x16xf32>
    %c0_48 = arith.constant 0 : index
    %c0_49 = arith.constant 0 : index
    %53 = vector.load %arg4[%c0_48, %c0_49] : memref<1x16xf32, #tpu.memory_space<vmem>>, vector<1x16xf32>
    %54 = vector.broadcast %53 : vector<1x16xf32> to vector<256x16xf32>
    %55 = arith.mulf %52, %54 : vector<256x16xf32>
    %c0_50 = arith.constant 0 : index
    %c0_51 = arith.constant 0 : index
    %56 = vector.load %arg5[%c0_50, %c0_51] : memref<1x16xf32, #tpu.memory_space<vmem>>, vector<1x16xf32>
    %57 = vector.broadcast %56 : vector<1x16xf32> to vector<256x16xf32>
    %58 = arith.addf %55, %57 : vector<256x16xf32>
    %59 = arith.negf %58 : vector<256x16xf32>
    %60 = math.exp %59 : vector<256x16xf32>
    %cst_52 = arith.constant 1.000000e+00 : f32
    %61 = vector.broadcast %cst_52 : f32 to vector<256x16xf32>
    %62 = arith.addf %61, %60 : vector<256x16xf32>
    %63 = arith.divf %61, %62 : vector<256x16xf32>
    %64 = arith.mulf %58, %63 : vector<256x16xf32>
    %c0_53 = arith.constant 0 : index
    %c0_54 = arith.constant 0 : index
    %c0_55 = arith.constant 0 : index
    %65 = vector.load %arg7[%c0_53, %c0_54, %c0_55] : memref<1x256x4xf32, #tpu.memory_space<vmem>>, vector<1x256x4xf32>
    %66 = vector.shape_cast %65 : vector<1x256x4xf32> to vector<256x4xf32>
    %c0_56 = arith.constant 0 : index
    %c0_57 = arith.constant 0 : index
    %67 = vector.load %arg8[%c0_56, %c0_57] : memref<4x16xf32, #tpu.memory_space<vmem>>, vector<4x16xf32>
    %cst_58 = arith.constant dense<0.000000e+00> : vector<256x16xf32>
    %68 = tpu.matmul %66, %67, %cst_58 {dimension_numbers = #tpu.dot_dimension_numbers<[1], [0], [0], [1], [0, 0, 1, 1], [], []>} : vector<256x4xf32>, vector<4x16xf32>, vector<256x16xf32> -> vector<256x16xf32>
    %69 = arith.addf %64, %68 : vector<256x16xf32>
    %c0_59 = arith.constant 0 : index
    %c0_60 = arith.constant 0 : index
    %70 = vector.load %arg9[%c0_59, %c0_60] : memref<1x16xf32, #tpu.memory_space<vmem>>, vector<1x16xf32>
    %71 = vector.broadcast %70 : vector<1x16xf32> to vector<256x16xf32>
    %72 = arith.addf %69, %71 : vector<256x16xf32>
    %c0_61 = arith.constant 0 : index
    %c0_62 = arith.constant 0 : index
    %c0_63 = arith.constant 0 : index
    %73 = vector.load %arg10[%c0_61, %c0_62, %c0_63] : memref<1x256x16xf32, #tpu.memory_space<vmem>>, vector<1x256x16xf32>
    %74 = vector.shape_cast %73 : vector<1x256x16xf32> to vector<256x16xf32>
    %75 = vector.shape_cast %72 : vector<256x16xf32> to vector<1x256x16xf32>
    tpu.vector_store %arg10[%c0_61, %c0_62, %c0_63], %75 {strides = array<i32>} : memref<1x256x16xf32, #tpu.memory_space<vmem>>, vector<1x256x16xf32>,
    return
  }
  func.func @transform_0(%arg0: i32) -> (i32, i32, i32, i32) {
    %c0_i32 = arith.constant 0 : i32
    %c0_i32_0 = arith.constant 0 : i32
    %c0_i32_1 = arith.constant 0 : i32
    %c0_i32_2 = arith.constant 0 : i32
    return %arg0, %c0_i32, %c0_i32_0, %c0_i32_1 : i32, i32, i32, i32
  }
  func.func @transform_1(%arg0: i32) -> (i32, i32) {
    %c0_i32 = arith.constant 0 : i32
    %c0_i32_0 = arith.constant 0 : i32
    %c0_i32_1 = arith.constant 0 : i32
    return %c0_i32, %c0_i32_0 : i32, i32
  }
  func.func @transform_2(%arg0: i32) -> (i32, i32) {
    %c0_i32 = arith.constant 0 : i32
    %c0_i32_0 = arith.constant 0 : i32
    %c0_i32_1 = arith.constant 0 : i32
    return %c0_i32, %c0_i32_0 : i32, i32
  }
  func.func @transform_3(%arg0: i32) -> (i32, i32) {
    %c0_i32 = arith.constant 0 : i32
    %c0_i32_0 = arith.constant 0 : i32
    %c0_i32_1 = arith.constant 0 : i32
    return %c0_i32, %c0_i32_0 : i32, i32
  }
  func.func @transform_4(%arg0: i32) -> (i32, i32) {
    %c0_i32 = arith.constant 0 : i32
    %c0_i32_0 = arith.constant 0 : i32
    %c0_i32_1 = arith.constant 0 : i32
    return %c0_i32, %c0_i32_0 : i32, i32
  }
  func.func @transform_5(%arg0: i32) -> (i32, i32) {
    %c0_i32 = arith.constant 0 : i32
    %c0_i32_0 = arith.constant 0 : i32
    %c0_i32_1 = arith.constant 0 : i32
    return %c0_i32, %c0_i32_0 : i32, i32
  }
  func.func @transform_6(%arg0: i32) -> (i32, i32, i32) {
    %c0_i32 = arith.constant 0 : i32
    %c0_i32_0 = arith.constant 0 : i32
    %c0_i32_1 = arith.constant 0 : i32
    return %arg0, %c0_i32, %c0_i32_0 : i32, i32, i32
  }
  func.func @transform_7(%arg0: i32) -> (i32, i32) {
    %c0_i32 = arith.constant 0 : i32
    %c0_i32_0 = arith.constant 0 : i32
    %c0_i32_1 = arith.constant 0 : i32
    return %c0_i32, %c0_i32_0 : i32, i32
  }
  func.func @transform_8(%arg0: i32) -> (i32, i32) {
    %c0_i32 = arith.constant 0 : i32
    %c0_i32_0 = arith.constant 0 : i32
    %c0_i32_1 = arith.constant 0 : i32
    return %c0_i32, %c0_i32_0 : i32, i32
  }
  func.func @transform_9(%arg0: i32) -> (i32, i32, i32) {
    %c0_i32 = arith.constant 0 : i32
    %c0_i32_0 = arith.constant 0 : i32
    %c0_i32_1 = arith.constant 0 : i32
    return %arg0, %c0_i32, %c0_i32_0 : i32, i32, i32
  }
}

</mosaic_0001>

<bundles_post_ra>
// kernel: res_conv_block.2
= control target key start
LH: loop header
LB: loop body
LE: loop exit
PB: predicated region body
PF: predicated region fallthrough
CT: control target
= control target key end

     0   :  { %s3563_s21 = smov 0   ;;  %s5514_s0 = inlined_call_operand.vmem [shape: f32[2,18,18,4], index: 0, kind: input, shape index: {}]   ;;  %s5515_s1 = inlined_call_operand.vmem [shape: f32[36,16], index: 1, kind: input, shape index: {}]   ;;  %s5516_s2 = inlined_call_operand.vmem [shape: f32[1,16], index: 2, kind: input, shape index: {}]   ;;  %s5517_s3 = inlined_call_operand.vmem [shape: f32[1,16], index: 3, kind: input, shape index: {}]   ;;  %s5518_s4 = inlined_call_operand.vmem [shape: f32[1,16], index: 4, kind: input, shape index: {}]   ;;  %s5519_s5 = inlined_call_operand.vmem [shape: f32[16,16], index: 5, kind: input, shape index: {}]   ;;  %s5520_s6 = inlined_call_operand.vmem [shape: f32[2,256,16], index: 6, kind: output, shape index: {}]  }
   0x1 LB: > { %s2951_s22 = sadd.s32 4294967295, %s3515_s21   ;;  %p2955_p0 = scmp.ge.s32.totalorder %s3515_s21, 1  ;;  %s3515_s21 = sphi %s3563_s21, %s16_s21  }
   0x2   : > { %p212_p1 = scmp.lt.s32.totalorder %s3515_s21, 3 }
   0x4   : > { %p213_p2 = pnand %p2955_p0, %p212_p1 }
   0x6   : > { %216 = sbr.rel (%p213_p2) target bundleno = 1493 (0x5d5), region = 44 }
   0xd   : > { %p242_p3 = scmp.lt.s32.totalorder %s2951_s22, 1  ;;  %s3517_s27 = smov 8   ;;  %v1830_v11 = vld [vmem:[%s5515_s1] sm:$0xff]  ;;  %v1831_v12 = vld [vmem:[%s5515_s1 + $0x8] sm:$0xff]  ;;  %v1832_v14 = vld [vmem:[%s5515_s1 + $0x10] sm:$0xff]  ;;  %vm1939_vm0 = vcmask 1043456  }
   0xe   : > { %s3518_s28 = smov 4   ;;  %s3519_s29 = smov 12   ;;  %v3339_v13 = vpack.c.bf16 %v1831_v12, %v1830_v11  ;;  %v1833_v15 = vld [vmem:[%s5515_s1 + $0x18] sm:$0xff]  ;;  %v1834_v19 = vld [vmem:[%s5515_s1 + $0x20] sm:$0xf]  ;;  %vm1566_vm1 = vcmask 31744  }
   0xf   : > { %s5525_s22 = smov (!%p242_p3, %s2951_s22), 1  ;;  %s3520_s30 = smov 16   ;;  %v3343_v18 = vpack.c.bf16 %v1833_v15, %v1832_v14  ;;  %vm1599_vm2 = vcmask 64512   ;;  %vm1632_vm3 = vcmask 97280   ;;  %vm1665_vm4 = vcmask 130048  }
  0x10   : > { %s3359_s23 = smul.u32 432, %s5525_s22  ;;  %s3521_s7 = smov 20   ;;  %3340 = vmatprep.subr.bf16.mxu0 %v3339_v13  ;;  %3353 = vmatprep.subr.bf16.mxu1 %v3339_v13  ;;  %vm1698_vm5 = vcmask 162816   ;;  %vm1731_vm6 = vcmask 195584   ;;  %vm1764_vm7 = vcmask 228352   ;;  %vm1797_vm8 = vcmask 261120  }
  0x11   : > { %s3522_s12 = smov 24   ;;  %3342 = vmatpush3.bf16.msra.mxu0 %v3339_v13  ;;  %3356 = vmatpush3.bf16.msra.mxu1 %v3339_v13  ;;  %s3523_s17 = smov 28   ;;  %vm1842_vm9 = vcmask 293888   ;;  %vm3526_vm10 = vmmov 0  }
  0x12   : > { %s3577_s26 = scalar_lea.vmem %s5514_s0, %s3359_s23  ;;  %3344 = vmatprep.subr.bf16.mxu0 %v3343_v18  ;;  %3354 = vmatprep.subr.bf16.mxu1 %v3343_v18  ;;  %s3524_s20 = smov 32  }
  0x13   : > { %v316_v0 = vld [vmem:[%s3577_s26 + $0x2] sm:$0xff]  ;;  %v317_v2 = vld [vmem:[%s3577_s26 + $0xa] sm:$0xff]  ;;  %v3591_v5 = vld [vmem:[%s3577_s26 + $0x18] sm:$0xff]  ;;  %s3223_s9 = sshll.u32 %s5525_s22, 8 }
  0x14   : > { %v284_v1 = vld [vmem:[%s3577_s26 + $0x1] sm:$0xff]  ;;  %702 = vrot.lane.b32.xlu1 %v316_v0, %s3517_s27  ;;  %v285_v3 = vld [vmem:[%s3577_s26 + $0x9] sm:$0xff]  ;;  %v286_v6 = vld [vmem:[%s3577_s26 + $0x19] sm:$0xff] }
  0x15   : > { %574 = vrot.lane.b32.xlu0 %v284_v1, %s3518_s28  ;;  %v3588_v4 = vld [vmem:[%s3577_s26 + $0x20] sm:$0xff]  ;;  %v3607_v9 = vld [vmem:[%s3577_s26 + $0x30] sm:$0xff]  ;;  %v3630_v17 = vld [vmem:[%s3577_s26 + $0x38] sm:$0xff]  ;;  %3346 = vmatpush3.bf16.msra.mxu0 %v3343_v18 }
  0x16   : > { %v3023_v7 = vld [vmem:[%s3577_s26 + $0x1a] sm:$0xff]  ;;  %v3024_v10 = vld [vmem:[%s3577_s26 + $0x22] sm:$0xff]  ;;  %v3087_v16 = vld [vmem:[%s3577_s26 + $0x31] sm:$0xff]  ;;  %3357 = vmatpush3.bf16.msra.mxu1 %v3343_v18  ;;  %3275 = vmatprep.subr.msk.mxu0 %vm1939_vm0, %v1834_v19 }
  0x17   : > { %v2992_v8 = vld [vmem:[%s3577_s26 + $0x21] sm:$0xff]  ;;  %3355 = vmatprep.subr.msk.mxu1 %vm1939_vm0, %v1834_v19  ;;  %v3119_v20 = vld [vmem:[%s3577_s26 + $0x32] sm:$0xff]  ;;  %v3089_v24 = vld [vmem:[%s3577_s26 + $0x49] sm:$0xff] }
  0x18   : > { %704 = vrot.lane.b32.xlu1 %v317_v2, %s3517_s27  ;;  %v3088_v21 = vld [vmem:[%s3577_s26 + $0x39] sm:$0xff]  ;;  %v3653_v23 = vld [vmem:[%s3577_s26 + $0x48] sm:$0xff]  ;;  %v3663_v25 = vld [vmem:[%s3577_s26 + $0x50] sm:$0xff] }
  0x19   : > { %576 = vrot.lane.b32.xlu0 %v285_v3, %s3518_s28  ;;  %3276 = vmatpush3.msk.msra.mxu0 %vm1939_vm0, %v1834_v19  ;;  %v3120_v22 = vld [vmem:[%s3577_s26 + $0x3a] sm:$0xff]  ;;  %v3121_v26 = vld [vmem:[%s3577_s26 + $0x4a] sm:$0xff]  ;;  %v3122_v28 = vld [vmem:[%s3577_s26 + $0x52] sm:$0xff] }
  0x1a   : > { %3358 = vmatpush3.msk.msra.mxu1 %vm1939_vm0, %v1834_v19  ;;  %v3090_v27 = vld [vmem:[%s3577_s26 + $0x51] sm:$0xff]  ;;  %v3683_v29 = vld [vmem:[%s3577_s26 + $0x60] sm:$0xff]  ;;  %v3693_v31 = vld [vmem:[%s3577_s26 + $0x68] sm:$0xff] }
  0x1b   : > { %v3091_v30 = vld [vmem:[%s3577_s26 + $0x61] sm:$0xff]  ;;  %v3092_v33 = vld [vmem:[%s3577_s26 + $0x69] sm:$0xff]  ;;  %v3713_v37 = vld [vmem:[%s3577_s26 + $0x78] sm:$0xff] }
  0x1c   : > { %832 = vrot.lane.b32.xlu1 %v3588_v4, %s3519_s29  ;;  %v3123_v32 = vld [vmem:[%s3577_s26 + $0x62] sm:$0xff]  ;;  %v3124_v34 = vld [vmem:[%s3577_s26 + $0x6a] sm:$0xff]  ;;  %v3093_v42 = vld [vmem:[%s3577_s26 + $0x79] sm:$0xff] }
  0x1d   : > { %830 = vrot.lane.b32.xlu0 %v3591_v5, %s3519_s29  ;;  %v3727_v43 = vld [vmem:[%s3577_s26 + $0x80] sm:$0xff]  ;;  %v3760_v62 = vld [vmem:[%s3577_s26 + $0x90] sm:$0xff]  ;;  %v253_v2 = vld [vmem:[%s3577_s26 + $0x8] sm:$0xff] }
  0x1e   : > { %v3125_v48 = vld [vmem:[%s3577_s26 + $0x7a] sm:$0xff]  ;;  %v3126_v54 = vld [vmem:[%s3577_s26 + $0x82] sm:$0xff]  ;;  %v3095_v15 = vld [vmem:[%s3577_s26 + $0x91] sm:$0xff] }
  0x1f   : > { %v3094_v49 = vld [vmem:[%s3577_s26 + $0x81] sm:$0xff] }
  0x20   : > { %578 = vrot.lane.b32.xlu1 %v286_v6, %s3518_s28  ;;  %v252_v57 = vld [vmem:[%s3577_s26] sm:$0xff] }
  0x21   : > { %958 = vrot.lane.b32.xlu0 %v286_v6, %s3520_s30 }
  0x24   : > { %1086 = vrot.lane.b32.xlu1 %v3023_v7, %s3521_s7 }
  0x25   : > { %960 = vrot.lane.b32.xlu0 %v2992_v8, %s3520_s30 }
  0x28   : > { %706 = vrot.lane.b32.xlu1 %v3023_v7, %s3517_s27 }
  0x29   : > { %580 = vrot.lane.b32.xlu0 %v2992_v8, %s3518_s28 }
  0x2c   : > { %1214 = vrot.lane.b32.xlu1 %v3607_v9, %s3522_s12 }
  0x2d   : > { %1088 = vrot.lane.b32.xlu0 %v3024_v10, %s3521_s7 }
  0x30   : > { %834 = vrot.lane.b32.xlu1 %v3607_v9, %s3519_s29 }
  0x31   : > { %708 = vrot.lane.b32.xlu0 %v3024_v10, %s3517_s27 }
  0x34   : > { %1342 = vrot.lane.b32.xlu1 %v3087_v16, %s3523_s17 }
  0x35   : > { %1216 = vrot.lane.b32.xlu0 %v3630_v17, %s3522_s12 }
  0x38   : > { %962 = vrot.lane.b32.xlu1 %v3087_v16, %s3520_s30 }
  0x39   : > { %836 = vrot.lane.b32.xlu0 %v3630_v17, %s3519_s29 }
  0x3c   : > { %1470 = vrot.lane.b32.xlu1 %v3119_v20, %s3524_s20 }
  0x3d   : > { %1344 = vrot.lane.b32.xlu0 %v3088_v21, %s3523_s17 }
  0x40   : > { %964 = vrot.lane.b32.xlu1 %v3088_v21, %s3520_s30 }
  0x41   : > { %582 = vrot.lane.b32.xlu0 %v3087_v16, %s3518_s28  ;;  %v3785_v16 = vld [vmem:[%s3577_s26 + $0x98] sm:$0xff] }
  0x44   : > { %1472 = vrot.lane.b32.xlu1 %v3120_v22, %s3524_s20 }
  0x45   : > { %1090 = vrot.lane.b32.xlu0 %v3119_v20, %s3521_s7 }
  0x48   : > { %710 = vrot.lane.b32.xlu1 %v3119_v20, %s3517_s27 }
  0x49   : > { %584 = vrot.lane.b32.xlu0 %v3088_v21, %s3518_s28 }
  0x4c   : > { %1218 = vrot.lane.b32.xlu1 %v3653_v23, %s3522_s12 }
  0x4d   : > { %1092 = vrot.lane.b32.xlu0 %v3120_v22, %s3521_s7 }
  0x50   : > { %838 = vrot.lane.b32.xlu1 %v3653_v23, %s3519_s29 }
  0x51   : > { %712 = vrot.lane.b32.xlu0 %v3120_v22, %s3517_s27 }
  0x54   : > { %1346 = vrot.lane.b32.xlu1 %v3089_v24, %s3523_s17 }
  0x55   : > { %1220 = vrot.lane.b32.xlu0 %v3663_v25, %s3522_s12 }
  0x58   : > { %966 = vrot.lane.b32.xlu1 %v3089_v24, %s3520_s30 }
  0x59   : > { %840 = vrot.lane.b32.xlu0 %v3663_v25, %s3519_s29 }
  0x5c   : > { %1474 = vrot.lane.b32.xlu1 %v3121_v26, %s3524_s20 }
  0x5d   : > { %1348 = vrot.lane.b32.xlu0 %v3090_v27, %s3523_s17 }
  0x60   : > { %968 = vrot.lane.b32.xlu1 %v3090_v27, %s3520_s30 }
  0x61   : > { %586 = vrot.lane.b32.xlu0 %v3089_v24, %s3518_s28 }
  0x64   : > { %1476 = vrot.lane.b32.xlu1 %v3122_v28, %s3524_s20 }
  0x65   : > { %1094 = vrot.lane.b32.xlu0 %v3121_v26, %s3521_s7 }
  0x68   : > { %714 = vrot.lane.b32.xlu1 %v3121_v26, %s3517_s27 }
  0x69   : > { %588 = vrot.lane.b32.xlu0 %v3090_v27, %s3518_s28 }
  0x6c   : > { %1222 = vrot.lane.b32.xlu1 %v3683_v29, %s3522_s12 }
  0x6d   : > { %1096 = vrot.lane.b32.xlu0 %v3122_v28, %s3521_s7 }
  0x70   : > { %842 = vrot.lane.b32.xlu1 %v3683_v29, %s3519_s29 }
  0x71   : > { %716 = vrot.lane.b32.xlu0 %v3122_v28, %s3517_s27 }
  0x74   : > { %1350 = vrot.lane.b32.xlu1 %v3091_v30, %s3523_s17 }
  0x75   : > { %1224 = vrot.lane.b32.xlu0 %v3693_v31, %s3522_s12 }
  0x78   : > { %970 = vrot.lane.b32.xlu1 %v3091_v30, %s3520_s30 }
  0x79   : > { %844 = vrot.lane.b32.xlu0 %v3693_v31, %s3519_s29 }
  0x7c   : > { %1478 = vrot.lane.b32.xlu1 %v3123_v32, %s3524_s20 }
  0x7d   : > { %1352 = vrot.lane.b32.xlu0 %v3092_v33, %s3523_s17 }
  0x80   : > { %972 = vrot.lane.b32.xlu1 %v3092_v33, %s3520_s30 }
  0x81   : > { %590 = vrot.lane.b32.xlu0 %v3091_v30, %s3518_s28 }
  0x84   : > { %1480 = vrot.lane.b32.xlu1 %v3124_v34, %s3524_s20 }
  0x85   : > { %1098 = vrot.lane.b32.xlu0 %v3123_v32, %s3521_s7 }
  0x86   : > { %v703_v35 = vpop.permute.xlu1 %702 }
  0x87   : > { %v575_v36 = vpop.permute.xlu0 %574 }
  0x88   : > { %718 = vrot.lane.b32.xlu1 %v3123_v32, %s3517_s27  ;;  %v1567_v58 = vsel %vm1566_vm1, %v252_v57, %v575_v36  ;;  %v3127_v32 = vld [vmem:[%s3577_s26 + $0x92] sm:$0xff] }
  0x89   : > { %592 = vrot.lane.b32.xlu0 %v3092_v33, %s3518_s28  ;;  %v1600_v61 = vsel %vm1599_vm2, %v1567_v58, %v703_v35  ;;  %v3096_v33 = vld [vmem:[%s3577_s26 + $0x99] sm:$0xff] }
  0x8a   : > { %v3715_v38 = vpop.permute.xlu1 %704 }
  0x8b   : > { %v577_v39 = vpop.permute.xlu0 %576 }
  0x8c   : > { %1226 = vrot.lane.b32.xlu1 %v3713_v37, %s3522_s12  ;;  %v1568_v8 = vsel %vm1566_vm1, %v253_v2, %v577_v39  ;;  %v3128_v39 = vld [vmem:[%s3577_s26 + $0x9a] sm:$0xff] }
  0x8d   : > { %1100 = vrot.lane.b32.xlu0 %v3124_v34, %s3521_s7  ;;  %v1601_v14 = vsel %vm1599_vm2, %v1568_v8, %v3715_v38 }
  0x8e   : > { %v3720_v40 = vpop.permute.xlu1 %832 }
  0x8f   : > { %v831_v41 = vpop.permute.xlu0 %830  ;;  %v1634_v18 = vsel %vm1632_vm3, %v1601_v14, %v3720_v40 }
  0x90   : > { %846 = vrot.lane.b32.xlu1 %v3713_v37, %s3519_s29  ;;  %v1633_v63 = vsel %vm1632_vm3, %v1600_v61, %v831_v41  ;;  %v3097_v61 = vld [vmem:[%s3577_s26 + $0xa9] sm:$0xff] }
  0x91   : > { %720 = vrot.lane.b32.xlu0 %v3124_v34, %s3517_s27 }
  0x92   : > { %v3729_v44 = vpop.permute.xlu1 %578 }
  0x93   : > { %v959_v45 = vpop.permute.xlu0 %958 }
  0x94   : > { %1354 = vrot.lane.b32.xlu1 %v3093_v42, %s3523_s17  ;;  %v1666_v3 = vsel %vm1665_vm4, %v1633_v63, %v959_v45  ;;  %v3854_v63 = vld [vmem:[%s3577_s26 + $0xb0] sm:$0xff] }
  0x95   : > { %1228 = vrot.lane.b32.xlu0 %v3727_v43, %s3522_s12 }
  0x96   : > { %v1087_v46 = vpop.permute.xlu1 %1086 }
  0x97   : > { %v961_v47 = vpop.permute.xlu0 %960  ;;  %v1699_v6 = vsel %vm1698_vm5, %v1666_v3, %v1087_v46  ;;  %v1569_v46 = vsel %vm1566_vm1, %v3591_v5, %v3729_v44 }
  0x98   : > { %974 = vrot.lane.b32.xlu1 %v3093_v42, %s3520_s30  ;;  %v1667_v21 = vsel %vm1665_vm4, %v1634_v18, %v961_v47  ;;  %v3130_v18 = vld [vmem:[%s3577_s26 + $0xb2] sm:$0xff] }
  0x99   : > { %848 = vrot.lane.b32.xlu0 %v3727_v43, %s3519_s29 }
  0x9a   : > { %v3739_v50 = vpop.permute.xlu1 %706 }
  0x9b   : > { %v3741_v51 = vpop.permute.xlu0 %580  ;;  %v1602_v47 = vsel %vm1599_vm2, %v1569_v46, %v3739_v50  ;;  %v3099_v46 = vld [vmem:[%s3577_s26 + $0xc1] sm:$0xff] }
  0x9c   : > { %1482 = vrot.lane.b32.xlu1 %v3125_v48, %s3524_s20 }
  0x9d   : > { %1356 = vrot.lane.b32.xlu0 %v3094_v49, %s3523_s17 }
  0x9e   : > { %v1215_v52 = vpop.permute.xlu1 %1214 }
  0x9f   : > { %v1089_v53 = vpop.permute.xlu0 %1088  ;;  %v1732_v7 = vsel %vm1731_vm6, %v1699_v6, %v1215_v52 }
  0xa0   : > { %976 = vrot.lane.b32.xlu1 %v3094_v49, %s3520_s30  ;;  %v1700_v22 = vsel %vm1698_vm5, %v1667_v21, %v1089_v53 }
  0xa1   : > { %594 = vrot.lane.b32.xlu0 %v3093_v42, %s3518_s28 }
  0xa2   : > { %v3748_v55 = vpop.permute.xlu1 %834 }
  0xa3   : > { %v3750_v56 = vpop.permute.xlu0 %708 }
  0xa4   : > { %1484 = vrot.lane.b32.xlu1 %v3126_v54, %s3524_s20 }
  0xa5   : > { %1102 = vrot.lane.b32.xlu0 %v3125_v48, %s3521_s7 }
  0xa6   : > { %v1343_v59 = vpop.permute.xlu1 %1342 }
  0xa7   : > { %v1217_v60 = vpop.permute.xlu0 %1216  ;;  %v1765_v10 = vsel %vm1764_vm7, %v1732_v7, %v1343_v59  ;;  %v1570_v59 = vsel %vm1566_vm1, %v3588_v4, %v3741_v51 }
  0xa8   : > { %722 = vrot.lane.b32.xlu1 %v3125_v48, %s3517_s27  ;;  %v1733_v24 = vsel %vm1731_vm6, %v1700_v22, %v1217_v60  ;;  %v3828_v48 = vld [vmem:[%s3577_s26 + $0xa8] sm:$0xff]  ;;  %v1603_v60 = vsel %vm1599_vm2, %v1570_v59, %v3750_v56 }
  0xa9   : > { %596 = vrot.lane.b32.xlu0 %v3094_v49, %s3518_s28  ;;  %v1635_v49 = vsel %vm1632_vm3, %v1602_v47, %v3748_v55  ;;  %v3922_v47 = vld [vmem:[%s3577_s26 + $0xc8] sm:$0xff] }
  0xaa   : > { %v3763_v0 = vpop.permute.xlu1 %962 }
  0xab   : > { %v3765_v1 = vpop.permute.xlu0 %836  ;;  %v1668_v5 = vsel %vm1665_vm4, %v1635_v49, %v3763_v0 }
  0xac   : > { %1230 = vrot.lane.b32.xlu1 %v3760_v62, %s3522_s12  ;;  %v1636_v0 = vsel %vm1632_vm3, %v1603_v60, %v3765_v1 }
  0xad   : > { %1104 = vrot.lane.b32.xlu0 %v3126_v54, %s3521_s7 }
  0xae   : > { %v1471_v11 = vpop.permute.xlu1 %1470 }
  0xaf   : > { %v1345_v12 = vpop.permute.xlu0 %1344  ;;  %v1798_v13 = vsel %vm1797_vm8, %v1765_v10, %v1471_v11  ;;  %v3129_v10 = vld [vmem:[%s3577_s26 + $0xaa] sm:$0xff] }
  0xb0   : > { %850 = vrot.lane.b32.xlu1 %v3760_v62, %s3519_s29  ;;  %3277 = vmatprep.mubr.msk.f32.mxu0 %vm1842_vm9, %v1798_v13  ;;  %v1766_v26 = vsel %vm1764_vm7, %v1733_v24, %v1345_v12  ;;  %v3098_v11 = vld [vmem:[%s3577_s26 + $0xb1] sm:$0xff] }
  0xb1   : > { %724 = vrot.lane.b32.xlu0 %v3126_v54, %s3517_s27 }
  0xb2   : > { %v965_v19 = vpop.permute.xlu1 %964 }
  0xb3   : > { %v3789_v20 = vpop.permute.xlu0 %582  ;;  %v1669_v51 = vsel %vm1665_vm4, %v1636_v0, %v965_v19  ;;  %v3132_v0 = vld [vmem:[%s3577_s26 + $0xca] sm:$0xff] }
  0xb4   : > { %1358 = vrot.lane.b32.xlu1 %v3095_v15, %s3523_s17 }
  0xb5   : > { %1232 = vrot.lane.b32.xlu0 %v3785_v16, %s3522_s12 }
  0xb6   : > { %v1473_v27 = vpop.permute.xlu1 %1472 }
  0xb7   : > { %v1091_v28 = vpop.permute.xlu0 %1090  ;;  %v1799_v30 = vsel %vm1797_vm8, %v1766_v26, %v1473_v27  ;;  %v1571_v26 = vsel %vm1566_vm1, %v3607_v9, %v3789_v20 }
  0xb8   : > { %978 = vrot.lane.b32.xlu1 %v3095_v15, %s3520_s30  ;;  %3278 = vmatmul.mubr.msk.f32.vlgmr.msra.gmra.mrb[0].mxu0 %vm1842_vm9, %v1799_v30  ;;  %v1701_v44 = vsel %vm1698_vm5, %v1668_v5, %v1091_v28  ;;  %v3897_v28 = vld [vmem:[%s3577_s26 + $0xc0] sm:$0xff] }
  0xb9   : > { %852 = vrot.lane.b32.xlu0 %v3785_v16, %s3519_s29 }
  0xba   : > { %v3805_v34 = vpop.permute.xlu1 %710 }
  0xbb   : > { %v3807_v35 = vpop.permute.xlu0 %584  ;;  %v1604_v27 = vsel %vm1599_vm2, %v1571_v26, %v3805_v34  ;;  %v3101_v26 = vld [vmem:[%s3577_s26 + $0xd9] sm:$0xff] }
  0xbc   : > { %1486 = vrot.lane.b32.xlu1 %v3127_v32, %s3524_s20 }
  0xbd   : > { %1360 = vrot.lane.b32.xlu0 %v3096_v33, %s3523_s17 }
  0xbe   : > { %v1219_v36 = vpop.permute.xlu1 %1218 }
  0xbf   : > { %v1093_v38 = vpop.permute.xlu0 %1092  ;;  %v1734_v50 = vsel %vm1731_vm6, %v1701_v44, %v1219_v36 }
  0xc0   : > { %980 = vrot.lane.b32.xlu1 %v3096_v33, %s3520_s30  ;;  %v1702_v3 = vsel %vm1698_vm5, %v1669_v51, %v1093_v38 }
  0xc1   : > { %598 = vrot.lane.b32.xlu0 %v3095_v15, %s3518_s28 }
  0xc2   : > { %v3814_v40 = vpop.permute.xlu1 %838 }
  0xc3   : > { %v3816_v41 = vpop.permute.xlu0 %712  ;;  %v1637_v30 = vsel %vm1632_vm3, %v1604_v27, %v3814_v40  ;;  %v3990_v27 = vld [vmem:[%s3577_s26 + $0xe0] sm:$0xff] }
  0xc4   : > { %1488 = vrot.lane.b32.xlu1 %v3128_v39, %s3524_s20 }
  0xc5   : > { %1106 = vrot.lane.b32.xlu0 %v3127_v32, %s3521_s7 }
  0xc6   : > { %v1347_v42 = vpop.permute.xlu1 %1346 }
  0xc7   : > { %v1221_v45 = vpop.permute.xlu0 %1220  ;;  %v1767_v54 = vsel %vm1764_vm7, %v1734_v50, %v1347_v42  ;;  %v1572_v42 = vsel %vm1566_vm1, %v3630_v17, %v3807_v35 }
  0xc8   : > { %726 = vrot.lane.b32.xlu1 %v3127_v32, %s3517_s27  ;;  %v1735_v56 = vsel %vm1731_vm6, %v1702_v3, %v1221_v45  ;;  %v1605_v45 = vsel %vm1599_vm2, %v1572_v42, %v3816_v41 }
  0xc9   : > { %600 = vrot.lane.b32.xlu0 %v3096_v33, %s3518_s28 }
  0xca   : > { %v967_v52 = vpop.permute.xlu1 %966 }
  0xcb   : > { %v3832_v53 = vpop.permute.xlu0 %840  ;;  %v1670_v36 = vsel %vm1665_vm4, %v1637_v30, %v967_v52 }
  0xcc   : > { %1234 = vrot.lane.b32.xlu1 %v3828_v48, %s3522_s12  ;;  %v1638_v49 = vsel %vm1632_vm3, %v1605_v45, %v3832_v53 }
  0xcd   : > { %1108 = vrot.lane.b32.xlu0 %v3128_v39, %s3521_s7 }
  0xce   : > { %v1475_v55 = vpop.permute.xlu1 %1474 }
  0xcf   : > { %v1349_v57 = vpop.permute.xlu0 %1348  ;;  %v1800_v58 = vsel %vm1797_vm8, %v1767_v54, %v1475_v55  ;;  %v3131_v55 = vld [vmem:[%s3577_s26 + $0xc2] sm:$0xff] }
  0xd0   : > { %854 = vrot.lane.b32.xlu1 %v3828_v48, %s3519_s29  ;;  %3280 = vmatprep.mubr.msk.f32.mxu0 %vm1842_vm9, %v1800_v58  ;;  %v1768_v6 = vsel %vm1764_vm7, %v1735_v56, %v1349_v57  ;;  %v3100_v57 = vld [vmem:[%s3577_s26 + $0xc9] sm:$0xff] }
  0xd1   : > { %728 = vrot.lane.b32.xlu0 %v3128_v39, %s3517_s27 }
  0xd2   : > { %v969_v2 = vpop.permute.xlu1 %968 }
  0xd3   : > { %v3858_v4 = vpop.permute.xlu0 %586  ;;  %v1671_v35 = vsel %vm1665_vm4, %v1638_v49, %v969_v2  ;;  %v3134_v49 = vld [vmem:[%s3577_s26 + $0xe2] sm:$0xff] }
  0xd4   : > { %1362 = vrot.lane.b32.xlu1 %v3097_v61, %s3523_s17 }
  0xd5   : > { %1236 = vrot.lane.b32.xlu0 %v3854_v63, %s3522_s12 }
  0xd6   : > { %v1477_v7 = vpop.permute.xlu1 %1476 }
  0xd7   : > { %v1095_v1 = vpop.permute.xlu0 %1094  ;;  %v1801_v8 = vsel %vm1797_vm8, %v1768_v6, %v1477_v7  ;;  %v1573_v6 = vsel %vm1566_vm1, %v3653_v23, %v3858_v4 }
  0xd8   : > { %982 = vrot.lane.b32.xlu1 %v3097_v61, %s3520_s30  ;;  %3281 = vmatmul.mubr.msk.f32.gmra.mrb[2].mxu0 %vm1842_vm9, %v1801_v8  ;;  %v1703_v9 = vsel %vm1698_vm5, %v1670_v36, %v1095_v1  ;;  %v3965_v1 = vld [vmem:[%s3577_s26 + $0xd8] sm:$0xff] }
  0xd9   : > { %856 = vrot.lane.b32.xlu0 %v3854_v63, %s3519_s29 }
  0xda   : > { %v3874_v12 = vpop.permute.xlu1 %714 }
  0xdb   : > { %v3876_v13 = vpop.permute.xlu0 %588  ;;  %v1606_v7 = vsel %vm1599_vm2, %v1573_v6, %v3874_v12  ;;  %v3103_v6 = vld [vmem:[%s3577_s26 + $0xf1] sm:$0xff] }
  0xdc   : > { %1490 = vrot.lane.b32.xlu1 %v3129_v10, %s3524_s20 }
  0xdd   : > { %1364 = vrot.lane.b32.xlu0 %v3098_v11, %s3523_s17 }
  0xde   : > { %v1223_v14 = vpop.permute.xlu1 %1222 }
  0xdf   : > { %v1097_v15 = vpop.permute.xlu0 %1096  ;;  %v1736_v20 = vsel %vm1731_vm6, %v1703_v9, %v1223_v14 }
  0xe0   : > { %984 = vrot.lane.b32.xlu1 %v3098_v11, %s3520_s30  ;;  %v1704_v5 = vsel %vm1698_vm5, %v1671_v35, %v1097_v15 }
  0xe1   : > { %602 = vrot.lane.b32.xlu0 %v3097_v61, %s3518_s28 }
  0xe2   : > { %v3883_v19 = vpop.permute.xlu1 %842 }
  0xe3   : > { %v3885_v21 = vpop.permute.xlu0 %716  ;;  %v1639_v8 = vsel %vm1632_vm3, %v1606_v7, %v3883_v19  ;;  %v4058_v7 = vld [vmem:[%s3577_s26 + $0xf8] sm:$0xff] }
  0xe4   : > { %1492 = vrot.lane.b32.xlu1 %v3130_v18, %s3524_s20 }
  0xe5   : > { %1110 = vrot.lane.b32.xlu0 %v3129_v10, %s3521_s7 }
  0xe6   : > { %v1351_v22 = vpop.permute.xlu1 %1350 }
  0xe7   : > { %v1225_v24 = vpop.permute.xlu0 %1224  ;;  %v1769_v34 = vsel %vm1764_vm7, %v1736_v20, %v1351_v22  ;;  %v1574_v22 = vsel %vm1566_vm1, %v3663_v25, %v3876_v13 }
  0xe8   : > { %730 = vrot.lane.b32.xlu1 %v3129_v10, %s3517_s27  ;;  %v1737_v41 = vsel %vm1731_vm6, %v1704_v5, %v1225_v24  ;;  %v1607_v24 = vsel %vm1599_vm2, %v1574_v22, %v3885_v21 }
  0xe9   : > { %604 = vrot.lane.b32.xlu0 %v3098_v11, %s3518_s28 }
  0xea   : > { %v971_v32 = vpop.permute.xlu1 %970 }
  0xeb   : > { %v3901_v33 = vpop.permute.xlu0 %844  ;;  %v1672_v14 = vsel %vm1665_vm4, %v1639_v8, %v971_v32 }
  0xec   : > { %1238 = vrot.lane.b32.xlu1 %v3897_v28, %s3522_s12  ;;  %v1640_v30 = vsel %vm1632_vm3, %v1607_v24, %v3901_v33 }
  0xed   : > { %1112 = vrot.lane.b32.xlu0 %v3130_v18, %s3521_s7 }
  0xee   : > { %v1479_v38 = vpop.permute.xlu1 %1478 }
  0xef   : > { %v1353_v39 = vpop.permute.xlu0 %1352  ;;  %v1802_v40 = vsel %vm1797_vm8, %v1769_v34, %v1479_v38  ;;  %v3133_v38 = vld [vmem:[%s3577_s26 + $0xda] sm:$0xff] }
  0xf0   : > { %858 = vrot.lane.b32.xlu1 %v3897_v28, %s3519_s29  ;;  %3283 = vmatprep.mubr.msk.f32.mxu0 %vm1842_vm9, %v1802_v40  ;;  %v1770_v44 = vsel %vm1764_vm7, %v1737_v41, %v1353_v39  ;;  %v3102_v39 = vld [vmem:[%s3577_s26 + $0xe1] sm:$0xff] }
  0xf1   : > { %732 = vrot.lane.b32.xlu0 %v3130_v18, %s3517_s27 }
  0xf2   : > { %v973_v52 = vpop.permute.xlu1 %972 }
  0xf3   : > { %v3926_v17 = vpop.permute.xlu0 %590  ;;  %v1673_v13 = vsel %vm1665_vm4, %v1640_v30, %v973_v52  ;;  %v3136_v30 = vld [vmem:[%s3577_s26 + $0xfa] sm:$0xff] }
  0xf4   : > { %1366 = vrot.lane.b32.xlu1 %v3099_v46, %s3523_s17 }
  0xf5   : > { %1240 = vrot.lane.b32.xlu0 %v3922_v47, %s3522_s12 }
  0xf6   : > { %v1481_v50 = vpop.permute.xlu1 %1480 }
  0xf7   : > { %v1099_v53 = vpop.permute.xlu0 %1098  ;;  %v1803_v54 = vsel %vm1797_vm8, %v1770_v44, %v1481_v50  ;;  %v1575_v44 = vsel %vm1566_vm1, %v3683_v29, %v3926_v17 }
  0xf8   : > { %986 = vrot.lane.b32.xlu1 %v3099_v46, %s3520_s30  ;;  %3284 = vmatmul.mubr.msk.f32.gmra.mrb[4].mxu0 %vm1842_vm9, %v1803_v54  ;;  %v1705_v23 = vsel %vm1698_vm5, %v1672_v14, %v1099_v53  ;;  %v4033_v53 = vld [vmem:[%s3577_s26 + $0xf0] sm:$0xff] }
  0xf9   : > { %860 = vrot.lane.b32.xlu0 %v3922_v47, %s3519_s29 }
  0xfa   : > { %v3942_v58 = vpop.permute.xlu1 %718 }
  0xfb   : > { %v3944_v59 = vpop.permute.xlu0 %592  ;;  %v1608_v50 = vsel %vm1599_vm2, %v1575_v44, %v3942_v58  ;;  %v3105_v44 = vld [vmem:[%s3577_s26 + $0x109] sm:$0xff] }
  0xfc   : > { %1494 = vrot.lane.b32.xlu1 %v3131_v55, %s3524_s20 }
  0xfd   : > { %1368 = vrot.lane.b32.xlu0 %v3100_v57, %s3523_s17 }
  0xfe   : > { %v1227_v60 = vpop.permute.xlu1 %1226 }
  0xff   : > { %v1101_v61 = vpop.permute.xlu0 %1100  ;;  %v1738_v4 = vsel %vm1731_vm6, %v1705_v23, %v1227_v60 }
 0x100   : > { %988 = vrot.lane.b32.xlu1 %v3100_v57, %s3520_s30  ;;  %v1706_v36 = vsel %vm1698_vm5, %v1673_v13, %v1101_v61 }
 0x101   : > { %606 = vrot.lane.b32.xlu0 %v3099_v46, %s3518_s28 }
 0x102   : > { %v3951_v2 = vpop.permute.xlu1 %846 }
 0x103   : > { %v3953_v51 = vpop.permute.xlu0 %720  ;;  %v1641_v54 = vsel %vm1632_vm3, %v1608_v50, %v3951_v2  ;;  %v4126_v50 = vld [vmem:[%s3577_s26 + $0x110] sm:$0xff] }
 0x104   : > { %1496 = vrot.lane.b32.xlu1 %v3132_v0, %s3524_s20 }
 0x105   : > { %1114 = vrot.lane.b32.xlu0 %v3131_v55, %s3521_s7 }
 0x106   : > { %v1355_v3 = vpop.permute.xlu1 %1354 }
 0x107   : > { %v1229_v56 = vpop.permute.xlu0 %1228  ;;  %v1771_v12 = vsel %vm1764_vm7, %v1738_v4, %v1355_v3  ;;  %v1576_v3 = vsel %vm1566_vm1, %v3693_v31, %v3944_v59 }
 0x108   : > { %734 = vrot.lane.b32.xlu1 %v3131_v55, %s3517_s27  ;;  %v1739_v21 = vsel %vm1731_vm6, %v1706_v36, %v1229_v56  ;;  %v1609_v56 = vsel %vm1599_vm2, %v1576_v3, %v3953_v51 }
 0x109   : > { %608 = vrot.lane.b32.xlu0 %v3100_v57, %s3518_s28 }
 0x10a   : > { %v975_v10 = vpop.permute.xlu1 %974 }
 0x10b   : > { %v3969_v11 = vpop.permute.xlu0 %848  ;;  %v1674_v60 = vsel %vm1665_vm4, %v1641_v54, %v975_v10 }
 0x10c   : > { %1242 = vrot.lane.b32.xlu1 %v3965_v1, %s3522_s12  ;;  %v1642_v8 = vsel %vm1632_vm3, %v1609_v56, %v3969_v11 }
 0x10d   : > { %1116 = vrot.lane.b32.xlu0 %v3132_v0, %s3521_s7 }
 0x10e   : > { %v1483_v15 = vpop.permute.xlu1 %1482 }
 0x10f   : > { %v1357_v18 = vpop.permute.xlu0 %1356  ;;  %v1804_v19 = vsel %vm1797_vm8, %v1771_v12, %v1483_v15  ;;  %v3135_v15 = vld [vmem:[%s3577_s26 + $0xf2] sm:$0xff] }
 0x110   : > { %862 = vrot.lane.b32.xlu1 %v3965_v1, %s3519_s29  ;;  %3286 = vmatprep.mubr.msk.f32.mxu0 %vm1842_vm9, %v1804_v19  ;;  %v1772_v9 = vsel %vm1764_vm7, %v1739_v21, %v1357_v18  ;;  %v3104_v18 = vld [vmem:[%s3577_s26 + $0xf9] sm:$0xff] }
 0x111   : > { %736 = vrot.lane.b32.xlu0 %v3132_v0, %s3517_s27 }
 0x112   : > { %v977_v32 = vpop.permute.xlu1 %976 }
 0x113   : > { %v3994_v25 = vpop.permute.xlu0 %594  ;;  %v1675_v59 = vsel %vm1665_vm4, %v1642_v8, %v977_v32  ;;  %v3138_v8 = vld [vmem:[%s3577_s26 + $0x112] sm:$0xff] }
 0x114   : > { %1370 = vrot.lane.b32.xlu1 %v3101_v26, %s3523_s17 }
 0x115   : > { %1244 = vrot.lane.b32.xlu0 %v3990_v27, %s3522_s12 }
 0x116   : > { %v1485_v20 = vpop.permute.xlu1 %1484 }
 0x117   : > { %v1103_v33 = vpop.permute.xlu0 %1102  ;;  %v1805_v34 = vsel %vm1797_vm8, %v1772_v9, %v1485_v20  ;;  %v1577_v9 = vsel %vm1566_vm1, %v3713_v37, %v3994_v25 }
 0x118   : > { %990 = vrot.lane.b32.xlu1 %v3101_v26, %s3520_s30  ;;  %3287 = vmatmul.mubr.msk.f32.gmra.mrb[6].mxu0 %vm1842_vm9, %v1805_v34  ;;  %v1707_v29 = vsel %vm1698_vm5, %v1674_v60, %v1103_v33  ;;  %v4101_v33 = vld [vmem:[%s3577_s26 + $0x108] sm:$0xff] }
 0x119   : > { %864 = vrot.lane.b32.xlu0 %v3990_v27, %s3519_s29 }
 0x11a   : > { %v4010_v40 = vpop.permute.xlu1 %722 }
 0x11b   : > { %v4012_v42 = vpop.permute.xlu0 %596  ;;  %v1610_v20 = vsel %vm1599_vm2, %v1577_v9, %v4010_v40  ;;  %v3107_v9 = vld [vmem:[%s3577_s26 + $0x121] sm:$0xff] }
 0x11c   : > { %1498 = vrot.lane.b32.xlu1 %v3133_v38, %s3524_s20 }
 0x11d   : > { %1372 = vrot.lane.b32.xlu0 %v3102_v39, %s3523_s17 }
 0x11e   : > { %v1231_v45 = vpop.permute.xlu1 %1230 }
 0x11f   : > { %v1105_v46 = vpop.permute.xlu0 %1104  ;;  %v1740_v17 = vsel %vm1731_vm6, %v1707_v29, %v1231_v45 }
 0x120   : > { %992 = vrot.lane.b32.xlu1 %v3102_v39, %s3520_s30  ;;  %v1708_v14 = vsel %vm1698_vm5, %v1675_v59, %v1105_v46 }
 0x121   : > { %610 = vrot.lane.b32.xlu0 %v3101_v26, %s3518_s28 }
 0x122   : > { %v4019_v52 = vpop.permute.xlu1 %850 }
 0x123   : > { %v4021_v35 = vpop.permute.xlu0 %724  ;;  %v1643_v34 = vsel %vm1632_vm3, %v1610_v20, %v4019_v52  ;;  %v4194_v20 = vld [vmem:[%s3577_s26 + $0x128] sm:$0xff] }
 0x124   : > { %1500 = vrot.lane.b32.xlu1 %v3134_v49, %s3524_s20 }
 0x125   : > { %1118 = vrot.lane.b32.xlu0 %v3133_v38, %s3521_s7 }
 0x126   : > { %v1359_v5 = vpop.permute.xlu1 %1358 }
 0x127   : > { %v1233_v41 = vpop.permute.xlu0 %1232  ;;  %v1773_v58 = vsel %vm1764_vm7, %v1740_v17, %v1359_v5  ;;  %v1578_v5 = vsel %vm1566_vm1, %v3727_v43, %v4012_v42 }
 0x128   : > { %738 = vrot.lane.b32.xlu1 %v3133_v38, %s3517_s27  ;;  %v1741_v51 = vsel %vm1731_vm6, %v1708_v14, %v1233_v41  ;;  %v1611_v41 = vsel %vm1599_vm2, %v1578_v5, %v4021_v35 }
 0x129   : > { %612 = vrot.lane.b32.xlu0 %v3102_v39, %s3518_s28 }
 0x12a   : > { %v979_v55 = vpop.permute.xlu1 %978 }
 0x12b   : > { %v4037_v57 = vpop.permute.xlu0 %852  ;;  %v1676_v45 = vsel %vm1665_vm4, %v1643_v34, %v979_v55 }
 0x12c   : > { %1246 = vrot.lane.b32.xlu1 %v4033_v53, %s3522_s12  ;;  %v1644_v54 = vsel %vm1632_vm3, %v1611_v41, %v4037_v57 }
 0x12d   : > { %1120 = vrot.lane.b32.xlu0 %v3134_v49, %s3521_s7 }
 0x12e   : > { %v1487_v61 = vpop.permute.xlu1 %1486 }
 0x12f   : > { %v1361_v0 = vpop.permute.xlu0 %1360  ;;  %v1806_v2 = vsel %vm1797_vm8, %v1773_v58, %v1487_v61  ;;  %v3137_v61 = vld [vmem:[%s3577_s26 + $0x10a] sm:$0xff] }
 0x130   : > { %866 = vrot.lane.b32.xlu1 %v4033_v53, %s3519_s29  ;;  %3289 = vmatprep.mubr.msk.f32.mxu0 %vm1842_vm9, %v1806_v2  ;;  %v1774_v23 = vsel %vm1764_vm7, %v1741_v51, %v1361_v0  ;;  %v3106_v0 = vld [vmem:[%s3577_s26 + $0x111] sm:$0xff] }
 0x131   : > { %740 = vrot.lane.b32.xlu0 %v3134_v49, %s3517_s27 }
 0x132   : > { %v981_v10 = vpop.permute.xlu1 %980 }
 0x133   : > { %v4062_v31 = vpop.permute.xlu0 %598  ;;  %v1677_v42 = vsel %vm1665_vm4, %v1644_v54, %v981_v10  ;;  %v3140_v54 = vld [vmem:[%s3577_s26 + $0x12a] sm:$0xff] }
 0x134   : > { %1374 = vrot.lane.b32.xlu1 %v3103_v6, %s3523_s17 }
 0x135   : > { %1248 = vrot.lane.b32.xlu0 %v4058_v7, %s3522_s12 }
 0x136   : > { %v1489_v4 = vpop.permute.xlu1 %1488 }
 0x137   : > { %v1107_v11 = vpop.permute.xlu0 %1106  ;;  %v1807_v12 = vsel %vm1797_vm8, %v1774_v23, %v1489_v4  ;;  %v1579_v23 = vsel %vm1566_vm1, %v3760_v62, %v4062_v31 }
 0x138   : > { %994 = vrot.lane.b32.xlu1 %v3103_v6, %s3520_s30  ;;  %3290 = vmatmul.mubr.msk.f32.gmra.mrb[8].mxu0 %vm1842_vm9, %v1807_v12  ;;  %v1709_v37 = vsel %vm1698_vm5, %v1676_v45, %v1107_v11  ;;  %v4169_v11 = vld [vmem:[%s3577_s26 + $0x120] sm:$0xff] }
 0x139   : > { %868 = vrot.lane.b32.xlu0 %v4058_v7, %s3519_s29 }
 0x13a   : > { %v4078_v19 = vpop.permute.xlu1 %726 }
 0x13b   : > { %v4080_v22 = vpop.permute.xlu0 %600  ;;  %v1612_v4 = vsel %vm1599_vm2, %v1579_v23, %v4078_v19 }
 0x13c   : > { %1502 = vrot.lane.b32.xlu1 %v3135_v15, %s3524_s20 }
 0x13d   : > { %1376 = vrot.lane.b32.xlu0 %v3104_v18, %s3523_s17 }
 0x13e   : > { %v1235_v24 = vpop.permute.xlu1 %1234 }
 0x13f   : > { %v1109_v26 = vpop.permute.xlu0 %1108  ;;  %v1742_v25 = vsel %vm1731_vm6, %v1709_v37, %v1235_v24 }
 0x140   : > { %996 = vrot.lane.b32.xlu1 %v3104_v18, %s3520_s30  ;;  %v1710_v60 = vsel %vm1698_vm5, %v1677_v42, %v1109_v26 }
 0x141   : > { %614 = vrot.lane.b32.xlu0 %v3103_v6, %s3518_s28 }
 0x142   : > { %v4087_v32 = vpop.permute.xlu1 %854 }
 0x143   : > { %v4089_v13 = vpop.permute.xlu0 %728  ;;  %v1645_v12 = vsel %vm1632_vm3, %v1612_v4, %v4087_v32 }
 0x144   : > { %1504 = vrot.lane.b32.xlu1 %v3136_v30, %s3524_s20 }
 0x145   : > { %1122 = vrot.lane.b32.xlu0 %v3135_v15, %s3521_s7 }
 0x146   : > { %v1363_v36 = vpop.permute.xlu1 %1362 }
 0x147   : > { %v1237_v21 = vpop.permute.xlu0 %1236  ;;  %v1775_v40 = vsel %vm1764_vm7, %v1742_v25, %v1363_v36  ;;  %v1580_v36 = vsel %vm1566_vm1, %v3785_v16, %v4080_v22 }
 0x148   : > { %742 = vrot.lane.b32.xlu1 %v3135_v15, %s3517_s27  ;;  %v1743_v35 = vsel %vm1731_vm6, %v1710_v60, %v1237_v21  ;;  %v1613_v21 = vsel %vm1599_vm2, %v1580_v36, %v4089_v13  ;;  %v3110_v36 = vld [vmem:[%s3577_s26 + $0x141] sm:$0xff] }
 0x149   : > { %616 = vrot.lane.b32.xlu0 %v3104_v18, %s3518_s28 }
 0x14a   : > { %v983_v38 = vpop.permute.xlu1 %982 }
 0x14b   : > { %v4105_v39 = vpop.permute.xlu0 %856  ;;  %v1678_v24 = vsel %vm1665_vm4, %v1645_v12, %v983_v38  ;;  %v3109_v12 = vld [vmem:[%s3577_s26 + $0x139] sm:$0xff] }
 0x14c   : > { %1250 = vrot.lane.b32.xlu1 %v4101_v33, %s3522_s12  ;;  %v1646_v34 = vsel %vm1632_vm3, %v1613_v21, %v4105_v39 }
 0x14d   : > { %1124 = vrot.lane.b32.xlu0 %v3136_v30, %s3521_s7 }
 0x14e   : > { %v1491_v46 = vpop.permute.xlu1 %1490 }
 0x14f   : > { %v1365_v49 = vpop.permute.xlu0 %1364  ;;  %v1808_v52 = vsel %vm1797_vm8, %v1775_v40, %v1491_v46  ;;  %v3139_v46 = vld [vmem:[%s3577_s26 + $0x122] sm:$0xff] }
 0x150   : > { %870 = vrot.lane.b32.xlu1 %v4101_v33, %s3519_s29  ;;  %3292 = vmatprep.mubr.msk.f32.mxu0 %vm1842_vm9, %v1808_v52  ;;  %v1776_v29 = vsel %vm1764_vm7, %v1743_v35, %v1365_v49  ;;  %v3108_v49 = vld [vmem:[%s3577_s26 + $0x129] sm:$0xff] }
 0x151   : > { %744 = vrot.lane.b32.xlu0 %v3136_v30, %s3517_s27 }
 0x152   : > { %v985_v55 = vpop.permute.xlu1 %984 }
 0x153   : > { %v4130_v43 = vpop.permute.xlu0 %602  ;;  %v1679_v22 = vsel %vm1665_vm4, %v1646_v34, %v985_v55 }
 0x154   : > { %1378 = vrot.lane.b32.xlu1 %v3105_v44, %s3523_s17 }
 0x155   : > { %1252 = vrot.lane.b32.xlu0 %v4126_v50, %s3522_s12 }
 0x156   : > { %v1493_v17 = vpop.permute.xlu1 %1492 }
 0x157   : > { %v1111_v57 = vpop.permute.xlu0 %1110  ;;  %v1809_v58 = vsel %vm1797_vm8, %v1776_v29, %v1493_v17  ;;  %v1581_v29 = vsel %vm1566_vm1, %v3828_v48, %v4130_v43 }
 0x158   : > { %998 = vrot.lane.b32.xlu1 %v3105_v44, %s3520_s30  ;;  %3293 = vmatmul.mubr.msk.f32.gmra.mrb[10].mxu0 %vm1842_vm9, %v1809_v58  ;;  %v1711_v62 = vsel %vm1698_vm5, %v1678_v24, %v1111_v57  ;;  %v4237_v57 = vld [vmem:[%s3577_s26 + $0x138] sm:$0xff] }
 0x159   : > { %872 = vrot.lane.b32.xlu0 %v4126_v50, %s3519_s29 }
 0x15a   : > { %v4146_v2 = vpop.permute.xlu1 %730 }
 0x15b   : > { %v4148_v3 = vpop.permute.xlu0 %604  ;;  %v1614_v17 = vsel %vm1599_vm2, %v1581_v29, %v4146_v2 }
 0x15c   : > { %1506 = vrot.lane.b32.xlu1 %v3137_v61, %s3524_s20  ;;  %v1582_v23 = vsel %vm1566_vm1, %v3854_v63, %v4148_v3 }
 0x15d   : > { %1380 = vrot.lane.b32.xlu0 %v3106_v0, %s3523_s17 }
 0x15e   : > { %v1239_v56 = vpop.permute.xlu1 %1238 }
 0x15f   : > { %v1113_v6 = vpop.permute.xlu0 %1112  ;;  %v1744_v31 = vsel %vm1731_vm6, %v1711_v62, %v1239_v56 }
 0x160   : > { %1000 = vrot.lane.b32.xlu1 %v3106_v0, %s3520_s30  ;;  %v1712_v45 = vsel %vm1698_vm5, %v1679_v22, %v1113_v6  ;;  %v3142_v22 = vld [vmem:[%s3577_s26 + $0x142] sm:$0xff] }
 0x161   : > { %618 = vrot.lane.b32.xlu0 %v3105_v44, %s3518_s28 }
 0x162   : > { %v4155_v10 = vpop.permute.xlu1 %858 }
 0x163   : > { %v4157_v59 = vpop.permute.xlu0 %732  ;;  %v1647_v58 = vsel %vm1632_vm3, %v1614_v17, %v4155_v10 }
 0x164   : > { %1508 = vrot.lane.b32.xlu1 %v3138_v8, %s3524_s20  ;;  %v1615_v4 = vsel %vm1599_vm2, %v1582_v23, %v4157_v59 }
 0x165   : > { %1126 = vrot.lane.b32.xlu0 %v3137_v61, %s3521_s7 }
 0x166   : > { %v1367_v14 = vpop.permute.xlu1 %1366 }
 0x167   : > { %v1241_v51 = vpop.permute.xlu0 %1240  ;;  %v1777_v19 = vsel %vm1764_vm7, %v1744_v31, %v1367_v14 }
 0x168   : > { %746 = vrot.lane.b32.xlu1 %v3137_v61, %s3517_s27  ;;  %v1745_v13 = vsel %vm1731_vm6, %v1712_v45, %v1241_v51 }
 0x169   : > { %620 = vrot.lane.b32.xlu0 %v3106_v0, %s3518_s28 }
 0x16a   : > { %v987_v15 = vpop.permute.xlu1 %986 }
 0x16b   : > { %v4173_v18 = vpop.permute.xlu0 %860  ;;  %v1680_v56 = vsel %vm1665_vm4, %v1647_v58, %v987_v15  ;;  %v4266_v15 = vld [vmem:[%s3577_s26 + $0x140] sm:$0xff] }
 0x16c   : > { %1254 = vrot.lane.b32.xlu1 %v4169_v11, %s3522_s12  ;;  %v1648_v24 = vsel %vm1632_vm3, %v1615_v4, %v4173_v18  ;;  %v3143_v4 = vld [vmem:[%s3577_s26 + $0x152] sm:$0xff] }
 0x16d   : > { %1128 = vrot.lane.b32.xlu0 %v3138_v8, %s3521_s7 }
 0x16e   : > { %v1495_v26 = vpop.permute.xlu1 %1494 }
 0x16f   : > { %v1369_v30 = vpop.permute.xlu0 %1368  ;;  %v1810_v32 = vsel %vm1797_vm8, %v1777_v19, %v1495_v26 }
 0x170   : > { %874 = vrot.lane.b32.xlu1 %v4169_v11, %s3519_s29  ;;  %3295 = vmatprep.mubr.msk.f32.mxu0 %vm1842_vm9, %v1810_v32  ;;  %v1778_v37 = vsel %vm1764_vm7, %v1745_v13, %v1369_v30  ;;  %v3141_v32 = vld [vmem:[%s3577_s26 + $0x13a] sm:$0xff] }
 0x171   : > { %748 = vrot.lane.b32.xlu0 %v3138_v8, %s3517_s27 }
 0x172   : > { %v989_v38 = vpop.permute.xlu1 %988 }
 0x173   : > { %v4198_v16 = vpop.permute.xlu0 %606  ;;  %v1681_v3 = vsel %vm1665_vm4, %v1648_v24, %v989_v38 }
 0x174   : > { %1382 = vrot.lane.b32.xlu1 %v3107_v9, %s3523_s17 }
 0x175   : > { %1256 = vrot.lane.b32.xlu0 %v4194_v20, %s3522_s12 }
 0x176   : > { %v1497_v25 = vpop.permute.xlu1 %1496 }
 0x177   : > { %v1115_v39 = vpop.permute.xlu0 %1114  ;;  %v1811_v40 = vsel %vm1797_vm8, %v1778_v37, %v1497_v25 }
 0x178   : > { %1002 = vrot.lane.b32.xlu1 %v3107_v9, %s3520_s30  ;;  %3296 = vmatmul.mubr.msk.f32.gmra.mrb[12].mxu0 %vm1842_vm9, %v1811_v40  ;;  %v1713_v48 = vsel %vm1698_vm5, %v1680_v56, %v1115_v39  ;;  %v1583_v39 = vsel %vm1566_vm1, %v3897_v28, %v4198_v16  ;;  %v3111_v56 = vld [vmem:[%s3577_s26 + $0x151] sm:$0xff] }
 0x179   : > { %876 = vrot.lane.b32.xlu0 %v4194_v20, %s3519_s29 }
 0x17a   : > { %v4214_v52 = vpop.permute.xlu1 %734 }
 0x17b   : > { %v4216_v5 = vpop.permute.xlu0 %608  ;;  %v1616_v40 = vsel %vm1599_vm2, %v1583_v39, %v4214_v52 }
 0x17c   : > { %1510 = vrot.lane.b32.xlu1 %v3139_v46, %s3524_s20  ;;  %v1584_v58 = vsel %vm1566_vm1, %v3922_v47, %v4216_v5 }
 0x17d   : > { %1384 = vrot.lane.b32.xlu0 %v3108_v49, %s3523_s17 }
 0x17e   : > { %v1243_v41 = vpop.permute.xlu1 %1242 }
 0x17f   : > { %v1117_v44 = vpop.permute.xlu0 %1116  ;;  %v1746_v2 = vsel %vm1731_vm6, %v1713_v48, %v1243_v41  ;;  %v4338_v48 = vld [vmem:[%s3577_s26 + $0x158] sm:$0xff] }
 0x180   : > { %1004 = vrot.lane.b32.xlu1 %v3108_v49, %s3520_s30  ;;  %v1714_v31 = vsel %vm1698_vm5, %v1681_v3, %v1117_v44 }
 0x181   : > { %622 = vrot.lane.b32.xlu0 %v3107_v9, %s3518_s28 }
 0x182   : > { %v4223_v55 = vpop.permute.xlu1 %862 }
 0x183   : > { %v4225_v42 = vpop.permute.xlu0 %736 }
 0x184   : > { %1512 = vrot.lane.b32.xlu1 %v3140_v54, %s3524_s20 }
 0x185   : > { %1130 = vrot.lane.b32.xlu0 %v3139_v46, %s3521_s7 }
 0x186   : > { %v1371_v60 = vpop.permute.xlu1 %1370 }
 0x187   : > { %v1245_v35 = vpop.permute.xlu0 %1244  ;;  %v1779_v8 = vsel %vm1764_vm7, %v1746_v2, %v1371_v60 }
 0x188   : > { %750 = vrot.lane.b32.xlu1 %v3139_v46, %s3517_s27  ;;  %v1747_v59 = vsel %vm1731_vm6, %v1714_v31, %v1245_v35  ;;  %v4309_v46 = vld [vmem:[%s3577_s26 + $0x150] sm:$0xff] }
 0x189   : > { %624 = vrot.lane.b32.xlu0 %v3108_v49, %s3518_s28  ;;  %v1649_v49 = vsel %vm1632_vm3, %v1616_v40, %v4223_v55 }
 0x18a   : > { %v991_v61 = vpop.permute.xlu1 %990 }
 0x18b   : > { %v4241_v0 = vpop.permute.xlu0 %864  ;;  %v4245_v43 = vpop.f32.mrb[0].mxu0 }
 0x18c   : > { %1258 = vrot.lane.b32.xlu1 %v4237_v57, %s3522_s12  ;;  %v4251_v6 = vpop.f32.mrb[1].mxu0 }
 0x18d   : > { %1132 = vrot.lane.b32.xlu0 %v3140_v54, %s3521_s7 }
 0x18e   : > { %v1499_v10 = vpop.permute.xlu1 %1498 }
 0x18f   : > { %v1373_v14 = vpop.permute.xlu0 %1372  ;;  %v1812_v51 = vsel %vm1797_vm8, %v1779_v8, %v1499_v10 }
 0x190   : > { %878 = vrot.lane.b32.xlu1 %v4237_v57, %s3519_s29  ;;  %3298 = vmatprep.mubr.msk.f32.mxu0 %vm1842_vm9, %v1812_v51  ;;  %v1780_v19 = vsel %vm1764_vm7, %v1747_v59, %v1373_v14  ;;  %v3144_v59 = vld [vmem:[%s3577_s26 + $0x15a] sm:$0xff] }
 0x191   : > { %752 = vrot.lane.b32.xlu0 %v3140_v54, %s3517_s27  ;;  %v1682_v54 = vsel %vm1665_vm4, %v1649_v49, %v991_v61  ;;  %v1617_v61 = vsel %vm1599_vm2, %v1584_v58, %v4225_v42 }
 0x192   : > { %v993_v62 = vpop.permute.xlu1 %992  ;;  %v1650_v2 = vsel %vm1632_vm3, %v1617_v61, %v4241_v0 }
 0x193   : > { %v4270_v63 = vpop.permute.xlu0 %610  ;;  %v1683_v5 = vsel %vm1665_vm4, %v1650_v2, %v993_v62  ;;  %v3145_v2 = vld [vmem:[%s3577_s26 + $0x16a] sm:$0xff] }
 0x194   : > { %1386 = vrot.lane.b32.xlu1 %v3109_v12, %s3523_s17 }
 0x195   : > { %1260 = vrot.lane.b32.xlu0 %v4266_v15, %s3522_s12 }
 0x196   : > { %v1501_v26 = vpop.permute.xlu1 %1500 }
 0x197   : > { %v1119_v18 = vpop.permute.xlu0 %1118  ;;  %v1813_v30 = vsel %vm1797_vm8, %v1780_v19, %v1501_v26 }
 0x198   : > { %1006 = vrot.lane.b32.xlu1 %v3109_v12, %s3520_s30  ;;  %3299 = vmatmul.mubr.msk.f32.gmra.mrb[14].mxu0 %vm1842_vm9, %v1813_v30  ;;  %v1715_v28 = vsel %vm1698_vm5, %v1682_v54, %v1119_v18 }
 0x199   : > { %880 = vrot.lane.b32.xlu0 %v4266_v15, %s3519_s29 }
 0x19a   : > { %v4286_v21 = vpop.permute.xlu1 %738 }
 0x19b   : > { %v4288_v9 = vpop.permute.xlu0 %612 }
 0x19c   : > { %1514 = vrot.lane.b32.xlu1 %v3141_v32, %s3524_s20  ;;  %v1586_v54 = vsel %vm1566_vm1, %v3990_v27, %v4288_v9 }
 0x19d   : > { %1388 = vrot.lane.b32.xlu0 %v3110_v36, %s3523_s17 }
 0x19e   : > { %v1247_v34 = vpop.permute.xlu1 %1246 }
 0x19f   : > { %v1121_v38 = vpop.permute.xlu0 %1120  ;;  %v1748_v52 = vsel %vm1731_vm6, %v1715_v28, %v1247_v34  ;;  %v4381_v34 = vld [vmem:[%s3577_s26 + $0x168] sm:$0xff] }
 0x1a0   : > { %1008 = vrot.lane.b32.xlu1 %v3110_v36, %s3520_s30  ;;  %v1716_v10 = vsel %vm1698_vm5, %v1683_v5, %v1121_v38 }
 0x1a1   : > { %626 = vrot.lane.b32.xlu0 %v3109_v12, %s3518_s28  ;;  %v3112_v12 = vld [vmem:[%s3577_s26 + $0x159] sm:$0xff] }
 0x1a2   : > { %v4295_v45 = vpop.permute.xlu1 %866 }
 0x1a3   : > { %v4297_v13 = vpop.permute.xlu0 %740 }
 0x1a4   : > { %1516 = vrot.lane.b32.xlu1 %v3142_v22, %s3524_s20  ;;  %v1619_v28 = vsel %vm1599_vm2, %v1586_v54, %v4297_v13 }
 0x1a5   : > { %1134 = vrot.lane.b32.xlu0 %v3141_v32, %s3521_s7 }
 0x1a6   : > { %v1375_v37 = vpop.permute.xlu1 %1374 }
 0x1a7   : > { %v1249_v25 = vpop.permute.xlu0 %1248  ;;  %v1781_v55 = vsel %vm1764_vm7, %v1748_v52, %v1375_v37  ;;  %v3113_v52 = vld [vmem:[%s3577_s26 + $0x169] sm:$0xff] }
 0x1a8   : > { %754 = vrot.lane.b32.xlu1 %v3141_v32, %s3517_s27  ;;  %v1749_v42 = vsel %vm1731_vm6, %v1716_v10, %v1249_v25  ;;  %v1585_v32 = vsel %vm1566_vm1, %v3965_v1, %v4270_v63 }
 0x1a9   : > { %628 = vrot.lane.b32.xlu0 %v3110_v36, %s3518_s28  ;;  %v1618_v36 = vsel %vm1599_vm2, %v1585_v32, %v4286_v21 }
 0x1aa   : > { %v995_v41 = vpop.permute.xlu1 %994  ;;  %v1651_v38 = vsel %vm1632_vm3, %v1618_v36, %v4295_v45 }
 0x1ab   : > { %v4313_v44 = vpop.permute.xlu0 %868  ;;  %v4317_v16 = vpop.f32.mrb[2].mxu0  ;;  %v1684_v25 = vsel %vm1665_vm4, %v1651_v38, %v995_v41 }
 0x1ac   : > { %1262 = vrot.lane.b32.xlu1 %v4309_v46, %s3522_s12  ;;  %v4323_v60 = vpop.f32.mrb[3].mxu0 }
 0x1ad   : > { %1136 = vrot.lane.b32.xlu0 %v3142_v22, %s3521_s7 }
 0x1ae   : > { %v1503_v35 = vpop.permute.xlu1 %1502 }
 0x1af   : > { %v1377_v29 = vpop.permute.xlu0 %1376  ;;  %v1814_v17 = vsel %vm1797_vm8, %v1781_v55, %v1503_v35  ;;  %v4410_v55 = vld [vmem:[%s3577_s26 + $0x170] sm:$0xff]  ;;  %v1652_v35 = vsel %vm1632_vm3, %v1619_v28, %v4313_v44 }
 0x1b0   : > { %882 = vrot.lane.b32.xlu1 %v4309_v46, %s3519_s29  ;;  %3301 = vmatprep.mubr.msk.f32.mxu0 %vm1842_vm9, %v1814_v17  ;;  %v1782_v14 = vsel %vm1764_vm7, %v1749_v42, %v1377_v29 }
 0x1b1   : > { %756 = vrot.lane.b32.xlu0 %v3142_v22, %s3517_s27 }
 0x1b2   : > { %v997_v8 = vpop.permute.xlu1 %996 }
 0x1b3   : > { %v4342_v47 = vpop.permute.xlu0 %614  ;;  %v1685_v9 = vsel %vm1665_vm4, %v1652_v35, %v997_v8  ;;  %v3114_v8 = vld [vmem:[%s3577_s26 + $0x171] sm:$0xff] }
 0x1b4   : > { %1390 = vrot.lane.b32.xlu1 %v3111_v56, %s3523_s17 }
 0x1b5   : > { %1264 = vrot.lane.b32.xlu0 %v4338_v48, %s3522_s12 }
 0x1b6   : > { %v1505_v51 = vpop.permute.xlu1 %1504 }
 0x1b7   : > { %v1123_v0 = vpop.permute.xlu0 %1122  ;;  %v1815_v23 = vsel %vm1797_vm8, %v1782_v14, %v1505_v51  ;;  %v3146_v51 = vld [vmem:[%s3577_s26 + $0x172] sm:$0xff] }
 0x1b8   : > { %1010 = vrot.lane.b32.xlu1 %v3111_v56, %s3520_s30  ;;  %3302 = vmatmul.mubr.msk.f32.gmra.mrb[16].mxu0 %vm1842_vm9, %v1815_v23  ;;  %v1717_v1 = vsel %vm1698_vm5, %v1684_v25, %v1123_v0 }
 0x1b9   : > { %884 = vrot.lane.b32.xlu0 %v4338_v48, %s3519_s29 }
 0x1ba   : > { %v4358_v24 = vpop.permute.xlu1 %742 }
 0x1bb   : > { %v4360_v62 = vpop.permute.xlu0 %616 }
 0x1bc   : > { %1518 = vrot.lane.b32.xlu1 %v3143_v4, %s3524_s20 }
 0x1bd   : > { %1392 = vrot.lane.b32.xlu0 %v3112_v12, %s3523_s17 }
 0x1be   : > { %v1251_v3 = vpop.permute.xlu1 %1250 }
 0x1bf   : > { %v1125_v31 = vpop.permute.xlu0 %1124  ;;  %v1750_v21 = vsel %vm1731_vm6, %v1717_v1, %v1251_v3  ;;  %v1587_v3 = vsel %vm1566_vm1, %v4033_v53, %v4342_v47 }
 0x1c0   : > { %1012 = vrot.lane.b32.xlu1 %v3112_v12, %s3520_s30  ;;  %v1718_v17 = vsel %vm1698_vm5, %v1685_v9, %v1125_v31  ;;  %v1620_v31 = vsel %vm1599_vm2, %v1587_v3, %v4358_v24 }
 0x1c1   : > { %630 = vrot.lane.b32.xlu0 %v3111_v56, %s3518_s28 }
 0x1c2   : > { %v4367_v19 = vpop.permute.xlu1 %870 }
 0x1c3   : > { %v4369_v26 = vpop.permute.xlu0 %744 }
 0x1c4   : > { %1520 = vrot.lane.b32.xlu1 %v3144_v59, %s3524_s20 }
 0x1c5   : > { %1138 = vrot.lane.b32.xlu0 %v3143_v4, %s3521_s7 }
 0x1c6   : > { %v1379_v18 = vpop.permute.xlu1 %1378 }
 0x1c7   : > { %v1253_v30 = vpop.permute.xlu0 %1252  ;;  %v1783_v45 = vsel %vm1764_vm7, %v1750_v21, %v1379_v18  ;;  %v1653_v18 = vsel %vm1632_vm3, %v1620_v31, %v4367_v19  ;;  %v1588_v21 = vsel %vm1566_vm1, %v4058_v7, %v4360_v62  ;;  %v3118_v31 = vld [vmem:[%s3577_s26 + $0x1a1] sm:$0xff] }
 0x1c8   : > { %758 = vrot.lane.b32.xlu1 %v3143_v4, %s3517_s27  ;;  %v1751_v13 = vsel %vm1731_vm6, %v1718_v17, %v1253_v30  ;;  %v3116_v17 = vld [vmem:[%s3577_s26 + $0x189] sm:$0xff] }
 0x1c9   : > { %632 = vrot.lane.b32.xlu0 %v3112_v12, %s3518_s28 }
 0x1ca   : > { %v999_v22 = vpop.permute.xlu1 %998 }
 0x1cb   : > { %v4385_v37 = vpop.permute.xlu0 %872  ;;  %v4389_v63 = vpop.f32.mrb[4].mxu0  ;;  %v1686_v36 = vsel %vm1665_vm4, %v1653_v18, %v999_v22 }
 0x1cc   : > { %1266 = vrot.lane.b32.xlu1 %v4381_v34, %s3522_s12  ;;  %v4395_v39 = vpop.f32.mrb[5].mxu0 }
 0x1cd   : > { %1140 = vrot.lane.b32.xlu0 %v3144_v59, %s3521_s7 }
 0x1ce   : > { %v1507_v40 = vpop.permute.xlu1 %1506 }
 0x1cf   : > { %v1381_v49 = vpop.permute.xlu0 %1380  ;;  %v1816_v41 = vsel %vm1797_vm8, %v1783_v45, %v1507_v40  ;;  %v1621_v45 = vsel %vm1599_vm2, %v1588_v21, %v4369_v26  ;;  %v3115_v40 = vld [vmem:[%s3577_s26 + $0x181] sm:$0xff] }
 0x1d0   : > { %886 = vrot.lane.b32.xlu1 %v4381_v34, %s3519_s29  ;;  %3304 = vmatprep.mubr.msk.f32.mxu1 %vm1842_vm9, %v1816_v41  ;;  %v1784_v58 = vsel %vm1764_vm7, %v1751_v13, %v1381_v49  ;;  %v3084_v49 = vld [vmem:[%s3577_s26 + $0x188] sm:$0xff]  ;;  %v1654_v41 = vsel %vm1632_vm3, %v1621_v45, %v4385_v37 }
 0x1d1   : > { %760 = vrot.lane.b32.xlu0 %v3144_v59, %s3517_s27  ;;  %v3083_v59 = vld [vmem:[%s3577_s26 + $0x180] sm:$0xff] }
 0x1d2   : > { %v1001_v29 = vpop.permute.xlu1 %1000 }
 0x1d3   : > { %v4414_v27 = vpop.permute.xlu0 %618  ;;  %v1687_v7 = vsel %vm1665_vm4, %v1654_v41, %v1001_v29  ;;  %v3147_v29 = vld [vmem:[%s3577_s26 + $0x182] sm:$0xff] }
 0x1d4   : > { %1394 = vrot.lane.b32.xlu1 %v3113_v52, %s3523_s17 }
 0x1d5   : > { %1268 = vrot.lane.b32.xlu0 %v4410_v55, %s3522_s12 }
 0x1d6   : > { %v1509_v61 = vpop.permute.xlu1 %1508 }
 0x1d7   : > { %v1127_v44 = vpop.permute.xlu0 %1126  ;;  %v1817_v56 = vsel %vm1797_vm8, %v1784_v58, %v1509_v61 }
 0x1d8   : > { %1014 = vrot.lane.b32.xlu1 %v3113_v52, %s3520_s30  ;;  %3305 = vmatmul.mubr.msk.f32.vlgmr.msra.gmra.mrb[0].mxu1 %vm1842_vm9, %v1817_v56  ;;  %v1719_v53 = vsel %vm1698_vm5, %v1686_v36, %v1127_v44  ;;  %v3054_v56 = vld [vmem:[%s3577_s26 + $0x18a] sm:$0xff] }
 0x1d9   : > { %888 = vrot.lane.b32.xlu0 %v4410_v55, %s3519_s29 }
 0x1da   : > { %v4430_v5 = vpop.permute.xlu1 %746 }
 0x1db   : > { %v4432_v10 = vpop.permute.xlu0 %620 }
 0x1dc   : > { %1522 = vrot.lane.b32.xlu1 %v3145_v2, %s3524_s20  ;;  %v1590_v45 = vsel %vm1566_vm1, %v4126_v50, %v4432_v10 }
 0x1dd   : > { %1396 = vrot.lane.b32.xlu0 %v3114_v8, %s3523_s17 }
 0x1de   : > { %v1255_v42 = vpop.permute.xlu1 %1254 }
 0x1df   : > { %v1129_v14 = vpop.permute.xlu0 %1128  ;;  %v1752_v24 = vsel %vm1731_vm6, %v1719_v53, %v1255_v42  ;;  %v3086_v42 = vld [vmem:[%s3577_s26 + $0x1a0] sm:$0xff] }
 0x1e0   : > { %1016 = vrot.lane.b32.xlu1 %v3114_v8, %s3520_s30  ;;  %v1720_v62 = vsel %vm1698_vm5, %v1687_v7, %v1129_v14  ;;  %v3085_v14 = vld [vmem:[%s3577_s26 + $0x198] sm:$0xff] }
 0x1e1   : > { %634 = vrot.lane.b32.xlu0 %v3113_v52, %s3518_s28 }
 0x1e2   : > { %v4439_v0 = vpop.permute.xlu1 %874 }
 0x1e3   : > { %v4441_v23 = vpop.permute.xlu0 %748 }
 0x1e4   : > { %1524 = vrot.lane.b32.xlu1 %v3146_v51, %s3524_s20 }
 0x1e5   : > { %1142 = vrot.lane.b32.xlu0 %v3145_v2, %s3521_s7 }
 0x1e6   : > { %v1383_v4 = vpop.permute.xlu1 %1382 }
 0x1e7   : > { %v1257_v12 = vpop.permute.xlu0 %1256  ;;  %v1785_v19 = vsel %vm1764_vm7, %v1752_v24, %v1383_v4 }
 0x1e8   : > { %762 = vrot.lane.b32.xlu1 %v3145_v2, %s3517_s27  ;;  %v1753_v26 = vsel %vm1731_vm6, %v1720_v62, %v1257_v12  ;;  %v1589_v12 = vsel %vm1566_vm1, %v4101_v33, %v4414_v27 }
 0x1e9   : > { %636 = vrot.lane.b32.xlu0 %v3114_v8, %s3518_s28  ;;  %v1622_v3 = vsel %vm1599_vm2, %v1589_v12, %v4430_v5 }
 0x1ea   : > { %v4455_v30 = vpop.permute.xlu1 %1002  ;;  %v1655_v18 = vsel %vm1632_vm3, %v1622_v3, %v4439_v0 }
 0x1eb   : > { %v4457_v32 = vpop.permute.xlu0 %876  ;;  %v4461_v47 = vpop.f32.mrb[6].mxu0  ;;  %v1688_v24 = vsel %vm1665_vm4, %v1655_v18, %v4455_v30 }
 0x1ec   : > { %1270 = vrot.lane.b32.xlu1 %v3083_v59, %s3522_s12  ;;  %v4466_v38 = vpop.f32.mrb[7].mxu0 }
 0x1ed   : > { %1144 = vrot.lane.b32.xlu0 %v3146_v51, %s3521_s7 }
 0x1ee   : > { %v1511_v25 = vpop.permute.xlu1 %1510 }
 0x1ef   : > { %v1385_v1 = vpop.permute.xlu0 %1384  ;;  %v1818_v22 = vsel %vm1797_vm8, %v1785_v19, %v1511_v25  ;;  %v3150_v25 = vld [vmem:[%s3577_s26 + $0x1a2] sm:$0xff] }
 0x1f0   : > { %890 = vrot.lane.b32.xlu1 %v3083_v59, %s3519_s29  ;;  %3307 = vmatprep.mubr.msk.f32.mxu1 %vm1842_vm9, %v1818_v22  ;;  %v1786_v52 = vsel %vm1764_vm7, %v1753_v26, %v1385_v1  ;;  %v3117_v59 = vld [vmem:[%s3577_s26 + $0x199] sm:$0xff] }
 0x1f1   : > { %764 = vrot.lane.b32.xlu0 %v3146_v51, %s3517_s27  ;;  %v3149_v1 = vld [vmem:[%s3577_s26 + $0x19a] sm:$0xff] }
 0x1f2   : > { %v4482_v54 = vpop.permute.xlu1 %1004 }
 0x1f3   : > { %v4484_v28 = vpop.permute.xlu0 %622 }
 0x1f4   : > { %1398 = vrot.lane.b32.xlu1 %v3115_v40, %s3523_s17 }
 0x1f5   : > { %1272 = vrot.lane.b32.xlu0 %v3084_v49, %s3522_s12 }
 0x1f6   : > { %v1513_v35 = vpop.permute.xlu1 %1512 }
 0x1f7   : > { %v1131_v37 = vpop.permute.xlu0 %1130  ;;  %v1819_v9 = vsel %vm1797_vm8, %v1786_v52, %v1513_v35 }
 0x1f8   : > { %1018 = vrot.lane.b32.xlu1 %v3115_v40, %s3520_s30  ;;  %3308 = vmatmul.mubr.msk.f32.gmra.mrb[2].mxu1 %vm1842_vm9, %v1819_v9  ;;  %v1721_v33 = vsel %vm1698_vm5, %v1688_v24, %v1131_v37  ;;  %v1623_v40 = vsel %vm1599_vm2, %v1590_v45, %v4441_v23 }
 0x1f9   : > { %892 = vrot.lane.b32.xlu0 %v3084_v49, %s3519_s29  ;;  %v1656_v49 = vsel %vm1632_vm3, %v1623_v40, %v4457_v32 }
 0x1fa   : > { %v4498_v13 = vpop.permute.xlu1 %750  ;;  %v1689_v62 = vsel %vm1665_vm4, %v1656_v49, %v4482_v54 }
 0x1fb   : > { %v4500_v58 = vpop.permute.xlu0 %624 }
 0x1fc   : > { %1526 = vrot.lane.b32.xlu1 %v3147_v29, %s3524_s20 }
 0x1fd   : > { %1400 = vrot.lane.b32.xlu0 %v3116_v17, %s3523_s17 }
 0x1fe   : > { %v1259_v61 = vpop.permute.xlu1 %1258 }
 0x1ff   : > { %v1133_v44 = vpop.permute.xlu0 %1132  ;;  %v1754_v5 = vsel %vm1731_vm6, %v1721_v33, %v1259_v61 }
 0x200   : > { %1146 = vrot.lane.b32.xlu1 %v3147_v29, %s3521_s7  ;;  %v1722_v26 = vsel %vm1698_vm5, %v1689_v62, %v1133_v44  ;;  %v1591_v44 = vsel %vm1566_vm1, %v4169_v11, %v4484_v28 }
 0x201   : > { %1020 = vrot.lane.b32.xlu0 %v3116_v17, %s3520_s30 }
 0x202   : > { %v879_v2 = vpop.permute.xlu1 %878 }
 0x203   : > { %v4507_v8 = vpop.permute.xlu0 %752 }
 0x204   : > { %1148 = vrot.lane.b32.xlu1 %v3054_v56, %s3521_s7 }
 0x205   : > { %1528 = vrot.lane.b32.xlu0 %v3054_v56, %s3524_s20 }
 0x206   : > { %v1387_v51 = vpop.permute.xlu1 %1386 }
 0x207   : > { %v1261_v4 = vpop.permute.xlu0 %1260  ;;  %v1787_v0 = vsel %vm1764_vm7, %v1754_v5, %v1387_v51 }
 0x208   : > { %1276 = vrot.lane.b32.xlu1 %v3086_v42, %s3522_s12  ;;  %v1755_v50 = vsel %vm1731_vm6, %v1722_v26, %v1261_v4  ;;  %v1624_v42 = vsel %vm1599_vm2, %v1591_v44, %v4498_v13 }
 0x209   : > { %1274 = vrot.lane.b32.xlu0 %v3085_v14, %s3522_s12  ;;  %v1657_v14 = vsel %vm1632_vm3, %v1624_v42, %v879_v2  ;;  %v1592_v2 = vsel %vm1566_vm1, %v4194_v20, %v4500_v58  ;;  %s5401_s12 = scalar_lea.vmem %s5520_s6, %s3223_s9 }
 0x20a   : > { %v1007_v36 = vpop.permute.xlu1 %1006 }
 0x20b   : > { %v881_v53 = vpop.permute.xlu0 %880  ;;  %v4527_v27 = vpop.f32.mrb[8].mxu0  ;;  %v1690_v12 = vsel %vm1665_vm4, %v1657_v14, %v1007_v36  ;;  %v1625_v36 = vsel %vm1599_vm2, %v1592_v2, %v4507_v8 }
 0x20c   : > { %1404 = vrot.lane.b32.xlu1 %v3118_v31, %s3523_s17  ;;  %v4532_v19 = vpop.f32.mrb[9].mxu0  ;;  %v1658_v33 = vsel %vm1632_vm3, %v1625_v36, %v881_v53 }
 0x20d   : > { %1402 = vrot.lane.b32.xlu0 %v3117_v59, %s3523_s17 }
 0x20e   : > { %v1515_v22 = vpop.permute.xlu1 %1514 }
 0x20f   : > { %v1389_v21 = vpop.permute.xlu0 %1388  ;;  %v1820_v30 = vsel %vm1797_vm8, %v1787_v0, %v1515_v22 }
 0x210   : > { %1532 = vrot.lane.b32.xlu1 %v3150_v25, %s3524_s20  ;;  %3310 = vmatprep.mubr.msk.f32.mxu1 %vm1842_vm9, %v1820_v30  ;;  %v1788_v10 = vsel %vm1764_vm7, %v1755_v50, %v1389_v21 }
 0x211   : > { %1530 = vrot.lane.b32.xlu0 %v3149_v1, %s3524_s20 }
 0x212   : > { %v1009_v41 = vpop.permute.xlu1 %1008 }
 0x213   : > { %v627_v7 = vpop.permute.xlu0 %626  ;;  %v1691_v1 = vsel %vm1665_vm4, %v1658_v33, %v1009_v41 }
 0x214   : > { %v1593_v50 = vsel %vm1566_vm1, %v4237_v57, %v627_v7 }
 0x216   : > { %v1517_v52 = vpop.permute.xlu1 %1516 }
 0x217   : > { %v1135_v35 = vpop.permute.xlu0 %1134  ;;  %v1821_v23 = vsel %vm1797_vm8, %v1788_v10, %v1517_v52 }
 0x218   : > { %3311 = vmatmul.mubr.msk.f32.gmra.mrb[4].mxu1 %vm1842_vm9, %v1821_v23  ;;  %v1723_v3 = vsel %vm1698_vm5, %v1690_v12, %v1135_v35 }
 0x21a   : > { %v755_v37 = vpop.permute.xlu1 %754 }
 0x21b   : > { %v629_v9 = vpop.permute.xlu0 %628  ;;  %v1626_v10 = vsel %vm1599_vm2, %v1593_v50, %v755_v37 }
 0x21c   : > { %v1594_v37 = vsel %vm1566_vm1, %v4266_v15, %v629_v9 }
 0x21e   : > { %v1263_v32 = vpop.permute.xlu1 %1262 }
 0x21f   : > { %v1137_v29 = vpop.permute.xlu0 %1136  ;;  %v1756_v59 = vsel %vm1731_vm6, %v1723_v3, %v1263_v32 }
 0x220   : > { %v1724_v0 = vsel %vm1698_vm5, %v1691_v1, %v1137_v29 }
 0x222   : > { %v883_v17 = vpop.permute.xlu1 %882 }
 0x223   : > { %v757_v61 = vpop.permute.xlu0 %756  ;;  %v1659_v52 = vsel %vm1632_vm3, %v1626_v10, %v883_v17 }
 0x224   : > { %v1627_v17 = vsel %vm1599_vm2, %v1594_v37, %v757_v61 }
 0x226   : > { %v1391_v56 = vpop.permute.xlu1 %1390 }
 0x227   : > { %v1265_v54 = vpop.permute.xlu0 %1264  ;;  %v1789_v24 = vsel %vm1764_vm7, %v1756_v59, %v1391_v56 }
 0x228   : > { %v1757_v22 = vsel %vm1731_vm6, %v1724_v0, %v1265_v54 }
 0x22a   : > { %v1011_v51 = vpop.permute.xlu1 %1010 }
 0x22b   : > { %v885_v4 = vpop.permute.xlu0 %884  ;;  %v4563_v31 = vpop.f32.mrb[10].mxu0  ;;  %v1692_v32 = vsel %vm1665_vm4, %v1659_v52, %v1011_v51 }
 0x22c   : > { %v4566_v18 = vpop.f32.mrb[11].mxu0  ;;  %v1660_v51 = vsel %vm1632_vm3, %v1627_v17, %v885_v4 }
 0x22e   : > { %v1519_v11 = vpop.permute.xlu1 %1518 }
 0x22f   : > { %v1393_v28 = vpop.permute.xlu0 %1392  ;;  %v1822_v13 = vsel %vm1797_vm8, %v1789_v24, %v1519_v11 }
 0x230   : > { %3313 = vmatprep.mubr.msk.f32.mxu1 %vm1842_vm9, %v1822_v13  ;;  %v1790_v21 = vsel %vm1764_vm7, %v1757_v22, %v1393_v28 }
 0x232   : > { %v1013_v5 = vpop.permute.xlu1 %1012 }
 0x233   : > { %v631_v25 = vpop.permute.xlu0 %630  ;;  %v1693_v59 = vsel %vm1665_vm4, %v1660_v51, %v1013_v5 }
 0x234   : > { %v1595_v22 = vsel %vm1566_vm1, %v4309_v46, %v631_v25 }
 0x236   : > { %v1521_v30 = vpop.permute.xlu1 %1520 }
 0x237   : > { %v1139_v45 = vpop.permute.xlu0 %1138  ;;  %v1823_v20 = vsel %vm1797_vm8, %v1790_v21, %v1521_v30 }
 0x238   : > { %3314 = vmatmul.mubr.msk.f32.gmra.mrb[6].mxu1 %vm1842_vm9, %v1823_v20  ;;  %v1725_v29 = vsel %vm1698_vm5, %v1692_v32, %v1139_v45 }
 0x23a   : > { %v759_v58 = vpop.permute.xlu1 %758 }
 0x23b   : > { %v633_v8 = vpop.permute.xlu0 %632  ;;  %v1628_v21 = vsel %vm1599_vm2, %v1595_v22, %v759_v58 }
 0x23c   : > { %v1596_v58 = vsel %vm1566_vm1, %v4338_v48, %v633_v8 }
 0x23e   : > { %v1267_v40 = vpop.permute.xlu1 %1266 }
 0x23f   : > { %v1141_v53 = vpop.permute.xlu0 %1140  ;;  %v1758_v54 = vsel %vm1731_vm6, %v1725_v29, %v1267_v40 }
 0x240   : > { %v1726_v24 = vsel %vm1698_vm5, %v1693_v59, %v1141_v53 }
 0x242   : > { %v887_v49 = vpop.permute.xlu1 %886 }
 0x243   : > { %v761_v62 = vpop.permute.xlu0 %760  ;;  %v1661_v30 = vsel %vm1632_vm3, %v1628_v21, %v887_v49 }
 0x244   : > { %v1629_v49 = vsel %vm1599_vm2, %v1596_v58, %v761_v62 }
 0x246   : > { %v1395_v26 = vpop.permute.xlu1 %1394 }
 0x247   : > { %v1269_v41 = vpop.permute.xlu0 %1268  ;;  %v1791_v42 = vsel %vm1764_vm7, %v1758_v54, %v1395_v26 }
 0x248   : > { %v1759_v11 = vsel %vm1731_vm6, %v1726_v24, %v1269_v41 }
 0x24a   : > { %v1015_v35 = vpop.permute.xlu1 %1014 }
 0x24b   : > { %v889_v23 = vpop.permute.xlu0 %888  ;;  %v4589_v56 = vpop.f32.mrb[12].mxu0  ;;  %v1694_v40 = vsel %vm1665_vm4, %v1661_v30, %v1015_v35 }
 0x24c   : > { %v4592_v44 = vpop.f32.mrb[13].mxu0  ;;  %v1662_v35 = vsel %vm1632_vm3, %v1629_v49, %v889_v23 }
 0x24e   : > { %v1523_v14 = vpop.permute.xlu1 %1522 }
 0x24f   : > { %v1397_v57 = vpop.permute.xlu0 %1396  ;;  %v1824_v7 = vsel %vm1797_vm8, %v1791_v42, %v1523_v14 }
 0x250   : > { %3316 = vmatprep.mubr.msk.f32.mxu1 %vm1842_vm9, %v1824_v7  ;;  %v1792_v28 = vsel %vm1764_vm7, %v1759_v11, %v1397_v57 }
 0x252   : > { %v1017_v12 = vpop.permute.xlu1 %1016 }
 0x253   : > { %v635_v3 = vpop.permute.xlu0 %634  ;;  %v1695_v54 = vsel %vm1665_vm4, %v1662_v35, %v1017_v12 }
 0x254   : > { %v1597_v23 = vsel %vm1566_vm1, %v4381_v34, %v635_v3 }
 0x256   : > { %v1525_v13 = vpop.permute.xlu1 %1524 }
 0x257   : > { %v1143_v2 = vpop.permute.xlu0 %1142  ;;  %v1825_v15 = vsel %vm1797_vm8, %v1792_v28, %v1525_v13 }
 0x258   : > { %3317 = vmatmul.mubr.msk.f32.gmra.mrb[8].mxu1 %vm1842_vm9, %v1825_v15  ;;  %v1727_v53 = vsel %vm1698_vm5, %v1694_v40, %v1143_v2  ;;  %v2238_v40 = vld [vmem:[%s5519_s5 + $0x8] sm:$0xff] }
 0x25a   : > { %v763_v9 = vpop.permute.xlu1 %762 }
 0x25b   : > { %v637_v61 = vpop.permute.xlu0 %636  ;;  %v1630_v51 = vsel %vm1599_vm2, %v1597_v23, %v763_v9 }
 0x25c   : > { %v1598_v17 = vsel %vm1566_vm1, %v4410_v55, %v637_v61 }
 0x25e   : > { %v1271_v36 = vpop.permute.xlu1 %1270 }
 0x25f   : > { %v1145_v4 = vpop.permute.xlu0 %1144  ;;  %v1760_v41 = vsel %vm1731_vm6, %v1727_v53, %v1271_v36  ;;  %v3525_v53 = vmov 0.0|0.0  }
 0x260   : > { %v1728_v42 = vsel %vm1698_vm5, %v1695_v54, %v1145_v4  ;;  %3347 = vmatprep.subr.bf16.mxu1 %v3525_v53 }
 0x262   : > { %v891_v33 = vpop.permute.xlu1 %890 }
 0x263   : > { %v765_v1 = vpop.permute.xlu0 %764  ;;  %v1663_v59 = vsel %vm1632_vm3, %v1630_v51, %v891_v33 }
 0x264   : > { %v1631_v12 = vsel %vm1599_vm2, %v1598_v17, %v765_v1 }
 0x266   : > { %v1399_v0 = vpop.permute.xlu1 %1398 }
 0x267   : > { %v1273_v5 = vpop.permute.xlu0 %1272  ;;  %v1793_v10 = vsel %vm1764_vm7, %v1760_v41, %v1399_v0 }
 0x268   : > { %v1761_v14 = vsel %vm1731_vm6, %v1728_v42, %v1273_v5 }
 0x26a   : > { %v1019_v45 = vpop.permute.xlu1 %1018 }
 0x26b   : > { %v893_v20 = vpop.permute.xlu0 %892  ;;  %v4613_v26 = vpop.f32.mrb[14].mxu0  ;;  %v1696_v13 = vsel %vm1665_vm4, %v1663_v59, %v1019_v45 }
 0x26c   : > { %v4616_v50 = vpop.f32.mrb[15].mxu0  ;;  %v1664_v24 = vsel %vm1632_vm3, %v1631_v12, %v893_v20  ;;  %v2237_v20 = vld [vmem:[%s5519_s5] sm:$0xff] }
 0x26d   : > { %v4669_v41 = vpack.c.bf16 %v2238_v40, %v2237_v20 }
 0x26e   : > { %v1527_v52 = vpop.permute.xlu1 %1526 }
 0x26f   : > { %v1401_v46 = vpop.permute.xlu0 %1400  ;;  %v1826_v25 = vsel %vm1797_vm8, %v1793_v10, %v1527_v52  ;;  %3349 = vmatpush3.bf16.msra.mxu1 %v4669_v41 }
 0x270   : > { %3319 = vmatprep.mubr.msk.f32.mxu1 %vm1842_vm9, %v1826_v25  ;;  %v1794_v57 = vsel %vm1764_vm7, %v1761_v14, %v1401_v46  ;;  %3350 = vmatprep.subr.bf16.mxu1 %v3525_v53  ;;  %v3527_v46 = vmov 0.0   ;;  %v4681_v25 = vld [vmem:[%s5516_s2] ss:$0 sm:$0xff] }
 0x271   : > { %v4685_v58 = vadd.f32 %v4245_v43, %v4681_v25  ;;  %v4689_v49 = vadd.f32 %v4681_v25, %v4251_v6  ;;  %v4693_v35 = vadd.f32 %v4681_v25, %v4323_v60  ;;  %v4703_v43 = vadd.f32 %v4317_v16, %v4681_v25 }
 0x272   : > { %v1147_v32 = vpop.permute.xlu1 %1146  ;;  %v4707_v6 = vadd.f32 %v4681_v25, %v4395_v39  ;;  %v4721_v16 = vadd.f32 %v4681_v25, %v4466_v38  ;;  %v4729_v51 = vadd.f32 %v4461_v47, %v4681_v25  ;;  %v4745_v47 = vadd.f32 %v4681_v25, %v4566_v18 }
 0x273   : > { %v1021_v29 = vpop.permute.xlu0 %1020  ;;  %v1729_v15 = vsel %vm1698_vm5, %v1696_v13, %v1147_v32  ;;  %v2169_v32 = vsel %vm1665_vm4, %v4685_v58, 0.0  ;;  %v2171_v54 = vsel %vm1665_vm4, %v4693_v35, 0.0 }
 0x274   : > { %v1697_v2 = vsel %vm1665_vm4, %v1664_v24, %v1021_v29  ;;  %v2168_v29 = vsel %vm1665_vm4, %v4689_v49, 0.0  ;;  %v2179_v23 = vsel %vm1665_vm4, %v4721_v16, 0.0  ;;  %v2181_v38 = vsel %vm1665_vm4, %v4729_v51, 0.0 }
 0x275   : > { %v2170_v42 = vadd.f32 %v2169_v32, %v2168_v29  ;;  %v2187_v13 = vsel %vm1665_vm4, %v4745_v47, 0.0 }
 0x276   : > { %v1149_v7 = vpop.permute.xlu1 %1148 }
 0x277   : > { %v1529_v37 = vpop.permute.xlu0 %1528  ;;  %v1730_v34 = vsel %vm1698_vm5, %v1697_v2, %v1149_v7  ;;  %v2172_v60 = vadd.f32 %v2171_v54, %v2170_v42  ;;  %v2175_v7 = vsel %vm1665_vm4, %v4707_v6, 0.0 }
 0x278   : > { %v1827_v48 = vsel %vm1797_vm8, %v1794_v57, %v1529_v37  ;;  %v2173_v57 = vsel %vm1665_vm4, %v4703_v43, 0.0 }
 0x279   : > { %3320 = vmatmul.mubr.msk.f32.gmra.mrb[10].mxu1 %vm1842_vm9, %v1827_v48  ;;  %v2174_v48 = vadd.f32 %v2173_v57, %v2172_v60 }
 0x27a   : > { %v1277_v8 = vpop.permute.xlu1 %1276 }
 0x27b   : > { %v1275_v62 = vpop.permute.xlu0 %1274  ;;  %v1763_v55 = vsel %vm1731_vm6, %v1730_v34, %v1277_v8  ;;  %v4717_v8 = vadd.f32 %v4389_v63, %v4681_v25  ;;  %v2176_v39 = vadd.f32 %v2175_v7, %v2174_v48  ;;  %v4733_v63 = vadd.f32 %v4681_v25, %v4532_v19 }
 0x27c   : > { %v1762_v3 = vsel %vm1731_vm6, %v1729_v15, %v1275_v62  ;;  %v4753_v15 = vadd.f32 %v4563_v31, %v4681_v25  ;;  %v4769_v31 = vadd.f32 %v4681_v25, %v4616_v50 }
 0x27d   : > { %v2177_v62 = vsel %vm1665_vm4, %v4717_v8, 0.0  ;;  %v2183_v59 = vsel %vm1665_vm4, %v4733_v63, 0.0 }
 0x27e   : > { %v1405_v11 = vpop.permute.xlu1 %1404  ;;  %v2178_v17 = vadd.f32 %v2177_v62, %v2176_v39  ;;  %v2189_v18 = vsel %vm1665_vm4, %v4753_v15, 0.0 }
 0x27f   : > { %v1403_v28 = vpop.permute.xlu0 %1402  ;;  %v1796_v9 = vsel %vm1764_vm7, %v1763_v55, %v1405_v11  ;;  %v4741_v11 = vadd.f32 %v4527_v27, %v4681_v25  ;;  %v4757_v27 = vadd.f32 %v4681_v25, %v4592_v44 }
 0x280   : > { %v1795_v61 = vsel %vm1764_vm7, %v1762_v3, %v1403_v28  ;;  %v2180_v12 = vadd.f32 %v2179_v23, %v2178_v17 }
 0x281   : > { %v2185_v19 = vsel %vm1665_vm4, %v4741_v11, 0.0  ;;  %v2191_v55 = vsel %vm1665_vm4, %v4757_v27, 0.0 }
 0x282   : > { %v1533_v36 = vpop.permute.xlu1 %1532  ;;  %v2182_v24 = vadd.f32 %v2181_v38, %v2180_v12 }
 0x283   : > { %v1531_v4 = vpop.permute.xlu0 %1530  ;;  %v1829_v33 = vsel %vm1797_vm8, %v1796_v9, %v1533_v36  ;;  %v4765_v9 = vadd.f32 %v4589_v56, %v4681_v25  ;;  %v2195_v36 = vsel %vm1665_vm4, %v4769_v31, 0.0 }
 0x284   : > { %v1828_v1 = vsel %vm1797_vm8, %v1795_v61, %v1531_v4  ;;  %v2184_v28 = vadd.f32 %v2183_v59, %v2182_v24 }
 0x285   : > { %3322 = vmatprep.mubr.msk.f32.mxu1 %vm1842_vm9, %v1828_v1  ;;  %v2193_v44 = vsel %vm1665_vm4, %v4765_v9, 0.0  ;;  %v4777_v1 = vadd.f32 %v4613_v26, %v4681_v25 }
 0x286   : > { %3323 = vmatmul.mubr.msk.f32.gmra.mrb[12].mxu1 %vm1842_vm9, %v1829_v33  ;;  %v2186_v2 = vadd.f32 %v2185_v19, %v2184_v28 }
 0x287   : > { %3329 = vmatprep.mubr.msk.f32.mxu1 %vm3526_vm10, %v3527_v46  ;;  %v2197_v40 = vsel %vm1665_vm4, %v4777_v1, 0.0 }
 0x288   : > { %v2188_v34 = vadd.f32 %v2187_v13, %v2186_v2 }
 0x28a   : > { %v2190_v3 = vadd.f32 %v2189_v18, %v2188_v34 }
 0x28b   : > { %v4651_v0 = vpop.f32.mrb[16].mxu0 }
 0x28c   : > { %v4653_v5 = vpop.f32.mrb[17].mxu0  ;;  %v2192_v61 = vadd.f32 %v2191_v55, %v2190_v3  ;;  %v4789_v29 = vadd.f32 %v4651_v0, %v4681_v25 }
 0x28d   : > { %v4781_v56 = vadd.f32 %v4681_v25, %v4653_v5 }
 0x28e   : > { %v2194_v4 = vadd.f32 %v2193_v44, %v2192_v61  ;;  %v2201_v5 = vsel %vm1665_vm4, %v4789_v29, 0.0 }
 0x28f   : > { %v2199_v53 = vsel %vm1665_vm4, %v4781_v56, 0.0 }
 0x290   : > { %v2196_v50 = vadd.f32 %v2195_v36, %v2194_v4 }
 0x292   : > { %v2198_v32 = vadd.f32 %v2197_v40, %v2196_v50 }
 0x294   : > { %v2200_v54 = vadd.f32 %v2199_v53, %v2198_v32 }
 0x296   : > { %v2202_v60 = vadd.f32 %v2201_v5, %v2200_v54 }
 0x2ab   : > { %v4655_v22 = vpop.f32.mrb[0].mxu1 }
 0x2ac   : > { %v4657_v21 = vpop.f32.mrb[1].mxu1  ;;  %v4801_v57 = vadd.f32 %v4655_v22, %v4681_v25 }
 0x2ad   : > { %v4793_v26 = vadd.f32 %v4681_v25, %v4657_v21 }
 0x2ae   : > { %v2205_v21 = vsel %vm1665_vm4, %v4801_v57, 0.0 }
 0x2af   : > { %v2203_v42 = vsel %vm1665_vm4, %v4793_v26, 0.0 }
 0x2b0   : > { %v2204_v7 = vadd.f32 %v2203_v42, %v2202_v60 }
 0x2b2   : > { %v2206_v39 = vadd.f32 %v2205_v21, %v2204_v7 }
 0x2cb   : > { %v4659_v30 = vpop.f32.mrb[2].mxu1 }
 0x2cc   : > { %v4661_v45 = vpop.f32.mrb[3].mxu1  ;;  %v4813_v62 = vadd.f32 %v4659_v30, %v4681_v25 }
 0x2cd   : > { %v4805_v0 = vadd.f32 %v4681_v25, %v4661_v45 }
 0x2ce   : > { %v2209_v45 = vsel %vm1665_vm4, %v4813_v62, 0.0 }
 0x2cf   : > { %v2207_v48 = vsel %vm1665_vm4, %v4805_v0, 0.0 }
 0x2d0   : > { %v2208_v23 = vadd.f32 %v2207_v48, %v2206_v39 }
 0x2d2   : > { %v2210_v12 = vadd.f32 %v2209_v45, %v2208_v23 }
 0x2eb   : > { %v4672_v10 = vpop.f32.mrb[4].mxu1 }
 0x2ec   : > { %v4674_v52 = vpop.f32.mrb[5].mxu1  ;;  %v4825_v38 = vadd.f32 %v4672_v10, %v4681_v25 }
 0x2ed   : > { %v4817_v22 = vadd.f32 %v4681_v25, %v4674_v52 }
 0x2ee   : > { %v2213_v52 = vsel %vm1665_vm4, %v4825_v38, 0.0 }
 0x2ef   : > { %v2211_v17 = vsel %vm1665_vm4, %v4817_v22, 0.0 }
 0x2f0   : > { %v2212_v30 = vadd.f32 %v2211_v17, %v2210_v12 }
 0x2f2   : > { %v2214_v28 = vadd.f32 %v2213_v52, %v2212_v30 }
 0x30b   : > { %v4709_v14 = vpop.f32.mrb[6].mxu1 }
 0x30c   : > { %v2129_v37 = vpop.f32.mrb[7].mxu1  ;;  %v4836_v19 = vadd.f32 %v4709_v14, %v4681_v25 }
 0x30d   : > { %v4828_v59 = vadd.f32 %v4681_v25, %v2129_v37 }
 0x30e   : > { %v2217_v37 = vsel %vm1665_vm4, %v4836_v19, 0.0 }
 0x30f   : > { %v2215_v24 = vsel %vm1665_vm4, %v4828_v59, 0.0 }
 0x310   : > { %v2216_v10 = vadd.f32 %v2215_v24, %v2214_v28 }
 0x312   : > { %v2218_v55 = vadd.f32 %v2217_v37, %v2216_v10 }
 0x32b   : > { %v3318_v33 = vpop.f32.mrb[8].mxu1 }
 0x32c   : > { %v2139_v20 = vpop.f32.mrb[9].mxu1  ;;  %v4846_v3 = vadd.f32 %v3318_v33, %v4681_v25 }
 0x32d   : > { %v4839_v13 = vadd.f32 %v4681_v25, %v2139_v20 }
 0x32e   : > { %v2221_v44 = vsel %vm1665_vm4, %v4846_v3, 0.0 }
 0x32f   : > { %v2219_v18 = vsel %vm1665_vm4, %v4839_v13, 0.0 }
 0x330   : > { %v2220_v14 = vadd.f32 %v2219_v18, %v2218_v55 }
 0x332   : > { %v2222_v4 = vadd.f32 %v2221_v44, %v2220_v14 }
 0x34c   : > { %v3321_v2 = vpop.f32.mrb[10].mxu1 }
 0x34d   : > { %v2149_v34 = vpop.f32.mrb[11].mxu1  ;;  %v4856_v20 = vadd.f32 %v3321_v2, %v4681_v25 }
 0x34e   : > { %v4849_v61 = vadd.f32 %v4681_v25, %v2149_v34 }
 0x34f   : > { %v2225_v33 = vsel %vm1665_vm4, %v4856_v20, 0.0 }
 0x350   : > { %v2223_v36 = vsel %vm1665_vm4, %v4849_v61, 0.0 }
 0x351   : > { %v2224_v50 = vadd.f32 %v2223_v36, %v2222_v4 }
 0x353   : > { %v2226_v5 = vadd.f32 %v2225_v33, %v2224_v50 }
 0x359   : > { %v3324_v40 = vpop.f32.mrb[12].mxu1 }
 0x35a   : > { %v2159_v53 = vpop.f32.mrb[13].mxu1  ;;  %v4861_v32 = vadd.f32 %v3324_v40, %v4681_v25 }
 0x35b   : > { %v4864_v54 = vadd.f32 %v4681_v25, %v2159_v53  ;;  %v2313_v25 = vlaneseq }
 0x35c   : > { %v2229_v7 = vsel %vm1665_vm4, %v4861_v32, 0.0 }
 0x35d   : > { %v2227_v42 = vsel %vm1665_vm4, %v4864_v54, 0.0  ;;  %v4874_v52 = vshrl.u32 %v2313_v25, 7 }
 0x35e   : > { %v2228_v60 = vadd.f32 %v2227_v42, %v2226_v5 }
 0x35f   : > { %v2315_v10 = vsub.s32 0, %v4874_v52  ;;  %v5119_v52 = vld [vmem:[%s5517_s3] ss:$0 sm:$0xff] }
 0x360   : > { %v2230_v21 = vadd.f32 %v2229_v7, %v2228_v60 }
 0x362   : > { %v2231_v48 = vrot.slane %v2230_v21, 4 }
 0x364   : > { %v2232_v39 = vadd.f32 %v2231_v48, %v2230_v21 }
 0x366   : > { %v2233_v23 = vrot.slane %v2232_v39, 2 }
 0x368   : > { %v2234_v45 = vadd.f32 %v2233_v23, %v2232_v39 }
 0x36a   : > { %v2235_v17 = vrot.slane %v2234_v45, 1 }
 0x36c   : > { %v2236_v12 = vadd.f32 %v2235_v17, %v2234_v45 }
 0x36e   : > { %3330 = vmatmul.mubr.msk.f32.vlgmr.msra.gmra.mrb[14].mxu1 %vm1665_vm4, %v2236_v12 }
 0x36f   : > { %3352 = vmatpush3.bf16.msra.mxu1 %v4669_v41  ;;  %3336 = vmatprep.mubr.msk.f32.mxu1 %vm3526_vm10, %v3527_v46 }
 0x441   : > { %v2308_v30 = vpop.f32.mrb[14].mxu1 }
 0x442   : > { %v3331_v24 = vpop.f32.mrb[15].mxu1  ;;  %v2312_v28 = vmul.f32 0.001953125, %v2308_v30 }
 0x444   : > { %v4879_v2 = vrot.slane %v2312_v28, %v2315_v10 }
 0x446   : > { %v4883_v34 = vsub.f32 %v4689_v49, %v4879_v2  ;;  %v4887_v41 = vsub.f32 %v4685_v58, %v4879_v2  ;;  %v4891_v46 = vsub.f32 %v4693_v35, %v4879_v2  ;;  %v4895_v37 = vsub.f32 %v4703_v43, %v4879_v2 }
 0x447   : > { %v4903_v49 = vsub.f32 %v4707_v6, %v4879_v2  ;;  %v4909_v35 = vsub.f32 %v4717_v8, %v4879_v2  ;;  %v4917_v4 = vsub.f32 %v4721_v16, %v4879_v2  ;;  %v4924_v8 = vsub.f32 %v4729_v51, %v4879_v2 }
 0x448   : > { %v2349_v18 = vmul.f32 %v4883_v34, %v4883_v34  ;;  %v2350_v55 = vmul.f32 %v4887_v41, %v4887_v41  ;;  %v2351_v58 = vmul.f32 %v4891_v46, %v4891_v46  ;;  %v2352_v43 = vmul.f32 %v4895_v37, %v4895_v37 }
 0x449   : > { %v2353_v6 = vmul.f32 %v4903_v49, %v4903_v49  ;;  %v2354_v53 = vmul.f32 %v4909_v35, %v4909_v35  ;;  %v4931_v16 = vsub.f32 %v4733_v63, %v4879_v2  ;;  %v2355_v42 = vmul.f32 %v4917_v4, %v4917_v4 }
 0x44a   : > { %v2381_v14 = vsel %vm1665_vm4, %v2349_v18, 0.0  ;;  %v2382_v44 = vsel %vm1665_vm4, %v2350_v55, 0.0  ;;  %v2384_v50 = vsel %vm1665_vm4, %v2351_v58, 0.0  ;;  %v2386_v33 = vsel %vm1665_vm4, %v2352_v43, 0.0 }
 0x44b   : > { %v2383_v36 = vadd.f32 %v2382_v44, %v2381_v14  ;;  %v2388_v60 = vsel %vm1665_vm4, %v2353_v6, 0.0  ;;  %v4938_v51 = vsub.f32 %v4741_v11, %v4879_v2  ;;  %v2356_v21 = vmul.f32 %v4924_v8, %v4924_v8 }
 0x44c   : > { %v2390_v48 = vsel %vm1665_vm4, %v2354_v53, 0.0  ;;  %v4945_v63 = vsub.f32 %v4745_v47, %v4879_v2  ;;  %v2357_v23 = vmul.f32 %v4931_v16, %v4931_v16  ;;  %v2392_v45 = vsel %vm1665_vm4, %v2355_v42, 0.0 }
 0x44d   : > { %v2385_v40 = vadd.f32 %v2384_v50, %v2383_v36  ;;  %v4952_v11 = vsub.f32 %v4753_v15, %v4879_v2  ;;  %v2358_v12 = vmul.f32 %v4938_v51, %v4938_v51  ;;  %v2394_v25 = vsel %vm1665_vm4, %v2356_v21, 0.0 }
 0x44e   : > { %v4959_v47 = vsub.f32 %v4757_v27, %v4879_v2  ;;  %v2359_v24 = vmul.f32 %v4945_v63, %v4945_v63  ;;  %v2396_v28 = vsel %vm1665_vm4, %v2357_v23, 0.0  ;;  %v4966_v15 = vsub.f32 %v4765_v9, %v4879_v2 }
 0x44f   : > { %v2387_v5 = vadd.f32 %v2386_v33, %v2385_v40  ;;  %v2360_v55 = vmul.f32 %v4952_v11, %v4952_v11  ;;  %v2398_v58 = vsel %vm1665_vm4, %v2358_v12, 0.0  ;;  %v4973_v27 = vsub.f32 %v4769_v31, %v4879_v2 }
 0x450   : > { %v2361_v14 = vmul.f32 %v4959_v47, %v4959_v47  ;;  %v2400_v44 = vsel %vm1665_vm4, %v2359_v24, 0.0  ;;  %v4980_v9 = vsub.f32 %v4777_v1, %v4879_v2  ;;  %v2362_v6 = vmul.f32 %v4966_v15, %v4966_v15 }
 0x451   : > { %v2389_v7 = vadd.f32 %v2388_v60, %v2387_v5  ;;  %v2402_v50 = vsel %vm1665_vm4, %v2360_v55, 0.0  ;;  %v4987_v31 = vsub.f32 %v4781_v56, %v4879_v2  ;;  %v2363_v53 = vmul.f32 %v4973_v27, %v4973_v27 }
 0x452   : > { %v2404_v33 = vsel %vm1665_vm4, %v2361_v14, 0.0  ;;  %v4994_v1 = vsub.f32 %v4789_v29, %v4879_v2  ;;  %v2364_v42 = vmul.f32 %v4980_v9, %v4980_v9  ;;  %v2406_v60 = vsel %vm1665_vm4, %v2362_v6, 0.0 }
 0x453   : > { %v2391_v39 = vadd.f32 %v2390_v48, %v2389_v7  ;;  %v5001_v56 = vsub.f32 %v4793_v26, %v4879_v2  ;;  %v2365_v21 = vmul.f32 %v4987_v31, %v4987_v31  ;;  %v2408_v48 = vsel %vm1665_vm4, %v2363_v53, 0.0 }
 0x454   : > { %v5008_v29 = vsub.f32 %v4801_v57, %v4879_v2  ;;  %v2366_v23 = vmul.f32 %v4994_v1, %v4994_v1  ;;  %v5015_v26 = vsub.f32 %v4805_v0, %v4879_v2  ;;  %v5022_v57 = vsub.f32 %v4813_v62, %v4879_v2 }
 0x455   : > { %v2393_v17 = vadd.f32 %v2392_v45, %v2391_v39  ;;  %v2410_v45 = vsel %vm1665_vm4, %v2364_v42, 0.0  ;;  %v2367_v12 = vmul.f32 %v5001_v56, %v5001_v56  ;;  %v5029_v0 = vsub.f32 %v4817_v22, %v4879_v2 }
 0x456   : > { %v2368_v24 = vmul.f32 %v5008_v29, %v5008_v29  ;;  %v2369_v55 = vmul.f32 %v5015_v26, %v5015_v26  ;;  %v5036_v62 = vsub.f32 %v4825_v38, %v4879_v2  ;;  %v2370_v14 = vmul.f32 %v5022_v57, %v5022_v57 }
 0x457   : > { %v2395_v30 = vadd.f32 %v2394_v25, %v2393_v17  ;;  %v2412_v25 = vsel %vm1665_vm4, %v2365_v21, 0.0  ;;  %v5043_v22 = vsub.f32 %v4828_v59, %v4879_v2  ;;  %v2371_v6 = vmul.f32 %v5029_v0, %v5029_v0 }
 0x458   : > { %v5050_v38 = vsub.f32 %v4836_v19, %v4879_v2  ;;  %v2372_v53 = vmul.f32 %v5036_v62, %v5036_v62  ;;  %v5057_v59 = vsub.f32 %v4839_v13, %v4879_v2  ;;  %v5064_v19 = vsub.f32 %v4846_v3, %v4879_v2 }
 0x459   : > { %v2397_v18 = vadd.f32 %v2396_v28, %v2395_v30  ;;  %v2414_v28 = vsel %vm1665_vm4, %v2366_v23, 0.0  ;;  %v2373_v42 = vmul.f32 %v5043_v22, %v5043_v22  ;;  %v5071_v13 = vsub.f32 %v4849_v61, %v4879_v2 }
 0x45a   : > { %v2374_v21 = vmul.f32 %v5050_v38, %v5050_v38  ;;  %v2375_v23 = vmul.f32 %v5057_v59, %v5057_v59  ;;  %v5078_v3 = vsub.f32 %v4856_v20, %v4879_v2  ;;  %v5085_v61 = vsub.f32 %v4864_v54, %v4879_v2 }
 0x45b   : > { %v2399_v43 = vadd.f32 %v2398_v58, %v2397_v18  ;;  %v2416_v58 = vsel %vm1665_vm4, %v2367_v12, 0.0  ;;  %v2376_v12 = vmul.f32 %v5064_v19, %v5064_v19  ;;  %v5092_v20 = vsub.f32 %v4861_v32, %v4879_v2 }
 0x45c   : > { %v2379_v54 = vmul.f32 %v5085_v61, %v5085_v61 }
 0x45d   : > { %v2401_v36 = vadd.f32 %v2400_v44, %v2399_v43  ;;  %v2418_v44 = vsel %vm1665_vm4, %v2368_v24, 0.0  ;;  %v2377_v24 = vmul.f32 %v5071_v13, %v5071_v13 }
 0x45e   : > { %v2440_v32 = vsel %vm1665_vm4, %v2379_v54, 0.0 }
 0x45f   : > { %v2403_v40 = vadd.f32 %v2402_v50, %v2401_v36  ;;  %v2420_v50 = vsel %vm1665_vm4, %v2369_v55, 0.0  ;;  %v2378_v55 = vmul.f32 %v5078_v3, %v5078_v3 }
 0x461   : > { %v2405_v5 = vadd.f32 %v2404_v33, %v2403_v40  ;;  %v2422_v33 = vsel %vm1665_vm4, %v2370_v14, 0.0  ;;  %v2436_v14 = vsel %vm1665_vm4, %v2377_v24, 0.0 }
 0x463   : > { %v2407_v7 = vadd.f32 %v2406_v60, %v2405_v5  ;;  %v2424_v60 = vsel %vm1665_vm4, %v2371_v6, 0.0  ;;  %v2438_v6 = vsel %vm1665_vm4, %v2378_v55, 0.0 }
 0x465   : > { %v2409_v39 = vadd.f32 %v2408_v48, %v2407_v7  ;;  %v2426_v48 = vsel %vm1665_vm4, %v2372_v53, 0.0 }
 0x467   : > { %v2411_v17 = vadd.f32 %v2410_v45, %v2409_v39  ;;  %v2428_v45 = vsel %vm1665_vm4, %v2373_v42, 0.0 }
 0x469   : > { %v2413_v30 = vadd.f32 %v2412_v25, %v2411_v17  ;;  %v2430_v25 = vsel %vm1665_vm4, %v2374_v21, 0.0 }
 0x46b   : > { %v2415_v18 = vadd.f32 %v2414_v28, %v2413_v30  ;;  %v2432_v28 = vsel %vm1665_vm4, %v2375_v23, 0.0 }
 0x46d   : > { %v2417_v43 = vadd.f32 %v2416_v58, %v2415_v18  ;;  %v2434_v58 = vsel %vm1665_vm4, %v2376_v12, 0.0 }
 0x46f   : > { %v2419_v36 = vadd.f32 %v2418_v44, %v2417_v43 }
 0x471   : > { %v2421_v40 = vadd.f32 %v2420_v50, %v2419_v36  ;;  %v2380_v36 = vmul.f32 %v5092_v20, %v5092_v20 }
 0x473   : > { %v2423_v5 = vadd.f32 %v2422_v33, %v2421_v40  ;;  %v2442_v40 = vsel %vm1665_vm4, %v2380_v36, 0.0 }
 0x475   : > { %v2425_v7 = vadd.f32 %v2424_v60, %v2423_v5 }
 0x477   : > { %v2427_v39 = vadd.f32 %v2426_v48, %v2425_v7 }
 0x479   : > { %v2429_v17 = vadd.f32 %v2428_v45, %v2427_v39 }
 0x47b   : > { %v2431_v30 = vadd.f32 %v2430_v25, %v2429_v17 }
 0x47d   : > { %v2433_v18 = vadd.f32 %v2432_v28, %v2431_v30 }
 0x47f   : > { %v2435_v43 = vadd.f32 %v2434_v58, %v2433_v18 }
 0x481   : > { %v2437_v44 = vadd.f32 %v2436_v14, %v2435_v43 }
 0x483   : > { %v2439_v50 = vadd.f32 %v2438_v6, %v2437_v44 }
 0x485   : > { %v2441_v2 = vadd.f32 %v2440_v32, %v2439_v50 }
 0x487   : > { %v2443_v53 = vadd.f32 %v2442_v40, %v2441_v2 }
 0x489   : > { %v2444_v33 = vrot.slane %v2443_v53, 4 }
 0x48b   : > { %v2445_v5 = vadd.f32 %v2444_v33, %v2443_v53 }
 0x48d   : > { %v2446_v42 = vrot.slane %v2445_v5, 2 }
 0x48f   : > { %v2447_v60 = vadd.f32 %v2446_v42, %v2445_v5 }
 0x491   : > { %v2448_v7 = vrot.slane %v2447_v60, 1 }
 0x493   : > { %v2449_v21 = vadd.f32 %v2448_v7, %v2447_v60 }
 0x495   : > { %3337 = vmatmul.mubr.msk.f32.vlgmr.msra.gmra.mrb[16].mxu1 %vm1665_vm4, %v2449_v21 }
 0x568   : > { %v2519_v48 = vpop.f32.mrb[16].mxu1 }
 0x569   : > { %v3338_v39 = vpop.f32.mrb[17].mxu1  ;;  %v2523_v23 = vmul.f32 0.001953125, %v2519_v48 }
 0x56b   : > { %v2524_v45 = vadd.f32 1e-05, %v2523_v23 }
 0x56d   : > { %3379 = vrsqrt.f32 %v2524_v45 }
 0x577   : > { %v3380_v17 = vpop.eup %3379 }
 0x578   : > { %v2529_v12 = vrot.slane %v3380_v17, %v2315_v10 }
 0x57a   : > { %v2530_v25 = vmul.f32 %v2529_v12, %v4883_v34  ;;  %v2531_v30 = vmul.f32 %v2529_v12, %v4887_v41  ;;  %v2532_v24 = vmul.f32 %v2529_v12, %v4891_v46  ;;  %v2533_v28 = vmul.f32 %v2529_v12, %v4895_v37 }
 0x57b   : > { %v2534_v18 = vmul.f32 %v2529_v12, %v4903_v49  ;;  %v2535_v55 = vmul.f32 %v2529_v12, %v4909_v35  ;;  %v2536_v58 = vmul.f32 %v2529_v12, %v4917_v4  ;;  %v2537_v43 = vmul.f32 %v2529_v12, %v4924_v8 }
 0x57c   : > { %v2538_v10 = vmul.f32 %v2529_v12, %v4931_v16  ;;  %v2539_v34 = vmul.f32 %v2529_v12, %v4938_v51  ;;  %v2540_v41 = vmul.f32 %v2529_v12, %v4945_v63  ;;  %v2541_v46 = vmul.f32 %v2529_v12, %v4952_v11 }
 0x57d   : > { %v2542_v37 = vmul.f32 %v2529_v12, %v4959_v47  ;;  %v2543_v49 = vmul.f32 %v2529_v12, %v4966_v15  ;;  %v2544_v35 = vmul.f32 %v2529_v12, %v4973_v27  ;;  %v2545_v4 = vmul.f32 %v2529_v12, %v4980_v9  ;;  %v5142_v27 = vld [vmem:[%s5518_s4] ss:$0 sm:$0xff] }
 0x57e   : > { %v2546_v8 = vmul.f32 %v2529_v12, %v4987_v31  ;;  %v2569_v54 = vmul.f32 %v5119_v52, %v2530_v25  ;;  %v2570_v16 = vmul.f32 %v5119_v52, %v2531_v30  ;;  %v2571_v51 = vmul.f32 %v5119_v52, %v2532_v24 }
 0x57f   : > { %v2547_v63 = vmul.f32 %v2529_v12, %v4994_v1  ;;  %v2548_v11 = vmul.f32 %v2529_v12, %v5001_v56  ;;  %v5136_v47 = vmul.f32 %v2529_v12, %v5008_v29  ;;  %v2572_v15 = vmul.f32 %v5119_v52, %v2533_v28 }
 0x580   : > { %v5145_v9 = vmul.f32 %v2529_v12, %v5015_v26  ;;  %v5148_v31 = vmul.f32 %v2529_v12, %v5022_v57  ;;  %v5151_v1 = vmul.f32 %v2529_v12, %v5029_v0  ;;  %v2573_v56 = vmul.f32 %v5119_v52, %v2534_v18 }
 0x581   : > { %v5155_v29 = vmul.f32 %v2529_v12, %v5036_v62  ;;  %v5158_v14 = vmul.f32 %v2529_v12, %v5043_v22  ;;  %v5161_v44 = vmul.f32 %v2529_v12, %v5050_v38  ;;  %v2574_v26 = vmul.f32 %v5119_v52, %v2535_v55 }
 0x582   : > { %v2575_v36 = vmul.f32 %v5119_v52, %v2536_v58  ;;  %v5166_v57 = vadd.f32 %v5142_v27, %v2569_v54  ;;  %v5169_v0 = vadd.f32 %v5142_v27, %v2570_v16  ;;  %v5172_v6 = vadd.f32 %v5142_v27, %v2571_v51 }
 0x583   : > { %v5175_v62 = vmul.f32 %v2529_v12, %v5057_v59  ;;  %v5178_v22 = vmul.f32 %v2529_v12, %v5064_v19  ;;  %v2576_v38 = vmul.f32 %v5119_v52, %v2537_v43  ;;  %v5182_v50 = vadd.f32 %v5142_v27, %v2572_v15 }
 0x584   : > { %v5185_v32 = vmul.f32 %v2529_v12, %v5071_v13  ;;  %v5188_v2 = vmul.f32 %v2529_v12, %v5078_v3  ;;  %v2577_v40 = vmul.f32 %v5119_v52, %v2538_v10  ;;  %v5192_v53 = vadd.f32 %v5142_v27, %v2573_v56 }
 0x585   : > { %v5195_v59 = vmul.f32 %v2529_v12, %v5085_v61  ;;  %v2578_v19 = vmul.f32 %v5119_v52, %v2539_v34  ;;  %v2579_v33 = vmul.f32 %v5119_v52, %v2540_v41  ;;  %v5200_v5 = vadd.f32 %v5142_v27, %v2574_v26 }
 0x586   : > { %v5203_v13 = vadd.f32 %v5142_v27, %v2575_v36  ;;  %v3189_v3 = vmul.f32 -1.442695, %v5166_v57  ;;  %v3190_v42 = vmul.f32 -1.442695, %v5169_v0  ;;  %v3191_v60 = vmul.f32 -1.442695, %v5172_v6 }
 0x587   : > { %v5209_v7 = vmul.f32 %v2529_v12, %v5092_v20  ;;  %v2580_v61 = vmul.f32 %v5119_v52, %v2541_v46  ;;  %v5213_v21 = vadd.f32 %v5142_v27, %v2576_v38  ;;  %v3192_v48 = vmul.f32 -1.442695, %v5182_v50 }
 0x588   : > { %v2581_v39 = vmul.f32 %v5119_v52, %v2542_v37  ;;  %v5218_v23 = vadd.f32 %v5142_v27, %v2577_v40  ;;  %3381 = vpow2.f32 %v3189_v3  ;;  %v3193_v45 = vmul.f32 -1.442695, %v5192_v53 }
 0x589   : > { %v2582_v17 = vmul.f32 %v5119_v52, %v2543_v49  ;;  %v5223_v20 = vadd.f32 %v5142_v27, %v2578_v19  ;;  %3383 = vpow2.f32 %v3190_v42  ;;  %v3194_v12 = vmul.f32 -1.442695, %v5200_v5 }
 0x58a   : > { %v2583_v25 = vmul.f32 %v5119_v52, %v2544_v35  ;;  %v5228_v30 = vadd.f32 %v5142_v27, %v2579_v33  ;;  %3385 = vpow2.f32 %v3191_v60  ;;  %v3195_v24 = vmul.f32 -1.442695, %v5203_v13 }
 0x58b   : > { %v2584_v28 = vmul.f32 %v5119_v52, %v2545_v4  ;;  %v5233_v18 = vadd.f32 %v5142_v27, %v2580_v61  ;;  %3387 = vpow2.f32 %v3192_v48  ;;  %v3196_v55 = vmul.f32 -1.442695, %v5213_v21 }
 0x58c   : > { %v2585_v58 = vmul.f32 %v5119_v52, %v2546_v8  ;;  %v5238_v43 = vadd.f32 %v5142_v27, %v2581_v39  ;;  %3389 = vpow2.f32 %v3193_v45  ;;  %v3197_v10 = vmul.f32 -1.442695, %v5218_v23 }
 0x58d   : > { %v2586_v34 = vmul.f32 %v5119_v52, %v2547_v63  ;;  %v5243_v41 = vadd.f32 %v5142_v27, %v2582_v17  ;;  %3391 = vpow2.f32 %v3194_v12  ;;  %v3198_v46 = vmul.f32 -1.442695, %v5223_v20 }
 0x58e   : > { %v2587_v37 = vmul.f32 %v5119_v52, %v2548_v11  ;;  %v5248_v49 = vadd.f32 %v5142_v27, %v2583_v25  ;;  %3393 = vpow2.f32 %v3195_v24  ;;  %v3199_v35 = vmul.f32 -1.442695, %v5228_v30 }
 0x58f   : > { %v2588_v4 = vmul.f32 %v5119_v52, %v5136_v47  ;;  %v5254_v8 = vadd.f32 %v5142_v27, %v2584_v28  ;;  %3395 = vpow2.f32 %v3196_v55  ;;  %v3200_v54 = vmul.f32 -1.442695, %v5233_v18 }
 0x590   : > { %v2589_v16 = vmul.f32 %v5119_v52, %v5145_v9  ;;  %v5260_v51 = vadd.f32 %v5142_v27, %v2585_v58  ;;  %3397 = vpow2.f32 %v3197_v10  ;;  %v3201_v63 = vmul.f32 -1.442695, %v5238_v43 }
 0x591   : > { %v2590_v11 = vmul.f32 %v5119_v52, %v5148_v31  ;;  %v5266_v47 = vadd.f32 %v5142_v27, %v2586_v34  ;;  %3399 = vpow2.f32 %v3198_v46  ;;  %v3202_v15 = vmul.f32 -1.442695, %v5243_v41 }
 0x592   : > { %v5269_v56 = vpop.eup %3381  ;;  %v2591_v9 = vmul.f32 %v5119_v52, %v5151_v1  ;;  %v5274_v26 = vadd.f32 %v5142_v27, %v2587_v37  ;;  %3401 = vpow2.f32 %v3199_v35  ;;  %v3203_v36 = vmul.f32 -1.442695, %v5248_v49 }
 0x593   : > { %v5277_v38 = vpop.eup %3383  ;;  %v2592_v31 = vmul.f32 %v5119_v52, %v5155_v29  ;;  %v5282_v40 = vadd.f32 %v5142_v27, %v2588_v4  ;;  %3403 = vpow2.f32 %v3200_v54  ;;  %v3204_v19 = vmul.f32 -1.442695, %v5254_v8 }
 0x594   : > { %v5285_v33 = vpop.eup %3385  ;;  %v2593_v1 = vmul.f32 %v5119_v52, %v5158_v14  ;;  %v5290_v3 = vadd.f32 %v5142_v27, %v2589_v16  ;;  %3405 = vpow2.f32 %v3201_v63  ;;  %v3205_v42 = vmul.f32 -1.442695, %v5260_v51 }
 0x595   : > { %v5293_v60 = vpop.eup %3387  ;;  %v2594_v29 = vmul.f32 %v5119_v52, %v5161_v44  ;;  %v5298_v61 = vadd.f32 %v5142_v27, %v2590_v11  ;;  %3407 = vpow2.f32 %v3202_v15  ;;  %v3206_v48 = vmul.f32 -1.442695, %v5266_v47 }
 0x596   : > { %v5301_v39 = vpop.eup %3389  ;;  %v2595_v14 = vmul.f32 %v5119_v52, %v5175_v62  ;;  %v5306_v45 = vadd.f32 %v5142_v27, %v2591_v9  ;;  %3409 = vpow2.f32 %v3203_v36  ;;  %v3207_v17 = vmul.f32 -1.442695, %v5274_v26 }
 0x597   : > { %v5309_v12 = vpop.eup %3391  ;;  %v2596_v44 = vmul.f32 %v5119_v52, %v5178_v22  ;;  %v5314_v25 = vadd.f32 %v5142_v27, %v2592_v31  ;;  %3411 = vpow2.f32 %v3204_v19  ;;  %v3208_v24 = vmul.f32 -1.442695, %v5282_v40 }
 0x598   : > { %v5317_v28 = vpop.eup %3393  ;;  %v2597_v62 = vmul.f32 %v5119_v52, %v5185_v32  ;;  %v5322_v55 = vadd.f32 %v5142_v27, %v2593_v1  ;;  %3413 = vpow2.f32 %v3205_v42  ;;  %v3209_v58 = vmul.f32 -1.442695, %v5290_v3 }
 0x599   : > { %v5325_v10 = vpop.eup %3395  ;;  %v2598_v22 = vmul.f32 %v5119_v52, %v5188_v2  ;;  %v5330_v34 = vadd.f32 %v5142_v27, %v2594_v29  ;;  %3415 = vpow2.f32 %v3206_v48  ;;  %v3210_v46 = vmul.f32 -1.442695, %v5298_v61 }
 0x59a   : > { %v3398_v37 = vpop.eup %3397  ;;  %v2599_v32 = vmul.f32 %v5119_v52, %v5195_v59  ;;  %v5336_v35 = vadd.f32 %v5142_v27, %v2595_v14  ;;  %3417 = vpow2.f32 %v3207_v17  ;;  %v3211_v4 = vmul.f32 -1.442695, %v5306_v45 }
 0x59b   : > { %v3400_v54 = vpop.eup %3399  ;;  %v2600_v2 = vmul.f32 %v5119_v52, %v5209_v7  ;;  %v5342_v16 = vadd.f32 %v5142_v27, %v2596_v44  ;;  %3419 = vpow2.f32 %v3208_v24  ;;  %v3212_v63 = vmul.f32 -1.442695, %v5314_v25 }
 0x59c   : > { %v3402_v11 = vpop.eup %3401  ;;  %v5346_v15 = vadd.f32 %v5142_v27, %v2597_v62  ;;  %3421 = vpow2.f32 %v3209_v58  ;;  %v3213_v59 = vmul.f32 -1.442695, %v5322_v55  ;;  %v5350_v36 = vadd.f32 %v5142_v27, %v2598_v22 }
 0x59d   : > { %v3404_v9 = vpop.eup %3403  ;;  %3423 = vpow2.f32 %v3210_v46  ;;  %v3214_v52 = vmul.f32 -1.442695, %v5330_v34  ;;  %v5354_v31 = vadd.f32 %v5142_v27, %v2599_v32  ;;  %v3215_v19 = vmul.f32 -1.442695, %v5336_v35 }
 0x59e   : > { %v3406_v7 = vpop.eup %3405  ;;  %3425 = vpow2.f32 %v3211_v4  ;;  %v5358_v42 = vadd.f32 %v5142_v27, %v2600_v2  ;;  %v3216_v29 = vmul.f32 -1.442695, %v5342_v16  ;;  %v3217_v14 = vmul.f32 -1.442695, %v5346_v15 }
 0x59f   : > { %v3408_v1 = vpop.eup %3407  ;;  %3427 = vpow2.f32 %v3212_v63  ;;  %v3218_v44 = vmul.f32 -1.442695, %v5350_v36  ;;  %v3219_v62 = vmul.f32 -1.442695, %v5354_v31  ;;  %v2736_v46 = vadd.f32 1.0, %v5269_v56 }
 0x5a0   : > { %5522 = vst [vmem:[#allocation2_spill] sm:$0xff] %v5358_v42  ;;  %v3410_v48 = vpop.eup %3409  ;;  %3429 = vpow2.f32 %v3213_v59  ;;  %v3220_v27 = vmul.f32 -1.442695, %v5358_v42  ;;  %v2737_v4 = vadd.f32 1.0, %v5277_v38  ;;  %v2738_v63 = vadd.f32 1.0, %v5285_v33 }
 0x5a1   : > { %v3412_v17 = vpop.eup %3411  ;;  %3431 = vpow2.f32 %v3214_v52  ;;  %v2739_v52 = vadd.f32 1.0, %v5293_v60  ;;  %v2742_v33 = vadd.f32 1.0, %v5317_v28  ;;  %v2743_v60 = vadd.f32 1.0, %v5325_v10 }
 0x5a2   : > { %v3414_v24 = vpop.eup %3413  ;;  %3433 = vpow2.f32 %v3215_v19  ;;  %v2747_v28 = vadd.f32 1.0, %v3404_v9  ;;  %v2748_v10 = vadd.f32 1.0, %v3406_v7  ;;  %v2751_v9 = vadd.f32 1.0, %v3412_v17 }
 0x5a3   : > { %v3416_v58 = vpop.eup %3415  ;;  %3435 = vpow2.f32 %v3216_v29  ;;  %v2740_v29 = vadd.f32 1.0, %v5301_v39  ;;  %v2744_v39 = vadd.f32 1.0, %v3398_v37  ;;  %v2749_v37 = vadd.f32 1.0, %v3408_v1 }
 0x5a4   : > { %v3418_v22 = vpop.eup %3417  ;;  %3437 = vpow2.f32 %v3217_v14  ;;  %v2741_v14 = vadd.f32 1.0, %v5309_v12 }
 0x5a5   : > { %v3420_v32 = vpop.eup %3419  ;;  %3439 = vpow2.f32 %v3218_v44  ;;  %v2754_v17 = vadd.f32 1.0, %v3418_v22 }
 0x5a6   : > { %v5367_v2 = vpop.eup %3421  ;;  %3441 = vpow2.f32 %v3219_v62 }
 0x5a7   : > { %v5370_v59 = vpop.eup %3423  ;;  %3443 = vpow2.f32 %v3220_v27 }
 0x5a8   : > { %v5373_v19 = vpop.eup %3425  ;;  %3445 = vrcp.f32 %v2736_v46  ;;  %v2745_v46 = vadd.f32 1.0, %v3400_v54  ;;  %v2750_v54 = vadd.f32 1.0, %v3410_v48 }
 0x5a9   : > { %v5376_v56 = vpop.eup %3427  ;;  %3447 = vrcp.f32 %v2737_v4  ;;  %v2746_v4 = vadd.f32 1.0, %v3402_v11 }
 0x5aa   : > { %v5379_v38 = vpop.eup %3429  ;;  %3449 = vrcp.f32 %v2738_v63 }
 0x5ab   : > { %v5382_v44 = vpop.eup %3431  ;;  %3451 = vrcp.f32 %v2739_v52 }
 0x5ac   : > { %v5385_v62 = vpop.eup %3433  ;;  %3453 = vrcp.f32 %v2740_v29 }
 0x5ad   : > { %v5387_v27 = vpop.eup %3435  ;;  %3455 = vrcp.f32 %v2741_v14 }
 0x5ae   : > { %v5389_v12 = vpop.eup %3437  ;;  %3457 = vrcp.f32 %v2742_v33  ;;  %v2752_v33 = vadd.f32 1.0, %v3414_v24  ;;  %v2755_v24 = vadd.f32 1.0, %v3420_v32 }
 0x5af   : > { %v5391_v42 = vpop.eup %3439  ;;  %3459 = vrcp.f32 %v2743_v60 }
 0x5b0   : > { %v5394_v63 = vpop.eup %3441  ;;  %3461 = vrcp.f32 %v2744_v39  ;;  %v2753_v39 = vadd.f32 1.0, %v3416_v58  ;;  %v2756_v58 = vadd.f32 1.0, %v5367_v2 }
 0x5b1   : > { %v5396_v52 = vpop.eup %3443  ;;  %3463 = vrcp.f32 %v2745_v46 }
 0x5b2   : > { %v3446_v29 = vpop.eup %3445  ;;  %3465 = vrcp.f32 %v2746_v4 }
 0x5b3   : > { %v3448_v11 = vpop.eup %3447  ;;  %3467 = vrcp.f32 %v2747_v28  ;;  %v2832_v7 = vmul.f32 %v3446_v29, %v5166_v57  ;;  %v2757_v28 = vadd.f32 1.0, %v5370_v59  ;;  %v2760_v29 = vadd.f32 1.0, %v5379_v38 }
 0x5b4   : > { %v3450_v14 = vpop.eup %3449  ;;  %3469 = vrcp.f32 %v2748_v10  ;;  %v2833_v1 = vmul.f32 %v3448_v11, %v5169_v0  ;;  %v2758_v10 = vadd.f32 1.0, %v5373_v19  ;;  %v2762_v11 = vadd.f32 1.0, %v5385_v62 }
 0x5b5   : > { %v3452_v60 = vpop.eup %3451  ;;  %3471 = vrcp.f32 %v2749_v37  ;;  %v2834_v46 = vmul.f32 %v3450_v14, %v5172_v6  ;;  %2864 = vst.msk [vmem:[%s5401_s12] sm:$0xff] %vm1665_vm4, %v2832_v7  ;;  %v2759_v37 = vadd.f32 1.0, %v5376_v56  ;;  %v2764_v7 = vadd.f32 1.0, %v5389_v12 }
 0x5b6   : > { %v3454_v48 = vpop.eup %3453  ;;  %3473 = vrcp.f32 %v2750_v54  ;;  %v2835_v4 = vmul.f32 %v3452_v60, %v5182_v50  ;;  %2865 = vst.msk [vmem:[%s5401_s12 + $0x8] sm:$0xff] %vm1665_vm4, %v2833_v1  ;;  %v2761_v54 = vadd.f32 1.0, %v5382_v44  ;;  %v2765_v14 = vadd.f32 1.0, %v5391_v42 }
 0x5b7   : > { %v3456_v57 = vpop.eup %3455  ;;  %3475 = vrcp.f32 %v2751_v9  ;;  %v2836_v0 = vmul.f32 %v3454_v48, %v5192_v53  ;;  %2866 = vst.msk [vmem:[%s5401_s12 + $0x10] sm:$0xff] %vm1665_vm4, %v2834_v46  ;;  %v2763_v9 = vadd.f32 1.0, %v5387_v27  ;;  %v2767_v1 = vadd.f32 1.0, %v5396_v52 }
 0x5b8   : > { %v3458_v6 = vpop.eup %3457  ;;  %3477 = vrcp.f32 %v2752_v33  ;;  %v2837_v22 = vmul.f32 %v3456_v57, %v5200_v5  ;;  %2867 = vst.msk [vmem:[%s5401_s12 + $0x18] sm:$0xff] %vm1665_vm4, %v2835_v4  ;;  %v2766_v33 = vadd.f32 1.0, %v5394_v63 }
 0x5b9   : > { %v3460_v50 = vpop.eup %3459  ;;  %3479 = vrcp.f32 %v2753_v39  ;;  %v2838_v32 = vmul.f32 %v3458_v6, %v5203_v13  ;;  %2868 = vst.msk [vmem:[%s5401_s12 + $0x20] sm:$0xff] %vm1665_vm4, %v2836_v0 }
 0x5ba   : > { %v3462_v53 = vpop.eup %3461  ;;  %3481 = vrcp.f32 %v2754_v17  ;;  %v2839_v2 = vmul.f32 %v3460_v50, %v5213_v21  ;;  %2869 = vst.msk [vmem:[%s5401_s12 + $0x28] sm:$0xff] %vm1665_vm4, %v2837_v22 }
 0x5bb   : > { %v3464_v5 = vpop.eup %3463  ;;  %3483 = vrcp.f32 %v2755_v24  ;;  %v2840_v59 = vmul.f32 %v3462_v53, %v5218_v23  ;;  %2870 = vst.msk [vmem:[%s5401_s12 + $0x30] sm:$0xff] %vm1665_vm4, %v2838_v32 }
 0x5bc   : > { %v3466_v13 = vpop.eup %3465  ;;  %3485 = vrcp.f32 %v2756_v58  ;;  %v2841_v19 = vmul.f32 %v3464_v5, %v5223_v20  ;;  %2871 = vst.msk [vmem:[%s5401_s12 + $0x38] sm:$0xff] %vm1665_vm4, %v2839_v2 }
 0x5bd   : > { %v3468_v21 = vpop.eup %3467  ;;  %3487 = vrcp.f32 %v2757_v28  ;;  %v2842_v56 = vmul.f32 %v3466_v13, %v5228_v30  ;;  %2872 = vst.msk [vmem:[%s5401_s12 + $0x40] sm:$0xff] %vm1665_vm4, %v2840_v59  ;;  %v5523_v28 = vld [vmem:[#allocation2_spill] sm:$0xff] }
 0x5be   : > { %v3470_v23 = vpop.eup %3469  ;;  %3489 = vrcp.f32 %v2758_v10  ;;  %v2843_v38 = vmul.f32 %v3468_v21, %v5233_v18  ;;  %2873 = vst.msk [vmem:[%s5401_s12 + $0x48] sm:$0xff] %vm1665_vm4, %v2841_v19 }
 0x5bf   : > { %v3472_v20 = vpop.eup %3471  ;;  %3491 = vrcp.f32 %v2759_v37  ;;  %v2844_v44 = vmul.f32 %v3470_v23, %v5238_v43  ;;  %2874 = vst.msk [vmem:[%s5401_s12 + $0x50] sm:$0xff] %vm1665_vm4, %v2842_v56 }
 0x5c0   : > { %v3474_v30 = vpop.eup %3473  ;;  %3493 = vrcp.f32 %v2760_v29  ;;  %v2845_v62 = vmul.f32 %v3472_v20, %v5243_v41  ;;  %2875 = vst.msk [vmem:[%s5401_s12 + $0x58] sm:$0xff] %vm1665_vm4, %v2843_v38 }
 0x5c1   : > { %v3476_v18 = vpop.eup %3475  ;;  %3495 = vrcp.f32 %v2761_v54  ;;  %v2846_v27 = vmul.f32 %v3474_v30, %v5248_v49  ;;  %2876 = vst.msk [vmem:[%s5401_s12 + $0x60] sm:$0xff] %vm1665_vm4, %v2844_v44 }
 0x5c2   : > { %v3478_v43 = vpop.eup %3477  ;;  %3497 = vrcp.f32 %v2762_v11  ;;  %v2847_v12 = vmul.f32 %v3476_v18, %v5254_v8  ;;  %2877 = vst.msk [vmem:[%s5401_s12 + $0x68] sm:$0xff] %vm1665_vm4, %v2845_v62 }
 0x5c3   : > { %v3480_v41 = vpop.eup %3479  ;;  %3499 = vrcp.f32 %v2763_v9  ;;  %v2848_v42 = vmul.f32 %v3478_v43, %v5260_v51  ;;  %2878 = vst.msk [vmem:[%s5401_s12 + $0x70] sm:$0xff] %vm1665_vm4, %v2846_v27 }
 0x5c4   : > { %v3482_v49 = vpop.eup %3481  ;;  %3501 = vrcp.f32 %v2764_v7  ;;  %v2849_v63 = vmul.f32 %v3480_v41, %v5266_v47  ;;  %2879 = vst.msk [vmem:[%s5401_s12 + $0x78] sm:$0xff] %vm1665_vm4, %v2847_v12 }
 0x5c5   : > { %v3484_v8 = vpop.eup %3483  ;;  %3503 = vrcp.f32 %v2765_v14  ;;  %v2850_v60 = vmul.f32 %v3482_v49, %v5274_v26  ;;  %2880 = vst.msk [vmem:[%s5401_s12 + $0x80] sm:$0xff] %vm1665_vm4, %v2848_v42 }
 0x5c6   : > { %v3486_v52 = vpop.eup %3485  ;;  %3505 = vrcp.f32 %v2766_v33  ;;  %v2851_v51 = vmul.f32 %v3484_v8, %v5282_v40  ;;  %2881 = vst.msk [vmem:[%s5401_s12 + $0x88] sm:$0xff] %vm1665_vm4, %v2849_v63 }
 0x5c7   : > { %v3488_v39 = vpop.eup %3487  ;;  %3507 = vrcp.f32 %v2767_v1  ;;  %v2852_v47 = vmul.f32 %v3486_v52, %v5290_v3  ;;  %2882 = vst.msk [vmem:[%s5401_s12 + $0x90] sm:$0xff] %vm1665_vm4, %v2850_v60 }
 0x5c8   : > { %v3490_v46 = vpop.eup %3489  ;;  %v2853_v26 = vmul.f32 %v3488_v39, %v5298_v61  ;;  %2883 = vst.msk [vmem:[%s5401_s12 + $0x98] sm:$0xff] %vm1665_vm4, %v2851_v51 }
 0x5c9   : > { %v3492_v48 = vpop.eup %3491  ;;  %v2854_v17 = vmul.f32 %v3490_v46, %v5306_v45  ;;  %2884 = vst.msk [vmem:[%s5401_s12 + $0xa0] sm:$0xff] %vm1665_vm4, %v2852_v47 }
 0x5ca   : > { %v3494_v40 = vpop.eup %3493  ;;  %v2855_v4 = vmul.f32 %v3492_v48, %v5314_v25  ;;  %2885 = vst.msk [vmem:[%s5401_s12 + $0xa8] sm:$0xff] %vm1665_vm4, %v2853_v26 }
 0x5cb   : > { %v3496_v3 = vpop.eup %3495  ;;  %v2856_v57 = vmul.f32 %v3494_v40, %v5322_v55  ;;  %2886 = vst.msk [vmem:[%s5401_s12 + $0xb0] sm:$0xff] %vm1665_vm4, %v2854_v17 }
 0x5cc   : > { %v3498_v61 = vpop.eup %3497  ;;  %v2857_v24 = vmul.f32 %v3496_v3, %v5330_v34  ;;  %2887 = vst.msk [vmem:[%s5401_s12 + $0xb8] sm:$0xff] %vm1665_vm4, %v2855_v4 }
 0x5cd   : > { %v3500_v45 = vpop.eup %3499  ;;  %v2858_v0 = vmul.f32 %v3498_v61, %v5336_v35  ;;  %2888 = vst.msk [vmem:[%s5401_s12 + $0xc0] sm:$0xff] %vm1665_vm4, %v2856_v57 }
 0x5ce   : > { %v3502_v25 = vpop.eup %3501  ;;  %v2859_v55 = vmul.f32 %v3500_v45, %v5342_v16  ;;  %2889 = vst.msk [vmem:[%s5401_s12 + $0xc8] sm:$0xff] %vm1665_vm4, %v2857_v24 }
 0x5cf   : > { %v3504_v6 = vpop.eup %3503  ;;  %v2860_v58 = vmul.f32 %v3502_v25, %v5346_v15  ;;  %2890 = vst.msk [vmem:[%s5401_s12 + $0xd0] sm:$0xff] %vm1665_vm4, %v2858_v0 }
 0x5d0   : > { %v3506_v34 = vpop.eup %3505  ;;  %v2861_v22 = vmul.f32 %v3504_v6, %v5350_v36  ;;  %2891 = vst.msk [vmem:[%s5401_s12 + $0xd8] sm:$0xff] %vm1665_vm4, %v2859_v55 }
 0x5d1   : > { %v3508_v35 = vpop.eup %3507  ;;  %v2862_v50 = vmul.f32 %v3506_v34, %v5354_v31  ;;  %2892 = vst.msk [vmem:[%s5401_s12 + $0xe0] sm:$0xff] %vm1665_vm4, %v2860_v58 }
 0x5d2   : > { %v2863_v32 = vmul.f32 %v3508_v35, %v5523_v28  ;;  %2893 = vst.msk [vmem:[%s5401_s12 + $0xe8] sm:$0xff] %vm1665_vm4, %v2861_v22 }
 0x5d3   : > { %2894 = vst.msk [vmem:[%s5401_s12 + $0xf0] sm:$0xff] %vm1665_vm4, %v2862_v50 }
 0x5d4   : > { %2895 = vst.msk [vmem:[%s5401_s12 + $0xf8] sm:$0xff] %vm1665_vm4, %v2863_v32 }
 0x5d5 PF: > { %s16_s21 = sadd.s32 1, %s3515_s21  }
 0x5d6   : > { %p13_p4 = scmp.ge.s32.totalorder %s16_s21, 4  }
 0x5d8   :  { %15 = sbr.rel (!%p13_p4) target bundleno = 1 (0x1), region = 76 }

// kernel: res_conv_block.3
= control target key start
LH: loop header
LB: loop body
LE: loop exit
PB: predicated region body
PF: predicated region fallthrough
CT: control target
= control target key end

     0   :  { %s4566_s30 = smov 0   ;;  %s6381_s0 = inlined_call_operand.vmem [shape: f32[2,18,18,16], index: 0, kind: input, shape index: {}]   ;;  %s6382_s1 = inlined_call_operand.vmem [shape: f32[144,16], index: 1, kind: input, shape index: {}]   ;;  %s6383_s2 = inlined_call_operand.vmem [shape: f32[1,16], index: 2, kind: input, shape index: {}]   ;;  %s6384_s3 = inlined_call_operand.vmem [shape: f32[1,16], index: 3, kind: input, shape index: {}]   ;;  %s6385_s4 = inlined_call_operand.vmem [shape: f32[1,16], index: 4, kind: input, shape index: {}]   ;;  %s6386_s5 = inlined_call_operand.vmem [shape: f32[16,16], index: 5, kind: input, shape index: {}]   ;;  %s6387_s6 = inlined_call_operand.vmem [shape: f32[2,256,4], index: 6, kind: input, shape index: {}]   ;;  %s6388_s7 = inlined_call_operand.vmem [shape: f32[4,16], index: 7, kind: input, shape index: {}]   ;;  %s6389_s8 = inlined_call_operand.vmem [shape: f32[1,16], index: 8, kind: input, shape index: {}]   ;;  %s6390_s9 = inlined_call_operand.vmem [shape: f32[2,256,16], index: 9, kind: output, shape index: {}]  }
   0x1 LB: > { %s3341_s10 = sadd.s32 4294967295, %s4504_s30   ;;  %p3345_p0 = scmp.ge.s32.totalorder %s4504_s30, 1  ;;  %s4504_s30 = sphi %s4566_s30, %s19_s30  }
   0x2   : > { %p297_p1 = scmp.lt.s32.totalorder %s4504_s30, 3 }
   0x4   : > { %p298_p2 = pnand %p3345_p0, %p297_p1 }
   0x6   : > { %301 = sbr.rel (%p298_p2) target bundleno = 1220 (0x4c4), region = 56 }
   0xd   : > { %p338_p3 = scmp.lt.s32.totalorder %s3341_s10, 1  ;;  %v1770_v0 = vld [vmem:[%s6382_s1] sm:$0xff]  ;;  %v1771_v1 = vld [vmem:[%s6382_s1 + $0x8] sm:$0xff]  ;;  %v1772_v2 = vld [vmem:[%s6382_s1 + $0x10] sm:$0xff]  ;;  %v4506_v3 = vmov 0.0|0.0   ;;  %s4507_s12 = smov 48  }
   0xe   : > { %3753 = vmatprep.subr.bf16.mxu0 %v4506_v3  ;;  %v3754_v4 = vpack.c.bf16 %v1771_v1, %v1770_v0  ;;  %v1773_v5 = vld [vmem:[%s6382_s1 + $0x18] sm:$0xff]  ;;  %3786 = vmatprep.subr.bf16.mxu1 %v4506_v3  ;;  %v1774_v7 = vld [vmem:[%s6382_s1 + $0x20] sm:$0xff]  ;;  %v1775_v8 = vld [vmem:[%s6382_s1 + $0x28] sm:$0xff]  ;;  %s4508_s15 = smov 16   ;;  %vm1539_vm0 = vcmask 130048   ;;  %s4509_s18 = smov 64  }
   0xf   : > { %s6429_s10 = smov (!%p338_p3, %s3341_s10), 1  ;;  %v3757_v6 = vpack.c.bf16 %v1773_v5, %v1772_v2  ;;  %v1776_v9 = vld [vmem:[%s6382_s1 + $0x30] sm:$0xff]  ;;  %v1777_v10 = vld [vmem:[%s6382_s1 + $0x38] sm:$0xff]  ;;  %v3760_v14 = vpack.c.bf16 %v1775_v8, %v1774_v7  ;;  %v1778_v23 = vld [vmem:[%s6382_s1 + $0x40] sm:$0xff]  ;;  %s4511_s24 = smov 96   ;;  %vm1572_vm1 = vcmask 261120  }
  0x10   : > { %3755 = vmatpush1.bf16.msra.mxu0 %v3754_v4  ;;  %3795 = vmatpush1.bf16.msra.mxu1 %v3754_v4  ;;  %s3804_s19 = smul.u32 432, %s6429_s10  ;;  %v3763_v28 = vpack.c.bf16 %v1777_v10, %v1776_v9  ;;  %v1779_v31 = vld [vmem:[%s6382_s1 + $0x48] sm:$0xff]  ;;  %v1780_v35 = vld [vmem:[%s6382_s1 + $0x50] sm:$0xff]  ;;  %v1781_v38 = vld [vmem:[%s6382_s1 + $0x58] sm:$0xff]  ;;  %s4512_s25 = smov 80   ;;  %vm1605_vm2 = vcmask 392192  }
  0x11   : > { %3756 = vmatprep.subr.bf16.mxu0 %v4506_v3  ;;  %3787 = vmatprep.subr.bf16.mxu1 %v4506_v3  ;;  %v3766_v34 = vpack.c.bf16 %v1779_v31, %v1778_v23  ;;  %v3769_v40 = vpack.c.bf16 %v1781_v38, %v1780_v35  ;;  %v1782_v41 = vld [vmem:[%s6382_s1 + $0x60] sm:$0xff]  ;;  %v1783_v42 = vld [vmem:[%s6382_s1 + $0x68] sm:$0xff]  ;;  %s4513_s13 = smov 112   ;;  %v1784_v45 = vld [vmem:[%s6382_s1 + $0x70] sm:$0xff]  ;;  %vm1638_vm3 = vcmask 523264   ;;  %vm1671_vm4 = vcmask 654336  }
  0x12   : > { %s4602_s26 = scalar_lea.vmem %s6381_s0, %s3804_s19  ;;  %s4510_s19 = smov 32   ;;  %v3772_v44 = vpack.c.bf16 %v1783_v42, %v1782_v41  ;;  %v1785_v46 = vld [vmem:[%s6382_s1 + $0x78] sm:$0xff]  ;;  %v1786_v53 = vld [vmem:[%s6382_s1 + $0x80] sm:$0xff]  ;;  %v1787_v54 = vld [vmem:[%s6382_s1 + $0x88] sm:$0xff]  ;;  %vm1704_vm5 = vcmask 785408   ;;  %vm1737_vm6 = vcmask 916480  }
  0x13   : > { %v4611_v11 = vld [vmem:[%s4602_s26 + $0x18] sm:$0xff]  ;;  %v4614_v12 = vld [vmem:[%s4602_s26 + $0x20] sm:$0xff]  ;;  %v386_v16 = vld [vmem:[%s4602_s26 + $0x9] sm:$0xff]  ;;  %v3775_v51 = vpack.c.bf16 %v1785_v46, %v1784_v45  ;;  %v3778_v57 = vpack.c.bf16 %v1787_v54, %v1786_v53  ;;  %vm4514_vm7 = vmmov 0   ;;  %vm2942_vm8 = vcmask 1043456   ;;  %s3648_s29 = sshll.u32 %s6429_s10, 8 }
  0x14   : > { %v385_v13 = vld [vmem:[%s4602_s26 + $0x1] sm:$0xff]  ;;  %3758 = vmatpush1.bf16.msra.mxu0 %v3757_v6  ;;  %3796 = vmatpush1.bf16.msra.mxu1 %v3757_v6  ;;  %v3833_v15 = vpack.i.bf16 %v4614_v12, %v4611_v11  ;;  %v3383_v17 = vld [vmem:[%s4602_s26 + $0x19] sm:$0xff]  ;;  %v418_v21 = vld [vmem:[%s4602_s26 + $0xa] sm:$0xff]  ;;  %s5811_s14 = scalar_lea.vmem %s6387_s6, %s3648_s29  ;;  %vm2845_vm9 = vcmask 31744  }
  0x15   : > { %v3384_v18 = vld [vmem:[%s4602_s26 + $0x21] sm:$0xff]  ;;  %3759 = vmatprep.subr.bf16.mxu0 %v4506_v3  ;;  %3788 = vmatprep.subr.bf16.mxu1 %v4506_v3  ;;  %v3823_v19 = vpack.i.bf16 %v386_v16, %v385_v13  ;;  %v4632_v25 = vld [vmem:[%s4602_s26 + $0x30] sm:$0xff]  ;;  %v4635_v26 = vld [vmem:[%s4602_s26 + $0x38] sm:$0xff] }
  0x16   : > { %v417_v20 = vld [vmem:[%s4602_s26 + $0x2] sm:$0xff]  ;;  %3834 = vrot.lane.b32.xlu1 %v3833_v15, %s4507_s12  ;;  %v3838_v22 = vpack.i.bf16 %v3384_v18, %v3383_v17  ;;  %v3417_v27 = vld [vmem:[%s4602_s26 + $0x32] sm:$0xff]  ;;  %v3415_v29 = vld [vmem:[%s4602_s26 + $0x1a] sm:$0xff]  ;;  %v3848_v32 = vpack.i.bf16 %v4635_v26, %v4632_v25 }
  0x17   : > { %3824 = vrot.lane.b32.xlu0 %v3823_v19, %s4508_s15  ;;  %v3828_v24 = vpack.i.bf16 %v418_v21, %v417_v20  ;;  %v3416_v30 = vld [vmem:[%s4602_s26 + $0x22] sm:$0xff]  ;;  %3544 = vmatprep.mubr.msk.f32.mxu0 %vm1539_vm0, %v3417_v27  ;;  %v3479_v36 = vld [vmem:[%s4602_s26 + $0x31] sm:$0xff]  ;;  %v3480_v37 = vld [vmem:[%s4602_s26 + $0x39] sm:$0xff] }
  0x18   : > { %3761 = vmatpush1.bf16.msra.mxu0 %v3760_v14  ;;  %3797 = vmatpush1.bf16.msra.mxu1 %v3760_v14  ;;  %v3843_v33 = vpack.i.bf16 %v3416_v30, %v3415_v29  ;;  %v3853_v39 = vpack.i.bf16 %v3480_v37, %v3479_v36  ;;  %v4673_v43 = vld [vmem:[%s4602_s26 + $0x3a] sm:$0xff]  ;;  %v3481_v48 = vld [vmem:[%s4602_s26 + $0x49] sm:$0xff]  ;;  %v3482_v49 = vld [vmem:[%s4602_s26 + $0x51] sm:$0xff] }
  0x19   : > { %3762 = vmatprep.subr.bf16.mxu0 %v4506_v3  ;;  %3789 = vmatprep.subr.bf16.mxu1 %v4506_v3  ;;  %v3878_v47 = vpack.i.bf16 %v4673_v43, %v3417_v27  ;;  %v4689_v50 = vld [vmem:[%s4602_s26 + $0x48] sm:$0xff]  ;;  %v4692_v52 = vld [vmem:[%s4602_s26 + $0x50] sm:$0xff]  ;;  %v3888_v55 = vpack.i.bf16 %v3482_v49, %v3481_v48  ;;  %v4714_v58 = vld [vmem:[%s4602_s26 + $0x60] sm:$0xff] }
  0x1a   : > { %3839 = vrot.lane.b32.xlu1 %v3838_v22, %s4509_s18  ;;  %v3883_v56 = vpack.i.bf16 %v4692_v52, %v4689_v50  ;;  %v4717_v59 = vld [vmem:[%s4602_s26 + $0x68] sm:$0xff]  ;;  %v4723_v61 = vld [vmem:[%s4602_s26 + $0x52] sm:$0xff]  ;;  %v3454_v10 = vld [vmem:[%s4602_s26 + $0x80] sm:$0xff] }
  0x1b   : > { %3829 = vrot.lane.b32.xlu0 %v3828_v24, %s4510_s19  ;;  %v4720_v60 = vld [vmem:[%s4602_s26 + $0x4a] sm:$0xff]  ;;  %v3918_v62 = vpack.i.bf16 %v4717_v59, %v4714_v58  ;;  %v3483_v0 = vld [vmem:[%s4602_s26 + $0x61] sm:$0xff]  ;;  %v3485_v7 = vld [vmem:[%s4602_s26 + $0x79] sm:$0xff] }
  0x1c   : > { %3764 = vmatpush1.bf16.msra.mxu0 %v3763_v28  ;;  %3798 = vmatpush1.bf16.msra.mxu1 %v3763_v28  ;;  %v3913_v63 = vpack.i.bf16 %v4723_v61, %v4720_v60  ;;  %v3484_v1 = vld [vmem:[%s4602_s26 + $0x69] sm:$0xff]  ;;  %v3486_v8 = vld [vmem:[%s4602_s26 + $0x81] sm:$0xff]  ;;  %v3453_v9 = vld [vmem:[%s4602_s26 + $0x78] sm:$0xff] }
  0x1d   : > { %3765 = vmatprep.subr.bf16.mxu0 %v4506_v3  ;;  %3790 = vmatprep.subr.bf16.mxu1 %v4506_v3  ;;  %v3923_v2 = vpack.i.bf16 %v3484_v1, %v3483_v0  ;;  %v4738_v4 = vld [vmem:[%s4602_s26 + $0x62] sm:$0xff]  ;;  %v4741_v5 = vld [vmem:[%s4602_s26 + $0x6a] sm:$0xff]  ;;  %v3958_v13 = vpack.i.bf16 %v3486_v8, %v3485_v7  ;;  %v3953_v14 = vpack.i.bf16 %v3454_v10, %v3453_v9  ;;  %v3456_v16 = vld [vmem:[%s4602_s26 + $0x98] sm:$0xff] }
  0x1e   : > { %3849 = vrot.lane.b32.xlu1 %v3848_v32, %s4511_s24  ;;  %v3948_v6 = vpack.i.bf16 %v4741_v5, %v4738_v4  ;;  %v3455_v15 = vld [vmem:[%s4602_s26 + $0x90] sm:$0xff]  ;;  %v4760_v17 = vld [vmem:[%s4602_s26 + $0x7a] sm:$0xff]  ;;  %v4763_v18 = vld [vmem:[%s4602_s26 + $0x82] sm:$0xff] }
  0x1f   : > { %3844 = vrot.lane.b32.xlu0 %v3843_v33, %s4512_s25  ;;  %v3988_v19 = vpack.i.bf16 %v3456_v16, %v3455_v15  ;;  %v3983_v20 = vpack.i.bf16 %v4763_v18, %v4760_v17  ;;  %v3487_v21 = vld [vmem:[%s4602_s26 + $0x91] sm:$0xff]  ;;  %v4772_v23 = vld [vmem:[%s4602_s26 + $0x15a] sm:$0xff]  ;;  %v3489_v30 = vld [vmem:[%s4602_s26 + $0xa9] sm:$0xff] }
  0x20   : > { %3767 = vmatpush1.bf16.msra.mxu0 %v3766_v34  ;;  %3799 = vmatpush1.bf16.msra.mxu1 %v3766_v34  ;;  %v4781_v27 = vld [vmem:[%s4602_s26 + $0x92] sm:$0xff]  ;;  %v4784_v28 = vld [vmem:[%s4602_s26 + $0x9a] sm:$0xff]  ;;  %v3460_v37 = vld [vmem:[%s4602_s26 + $0xc8] sm:$0xff] }
  0x21   : > { %3768 = vmatprep.subr.bf16.mxu0 %v4506_v3  ;;  %3791 = vmatprep.subr.bf16.mxu1 %v4506_v3  ;;  %v4018_v29 = vpack.i.bf16 %v4784_v28, %v4781_v27  ;;  %v3490_v31 = vld [vmem:[%s4602_s26 + $0xb1] sm:$0xff]  ;;  %v3459_v36 = vld [vmem:[%s4602_s26 + $0xc0] sm:$0xff] }
  0x22   : > { %3859 = vrot.lane.b32.xlu1 %v3838_v22, %s4508_s15  ;;  %v3488_v22 = vld [vmem:[%s4602_s26 + $0x99] sm:$0xff]  ;;  %3569 = vmatprep.mubr.msk.f32.mxu1 %vm1539_vm0, %v4772_v23  ;;  %v4028_v34 = vpack.i.bf16 %v3490_v31, %v3489_v30  ;;  %v3427_v38 = vld [vmem:[%s4602_s26 + $0xaa] sm:$0xff]  ;;  %v3491_v42 = vld [vmem:[%s4602_s26 + $0xc1] sm:$0xff] }
  0x23   : > { %3854 = vrot.lane.b32.xlu0 %v3853_v39, %s4513_s13  ;;  %v3993_v24 = vpack.i.bf16 %v3488_v22, %v3487_v21  ;;  %v3429_v46 = vld [vmem:[%s4602_s26 + $0xc2] sm:$0xff]  ;;  %v3493_v49 = vld [vmem:[%s4602_s26 + $0xd9] sm:$0xff]  ;;  %v3495_v15 = vld [vmem:[%s4602_s26 + $0xf1] sm:$0xff] }
  0x24   : > { %3770 = vmatpush1.bf16.msra.mxu0 %v3769_v40  ;;  %3800 = vmatpush1.bf16.msra.mxu1 %v3769_v40  ;;  %v4058_v40 = vpack.i.bf16 %v3460_v37, %v3459_v36  ;;  %v3461_v53 = vld [vmem:[%s4602_s26 + $0xd8] sm:$0xff]  ;;  %v3462_v54 = vld [vmem:[%s4602_s26 + $0xe0] sm:$0xff] }
  0x25   : > { %3771 = vmatprep.subr.bf16.mxu0 %v4506_v3  ;;  %3792 = vmatprep.subr.bf16.mxu1 %v4506_v3  ;;  %v3431_v0 = vld [vmem:[%s4602_s26 + $0xda] sm:$0xff]  ;;  %v3432_v1 = vld [vmem:[%s4602_s26 + $0xe2] sm:$0xff] }
  0x26   : > { %3869 = vrot.lane.b32.xlu1 %v3848_v32, %s4507_s12  ;;  %v3457_v32 = vld [vmem:[%s4602_s26 + $0xa8] sm:$0xff]  ;;  %v353_v9 = vld [vmem:[%s4602_s26] sm:$0xff]  ;;  %v4123_v10 = vpack.i.bf16 %v3432_v1, %v3431_v0  ;;  %v4861_v0 = vld [vmem:[%s4602_s26 + $0x111] sm:$0xff] }
  0x27   : > { %3864 = vrot.lane.b32.xlu0 %v3843_v33, %s4510_s19  ;;  %v3458_v33 = vld [vmem:[%s4602_s26 + $0xb0] sm:$0xff]  ;;  %v3496_v16 = vld [vmem:[%s4602_s26 + $0xf9] sm:$0xff] }
  0x28   : > { %3773 = vmatpush1.bf16.msra.mxu0 %v3772_v44  ;;  %3801 = vmatpush1.bf16.msra.mxu1 %v3772_v44  ;;  %v4023_v35 = vpack.i.bf16 %v3458_v33, %v3457_v32  ;;  %v3492_v44 = vld [vmem:[%s4602_s26 + $0xc9] sm:$0xff]  ;;  %v4840_v31 = vpack.i.bf16 %v3496_v16, %v3495_v15 }
  0x29   : > { %3774 = vmatprep.subr.bf16.mxu0 %v4506_v3  ;;  %3793 = vmatprep.subr.bf16.mxu1 %v4506_v3  ;;  %v4063_v45 = vpack.i.bf16 %v3492_v44, %v3491_v42  ;;  %v3433_v44 = vld [vmem:[%s4602_s26 + $0xf2] sm:$0xff] }
  0x2a   : > { %3879 = vrot.lane.b32.xlu1 %v3878_v47, %s4512_s25 }
  0x2b   : > { %3874 = vrot.lane.b32.xlu0 %v3853_v39, %s4509_s18 }
  0x2c   : > { %3776 = vmatpush1.bf16.msra.mxu0 %v3775_v51  ;;  %3802 = vmatpush1.bf16.msra.mxu1 %v3775_v51  ;;  %v3494_v51 = vld [vmem:[%s4602_s26 + $0xe1] sm:$0xff] }
  0x2d   : > { %3777 = vmatprep.subr.bf16.mxu0 %v4506_v3  ;;  %3794 = vmatprep.subr.bf16.mxu1 %v4506_v3 }
  0x2e   : > { %3889 = vrot.lane.b32.xlu1 %v3888_v55, %s4513_s13 }
  0x2f   : > { %3884 = vrot.lane.b32.xlu0 %v3883_v56, %s4511_s24 }
  0x30   : > { %3779 = vmatpush1.bf16.msra.mxu0 %v3778_v57  ;;  %3803 = vmatpush1.bf16.msra.mxu1 %v3778_v57  ;;  %v3463_v57 = vld [vmem:[%s4602_s26 + $0xf0] sm:$0xff] }
  0x31   : > { %3780 = vmatprep.subr.bf16.mxu1 %v4506_v3 }
  0x32   : > { %3899 = vrot.lane.b32.xlu1 %v3878_v47, %s4510_s19  ;;  %v3430_v47 = vld [vmem:[%s4602_s26 + $0xca] sm:$0xff] }
  0x33   : > { %3894 = vrot.lane.b32.xlu0 %v3853_v39, %s4508_s15  ;;  %v3428_v39 = vld [vmem:[%s4602_s26 + $0xb2] sm:$0xff]  ;;  %v4088_v48 = vpack.i.bf16 %v3430_v47, %v3429_v46 }
  0x34   : > { %v4053_v41 = vpack.i.bf16 %v3428_v39, %v3427_v38 }
  0x36   : > { %3909 = vrot.lane.b32.xlu1 %v3888_v55, %s4509_s18 }
  0x37   : > { %3904 = vrot.lane.b32.xlu0 %v3883_v56, %s4507_s12  ;;  %v4093_v56 = vpack.i.bf16 %v3462_v54, %v3461_v53 }
  0x3a   : > { %3919 = vrot.lane.b32.xlu1 %v3918_v62, %s4511_s24 }
  0x3b   : > { %3914 = vrot.lane.b32.xlu0 %v3913_v63, %s4512_s25 }
  0x3e   : > { %3929 = vrot.lane.b32.xlu1 %v3888_v55, %s4508_s15  ;;  %v4098_v55 = vpack.i.bf16 %v3494_v51, %v3493_v49 }
  0x3f   : > { %3924 = vrot.lane.b32.xlu0 %v3923_v2, %s4513_s13 }
  0x42   : > { %3939 = vrot.lane.b32.xlu1 %v3918_v62, %s4507_s12  ;;  %v3464_v62 = vld [vmem:[%s4602_s26 + $0xf8] sm:$0xff] }
  0x43   : > { %3934 = vrot.lane.b32.xlu0 %v3913_v63, %s4510_s19 }
  0x46   : > { %3949 = vrot.lane.b32.xlu1 %v3948_v6, %s4512_s25 }
  0x47   : > { %3944 = vrot.lane.b32.xlu0 %v3923_v2, %s4509_s18 }
  0x4a   : > { %3959 = vrot.lane.b32.xlu1 %v3958_v13, %s4513_s13 }
  0x4b   : > { %3954 = vrot.lane.b32.xlu0 %v3953_v14, %s4511_s24 }
  0x4e   : > { %3969 = vrot.lane.b32.xlu1 %v3948_v6, %s4510_s19  ;;  %v4128_v6 = vpack.i.bf16 %v3464_v62, %v3463_v57 }
  0x4f   : > { %3964 = vrot.lane.b32.xlu0 %v3923_v2, %s4508_s15 }
  0x52   : > { %3979 = vrot.lane.b32.xlu1 %v3958_v13, %s4509_s18 }
  0x53   : > { %3974 = vrot.lane.b32.xlu0 %v3953_v14, %s4507_s12 }
  0x56   : > { %3989 = vrot.lane.b32.xlu1 %v3988_v19, %s4511_s24 }
  0x57   : > { %3984 = vrot.lane.b32.xlu0 %v3983_v20, %s4512_s25 }
  0x5a   : > { %3999 = vrot.lane.b32.xlu1 %v3958_v13, %s4508_s15  ;;  %v354_v13 = vld [vmem:[%s4602_s26 + $0x8] sm:$0xff] }
  0x5b   : > { %3994 = vrot.lane.b32.xlu0 %v3993_v24, %s4513_s13 }
  0x5e   : > { %4009 = vrot.lane.b32.xlu1 %v3988_v19, %s4507_s12 }
  0x5f   : > { %4004 = vrot.lane.b32.xlu0 %v3983_v20, %s4510_s19 }
  0x62   : > { %4019 = vrot.lane.b32.xlu1 %v4018_v29, %s4512_s25 }
  0x63   : > { %4014 = vrot.lane.b32.xlu0 %v3993_v24, %s4509_s18 }
  0x66   : > { %4029 = vrot.lane.b32.xlu1 %v4028_v34, %s4513_s13 }
  0x67   : > { %4024 = vrot.lane.b32.xlu0 %v4023_v35, %s4511_s24 }
  0x6a   : > { %4039 = vrot.lane.b32.xlu1 %v4018_v29, %s4510_s19 }
  0x6b   : > { %4034 = vrot.lane.b32.xlu0 %v3993_v24, %s4508_s15 }
  0x6e   : > { %4049 = vrot.lane.b32.xlu1 %v4028_v34, %s4509_s18 }
  0x6f   : > { %4044 = vrot.lane.b32.xlu0 %v4023_v35, %s4507_s12 }
  0x72   : > { %4059 = vrot.lane.b32.xlu1 %v4058_v40, %s4511_s24 }
  0x73   : > { %4054 = vrot.lane.b32.xlu0 %v4053_v41, %s4512_s25 }
  0x76   : > { %4069 = vrot.lane.b32.xlu1 %v4028_v34, %s4508_s15 }
  0x77   : > { %4064 = vrot.lane.b32.xlu0 %v4063_v45, %s4513_s13 }
  0x7a   : > { %4079 = vrot.lane.b32.xlu1 %v4058_v40, %s4507_s12 }
  0x7b   : > { %4074 = vrot.lane.b32.xlu0 %v4053_v41, %s4510_s19 }
  0x7e   : > { %4089 = vrot.lane.b32.xlu1 %v4088_v48, %s4512_s25 }
  0x7f   : > { %4084 = vrot.lane.b32.xlu0 %v4063_v45, %s4509_s18 }
  0x82   : > { %4099 = vrot.lane.b32.xlu1 %v4098_v55, %s4513_s13 }
  0x83   : > { %4094 = vrot.lane.b32.xlu0 %v4093_v56, %s4511_s24 }
  0x86   : > { %4109 = vrot.lane.b32.xlu1 %v4088_v48, %s4510_s19 }
  0x87   : > { %4104 = vrot.lane.b32.xlu0 %v4063_v45, %s4508_s15  ;;  %v3434_v45 = vld [vmem:[%s4602_s26 + $0xfa] sm:$0xff] }
  0x88   : > { %v3835_v63 = vpop.permute.xlu1 %3834 }
  0x89   : > { %v3825_v2 = vpop.permute.xlu0 %3824  ;;  %v3836_v24 = vunpack.i.l.bf16 %v3835_v63  ;;  %v3837_v32 = vunpack.i.h.bf16 %v3835_v63  ;;  %v4858_v63 = vld [vmem:[%s4602_s26 + $0x109] sm:$0xff] }
  0x8a   : > { %4119 = vrot.lane.b32.xlu1 %v4098_v55, %s4509_s18  ;;  %v3827_v7 = vunpack.i.h.bf16 %v3825_v2  ;;  %v3826_v8 = vunpack.i.l.bf16 %v3825_v2  ;;  %v4168_v16 = vpack.i.bf16 %v4861_v0, %v4858_v63 }
  0x8b   : > { %4114 = vrot.lane.b32.xlu0 %v4093_v56, %s4507_s12 }
  0x8c   : > { %v3840_v14 = vpop.permute.xlu1 %3839  ;;  %v1540_v29 = vsel %vm1539_vm0, %v353_v9, %v3826_v8  ;;  %v1541_v30 = vsel %vm1539_vm0, %v354_v13, %v3827_v7  ;;  %v3465_v9 = vld [vmem:[%s4602_s26 + $0x108] sm:$0xff]  ;;  %v3466_v13 = vld [vmem:[%s4602_s26 + $0x110] sm:$0xff] }
  0x8d   : > { %v3830_v19 = vpop.permute.xlu0 %3829  ;;  %v3841_v20 = vunpack.i.l.bf16 %v3840_v14  ;;  %v3842_v36 = vunpack.i.h.bf16 %v3840_v14 }
  0x8e   : > { %v3832_v21 = vunpack.i.h.bf16 %v3830_v19  ;;  %v3831_v22 = vunpack.i.l.bf16 %v3830_v19  ;;  %4129 = vrot.lane.b32.xlu1 %v4128_v6, %s4511_s24 }
  0x8f   : > { %4124 = vrot.lane.b32.xlu0 %v4123_v10, %s4512_s25 }
  0x90   : > { %v1573_v33 = vsel %vm1572_vm1, %v1540_v29, %v3831_v22  ;;  %v1574_v34 = vsel %vm1572_vm1, %v1541_v30, %v3832_v21  ;;  %v3850_v35 = vpop.permute.xlu1 %3849  ;;  %v4163_v21 = vpack.i.bf16 %v3466_v13, %v3465_v9  ;;  %v4917_v9 = vld [vmem:[%s4602_s26 + $0x129] sm:$0xff] }
  0x91   : > { %v1606_v37 = vsel %vm1605_vm2, %v1573_v33, %v3836_v24  ;;  %v3845_v38 = vpop.permute.xlu0 %3844  ;;  %v1607_v39 = vsel %vm1605_vm2, %v1574_v34, %v3837_v32  ;;  %v3851_v42 = vunpack.i.l.bf16 %v3850_v35  ;;  %v3852_v56 = vunpack.i.h.bf16 %v3850_v35 }
  0x92   : > { %v3846_v40 = vunpack.i.l.bf16 %v3845_v38  ;;  %4139 = vrot.lane.b32.xlu1 %v4098_v55, %s4508_s15  ;;  %v1639_v41 = vsel %vm1638_vm3, %v1606_v37, %v3841_v20  ;;  %v3847_v46 = vunpack.i.h.bf16 %v3845_v38  ;;  %v1640_v53 = vsel %vm1638_vm3, %v1607_v39, %v3842_v36 }
  0x93   : > { %4134 = vrot.lane.b32.xlu0 %v4840_v31, %s4513_s13  ;;  %v4158_v55 = vpack.i.bf16 %v3434_v45, %v3433_v44 }
  0x94   : > { %v3860_v47 = vpop.permute.xlu1 %3859  ;;  %v1672_v48 = vsel %vm1671_vm4, %v1639_v41, %v3846_v40  ;;  %v1673_v8 = vsel %vm1671_vm4, %v1640_v53, %v3847_v46  ;;  %v3467_v46 = vld [vmem:[%s4602_s26 + $0x120] sm:$0xff]  ;;  %v4903_v53 = vld [vmem:[%s4602_s26 + $0x112] sm:$0xff] }
  0x95   : > { %v3861_v49 = vunpack.i.l.bf16 %v3860_v47  ;;  %v3855_v51 = vpop.permute.xlu0 %3854  ;;  %v3862_v57 = vunpack.i.h.bf16 %v3860_v47  ;;  %v1705_v62 = vsel %vm1704_vm5, %v1672_v48, %v3851_v42  ;;  %v4896_v47 = vld [vmem:[%s4602_s26 + $0x128] sm:$0xff] }
  0x96   : > { %v3856_v54 = vunpack.i.l.bf16 %v3855_v51  ;;  %4149 = vrot.lane.b32.xlu1 %v4128_v6, %s4507_s12  ;;  %v3857_v1 = vunpack.i.h.bf16 %v3855_v51  ;;  %v4900_v51 = vld [vmem:[%s4602_s26 + $0x10a] sm:$0xff] }
  0x97   : > { %4144 = vrot.lane.b32.xlu0 %v4123_v10, %s4510_s19  ;;  %v1542_v6 = vsel %vm1539_vm0, %v4611_v11, %v3861_v49  ;;  %v1543_v19 = vsel %vm1539_vm0, %v4614_v12, %v3862_v57  ;;  %v1706_v11 = vsel %vm1704_vm5, %v1673_v8, %v3852_v56  ;;  %v3499_v8 = vld [vmem:[%s4602_s26 + $0x121] sm:$0xff] }
  0x98   : > { %v3870_v2 = vpop.permute.xlu1 %3869  ;;  %v1738_v7 = vsel %vm1737_vm6, %v1705_v62, %v3856_v54  ;;  %v1739_v29 = vsel %vm1737_vm6, %v1706_v11, %v3857_v1  ;;  %v4198_v1 = vpack.i.bf16 %v4896_v47, %v3467_v46 }
  0x99   : > { %v3865_v14 = vpop.permute.xlu0 %3864  ;;  %1956 = vmatmul.mubr.f32.vlgmr.msra.gmra.mrb[0].mxu0 %v1738_v7  ;;  %v3871_v20 = vunpack.i.l.bf16 %v3870_v2  ;;  %v3872_v30 = vunpack.i.h.bf16 %v3870_v2  ;;  %v4193_v7 = vpack.i.bf16 %v4903_v53, %v4900_v51 }
  0x9a   : > { %v3867_v10 = vunpack.i.h.bf16 %v3865_v14  ;;  %v3866_v15 = vunpack.i.l.bf16 %v3865_v14  ;;  %4159 = vrot.lane.b32.xlu1 %v4158_v55, %s4512_s25  ;;  %3545 = vmatprep.mubr.msk.f32.mxu0 %vm1539_vm0, %v4673_v43 }
  0x9b   : > { %4154 = vrot.lane.b32.xlu0 %v4840_v31, %s4509_s18 }
  0x9c   : > { %v1575_v22 = vsel %vm1572_vm1, %v1542_v6, %v3866_v15  ;;  %v3880_v24 = vpop.permute.xlu1 %3879  ;;  %v1576_v32 = vsel %vm1572_vm1, %v1543_v19, %v3867_v10 }
  0x9d   : > { %v3875_v43 = vpop.permute.xlu0 %3874  ;;  %1961 = vmatmul.mubr.f32.gmra.mrb[2].mxu0 %v1739_v29  ;;  %v3881_v12 = vunpack.i.l.bf16 %v3880_v24  ;;  %v1608_v35 = vsel %vm1605_vm2, %v1575_v22, %v3871_v20  ;;  %v3882_v38 = vunpack.i.h.bf16 %v3880_v24  ;;  %v1609_v39 = vsel %vm1605_vm2, %v1576_v32, %v3872_v30  ;;  %v4932_v22 = vld [vmem:[%s4602_s26 + $0x12a] sm:$0xff] }
  0x9e   : > { %v3877_v33 = vunpack.i.h.bf16 %v3875_v43  ;;  %v3876_v34 = vunpack.i.l.bf16 %v3875_v43  ;;  %4169 = vrot.lane.b32.xlu1 %v4168_v16, %s4513_s13  ;;  %3546 = vmatprep.mubr.msk.f32.mxu0 %vm1539_vm0, %v4720_v60 }
  0x9f   : > { %4164 = vrot.lane.b32.xlu0 %v4163_v21, %s4511_s24 }
  0xa0   : > { %v1641_v36 = vsel %vm1638_vm3, %v1608_v35, %v3876_v34  ;;  %v3890_v37 = vpop.permute.xlu1 %3889  ;;  %v1642_v42 = vsel %vm1638_vm3, %v1609_v39, %v3877_v33  ;;  %v4213_v34 = vpack.i.bf16 %v4900_v51, %v4932_v22 }
  0xa1   : > { %v3891_v40 = vunpack.i.l.bf16 %v3890_v37  ;;  %v3885_v41 = vpop.permute.xlu0 %3884  ;;  %v1674_v45 = vsel %vm1671_vm4, %v1641_v36, %v3881_v12  ;;  %v3892_v54 = vunpack.i.h.bf16 %v3890_v37  ;;  %v4947_v36 = vld [vmem:[%s4602_s26 + $0x139] sm:$0xff]  ;;  %v4950_v37 = vld [vmem:[%s4602_s26 + $0x141] sm:$0xff] }
  0xa2   : > { %v3887_v60 = vunpack.i.h.bf16 %v3885_v41  ;;  %v3886_v44 = vunpack.i.l.bf16 %v3885_v41  ;;  %4179 = vrot.lane.b32.xlu1 %v4158_v55, %s4510_s19 }
  0xa3   : > { %4174 = vrot.lane.b32.xlu0 %v4840_v31, %s4508_s15  ;;  %v1675_v31 = vsel %vm1671_vm4, %v1642_v42, %v3882_v38 }
  0xa4   : > { %v3900_v48 = vpop.permute.xlu1 %3899  ;;  %v1707_v49 = vsel %vm1704_vm5, %v1674_v45, %v3886_v44  ;;  %v1708_v62 = vsel %vm1704_vm5, %v1675_v31, %v3887_v60  ;;  %v4228_v45 = vpack.i.bf16 %v4861_v0, %v4947_v36  ;;  %v4969_v0 = vld [vmem:[%s4602_s26 + $0x122] sm:$0xff] }
  0xa5   : > { %v3895_v56 = vpop.permute.xlu0 %3894  ;;  %v1740_v55 = vsel %vm1737_vm6, %v1707_v49, %v3891_v40  ;;  %v3901_v2 = vunpack.i.l.bf16 %v3900_v48  ;;  %v1741_v15 = vsel %vm1737_vm6, %v1708_v62, %v3892_v54  ;;  %v3902_v19 = vunpack.i.h.bf16 %v3900_v48 }
  0xa6   : > { %v3896_v57 = vunpack.i.l.bf16 %v3895_v56  ;;  %1966 = vmatmul.mubr.f32.gmra.mrb[4].mxu0 %v1740_v55  ;;  %4189 = vrot.lane.b32.xlu1 %v4168_v16, %s4509_s18  ;;  %v3897_v13 = vunpack.i.h.bf16 %v3895_v56  ;;  %v4964_v55 = vld [vmem:[%s4602_s26 + $0x13a] sm:$0xff] }
  0xa7   : > { %4184 = vrot.lane.b32.xlu0 %v4163_v21, %s4507_s12  ;;  %3547 = vmatprep.mubr.msk.f32.mxu0 %vm1539_vm0, %v4723_v61  ;;  %v4208_v61 = vpack.i.bf16 %v4917_v9, %v3499_v8  ;;  %v4203_v21 = vpack.i.bf16 %v4858_v63, %v4917_v9 }
  0xa8   : > { %v1544_v6 = vsel %vm1539_vm0, %v4632_v25, %v3896_v57  ;;  %v3910_v14 = vpop.permute.xlu1 %3909  ;;  %v4929_v25 = vld [vmem:[%s4602_s26 + $0x140] sm:$0xff]  ;;  %v1545_v24 = vsel %vm1539_vm0, %v4635_v26, %v3897_v13 }
  0xa9   : > { %v3905_v10 = vpop.permute.xlu0 %3904  ;;  %v3911_v20 = vunpack.i.l.bf16 %v3910_v14  ;;  %v1577_v11 = vsel %vm1572_vm1, %v1544_v6, %v3901_v2  ;;  %v4218_v63 = vpack.i.bf16 %v3467_v46, %v4929_v25  ;;  %v3912_v12 = vunpack.i.h.bf16 %v3910_v14  ;;  %v3440_v2 = vld [vmem:[%s4602_s26 + $0x142] sm:$0xff] }
  0xaa   : > { %v3906_v16 = vunpack.i.l.bf16 %v3905_v10  ;;  %1971 = vmatmul.mubr.f32.gmra.mrb[6].mxu0 %v1741_v15  ;;  %4199 = vrot.lane.b32.xlu1 %v4198_v1, %s4511_s24  ;;  %v3907_v29 = vunpack.i.h.bf16 %v3905_v10  ;;  %v4958_v46 = vpack.i.bf16 %v3499_v8, %v4950_v37  ;;  %v4238_v14 = vpack.i.bf16 %v4903_v53, %v4964_v55 }
  0xab   : > { %4194 = vrot.lane.b32.xlu0 %v4193_v7, %s4512_s25  ;;  %3548 = vmatprep.mubr.msk.f32.mxu0 %vm1539_vm0, %v4738_v4  ;;  %v1578_v4 = vsel %vm1572_vm1, %v1545_v24, %v3902_v19 }
  0xac   : > { %v1610_v30 = vsel %vm1605_vm2, %v1577_v11, %v3906_v16  ;;  %v3920_v43 = vpop.permute.xlu1 %3919  ;;  %v1611_v38 = vsel %vm1605_vm2, %v1578_v4, %v3907_v29  ;;  %v4985_v16 = vpack.i.bf16 %v4969_v0, %v3440_v2  ;;  %v4993_v11 = vld [vmem:[%s4602_s26 + $0x138] sm:$0xff] }
  0xad   : > { %v3915_v32 = vpop.permute.xlu0 %3914  ;;  %v3921_v35 = vunpack.i.l.bf16 %v3920_v43  ;;  %v1643_v26 = vsel %vm1638_vm3, %v1610_v30, %v3911_v20  ;;  %v3922_v48 = vunpack.i.h.bf16 %v3920_v43  ;;  %v1644_v56 = vsel %vm1638_vm3, %v1611_v38, %v3912_v12  ;;  %v5009_v12 = vld [vmem:[%s4602_s26 + $0x151] sm:$0xff] }
  0xae   : > { %v3916_v33 = vunpack.i.l.bf16 %v3915_v32  ;;  %4209 = vrot.lane.b32.xlu1 %v4208_v61, %s4513_s13  ;;  %v3917_v39 = vunpack.i.h.bf16 %v3915_v32  ;;  %v4988_v61 = vld [vmem:[%s4602_s26 + $0x150] sm:$0xff] }
  0xaf   : > { %4204 = vrot.lane.b32.xlu0 %v4203_v21, %s4508_s15  ;;  %v4248_v32 = vpack.i.bf16 %v4896_v47, %v4988_v61 }
  0xb0   : > { %v3930_v40 = vpop.permute.xlu1 %3929  ;;  %v1676_v41 = vsel %vm1671_vm4, %v1643_v26, %v3916_v33  ;;  %v1677_v1 = vsel %vm1671_vm4, %v1644_v56, %v3917_v39  ;;  %v5013_v26 = vld [vmem:[%s4602_s26 + $0x159] sm:$0xff] }
  0xb1   : > { %v3931_v42 = vunpack.i.l.bf16 %v3930_v40  ;;  %v3925_v60 = vpop.permute.xlu0 %3924  ;;  %v3932_v49 = vunpack.i.h.bf16 %v3930_v40  ;;  %v1709_v54 = vsel %vm1704_vm5, %v1676_v41, %v3921_v35 }
  0xb2   : > { %v3926_v44 = vunpack.i.l.bf16 %v3925_v60  ;;  %4219 = vrot.lane.b32.xlu1 %v4218_v63, %s4507_s12  ;;  %v3927_v31 = vunpack.i.h.bf16 %v3925_v60  ;;  %v4258_v60 = vpack.i.bf16 %v4917_v9, %v5009_v12 }
  0xb3   : > { %4214 = vrot.lane.b32.xlu0 %v4213_v34, %s4510_s19  ;;  %v1546_v7 = vsel %vm1539_vm0, %v4689_v50, %v3931_v42  ;;  %v1547_v10 = vsel %vm1539_vm0, %v4692_v52, %v3932_v49  ;;  %v1710_v50 = vsel %vm1704_vm5, %v1677_v1, %v3922_v48  ;;  %v3472_v52 = vld [vmem:[%s4602_s26 + $0x158] sm:$0xff] }
  0xb4   : > { %v3940_v57 = vpop.permute.xlu1 %3939  ;;  %v1742_v62 = vsel %vm1737_vm6, %v1709_v54, %v3926_v44  ;;  %v1743_v20 = vsel %vm1737_vm6, %v1710_v50, %v3927_v31  ;;  %v5006_v34 = vpack.i.bf16 %v4993_v11, %v3472_v52  ;;  %v5028_v48 = vld [vmem:[%s4602_s26 + $0x152] sm:$0xff] }
  0xb5   : > { %v3935_v8 = vpop.permute.xlu0 %3934  ;;  %1976 = vmatmul.mubr.f32.gmra.mrb[8].mxu0 %v1742_v62  ;;  %v3941_v15 = vunpack.i.l.bf16 %v3940_v57  ;;  %v3942_v21 = vunpack.i.h.bf16 %v3940_v57 }
  0xb6   : > { %v3937_v13 = vunpack.i.h.bf16 %v3935_v8  ;;  %v3936_v6 = vunpack.i.l.bf16 %v3935_v8  ;;  %4229 = vrot.lane.b32.xlu1 %v4228_v45, %s4508_s15  ;;  %3549 = vmatprep.mubr.msk.f32.mxu0 %vm1539_vm0, %v4741_v5  ;;  %v5025_v45 = vpack.i.bf16 %v4947_v36, %v5013_v26  ;;  %v4268_v36 = vpack.i.bf16 %v4932_v22, %v5028_v48 }
  0xb7   : > { %4224 = vrot.lane.b32.xlu0 %v4958_v46, %s4509_s18 }
  0xb8   : > { %v1579_v19 = vsel %vm1572_vm1, %v1546_v7, %v3936_v6  ;;  %v3950_v5 = vpop.permute.xlu1 %3949  ;;  %v1580_v29 = vsel %vm1572_vm1, %v1547_v10, %v3937_v13  ;;  %v5042_v7 = vld [vmem:[%s4602_s26 + $0x168] sm:$0xff] }
  0xb9   : > { %v3945_v24 = vpop.permute.xlu0 %3944  ;;  %1981 = vmatmul.mubr.f32.gmra.mrb[10].mxu0 %v1743_v20  ;;  %v3951_v33 = vunpack.i.l.bf16 %v3950_v5  ;;  %v1612_v63 = vsel %vm1605_vm2, %v1579_v19, %v3941_v15  ;;  %v3952_v47 = vunpack.i.h.bf16 %v3950_v5  ;;  %v4278_v50 = vpack.i.bf16 %v4929_v25, %v5042_v7  ;;  %v5054_v20 = vld [vmem:[%s4602_s26 + $0x169] sm:$0xff] }
  0xba   : > { %v3947_v30 = vunpack.i.h.bf16 %v3945_v24  ;;  %v3946_v43 = vunpack.i.l.bf16 %v3945_v24  ;;  %4239 = vrot.lane.b32.xlu1 %v4238_v14, %s4510_s19  ;;  %3550 = vmatprep.mubr.msk.f32.mxu0 %vm1539_vm0, %v4760_v17  ;;  %v1613_v17 = vsel %vm1605_vm2, %v1580_v29, %v3942_v21 }
  0xbb   : > { %4234 = vrot.lane.b32.xlu0 %v4985_v16, %s4512_s25 }
  0xbc   : > { %v1645_v4 = vsel %vm1638_vm3, %v1612_v63, %v3946_v43  ;;  %v3960_v35 = vpop.permute.xlu1 %3959  ;;  %v1646_v40 = vsel %vm1638_vm3, %v1613_v17, %v3947_v30  ;;  %v363_v17 = vld [vmem:[%s4602_s26 + $0x78] sm:$0xff] }
  0xbd   : > { %v3961_v38 = vunpack.i.l.bf16 %v3960_v35  ;;  %v3955_v39 = vpop.permute.xlu0 %3954  ;;  %v1678_v44 = vsel %vm1671_vm4, %v1645_v4, %v3951_v33  ;;  %v3962_v56 = vunpack.i.h.bf16 %v3960_v35  ;;  %v1679_v9 = vsel %vm1671_vm4, %v1646_v40, %v3952_v47 }
  0xbe   : > { %v3957_v41 = vunpack.i.h.bf16 %v3955_v39  ;;  %v3956_v42 = vunpack.i.l.bf16 %v3955_v39  ;;  %4249 = vrot.lane.b32.xlu1 %v4248_v32, %s4507_s12 }
  0xbf   : > { %4244 = vrot.lane.b32.xlu0 %v5006_v34, %s4511_s24 }
  0xc0   : > { %v3970_v49 = vpop.permute.xlu1 %3969  ;;  %v1711_v54 = vsel %vm1704_vm5, %v1678_v44, %v3956_v42  ;;  %v1712_v1 = vsel %vm1704_vm5, %v1679_v9, %v3957_v41  ;;  %v364_v42 = vld [vmem:[%s4602_s26 + $0x80] sm:$0xff] }
  0xc1   : > { %v3965_v31 = vpop.permute.xlu0 %3964  ;;  %v1744_v57 = vsel %vm1737_vm6, %v1711_v54, %v3961_v38  ;;  %v3971_v2 = vunpack.i.l.bf16 %v3970_v49  ;;  %v1745_v10 = vsel %vm1737_vm6, %v1712_v1, %v3962_v56  ;;  %v3972_v19 = vunpack.i.h.bf16 %v3970_v49 }
  0xc2   : > { %v3966_v62 = vunpack.i.l.bf16 %v3965_v31  ;;  %1986 = vmatmul.mubr.f32.gmra.mrb[12].mxu0 %v1744_v57  ;;  %4259 = vrot.lane.b32.xlu1 %v4258_v60, %s4509_s18  ;;  %v3967_v8 = vunpack.i.h.bf16 %v3965_v31  ;;  %v4298_v38 = vpack.i.bf16 %v5013_v26, %v5009_v12 }
  0xc3   : > { %4254 = vrot.lane.b32.xlu0 %v5025_v45, %s4513_s13  ;;  %3551 = vmatprep.mubr.msk.f32.mxu0 %vm1539_vm0, %v4763_v18 }
  0xc4   : > { %v1548_v13 = vsel %vm1539_vm0, %v4714_v58, %v3966_v62  ;;  %v3980_v6 = vpop.permute.xlu1 %3979  ;;  %v1549_v58 = vsel %vm1539_vm0, %v4717_v59, %v3967_v8  ;;  %v3521_v8 = vld [vmem:[%s4602_s26 + $0xaa] sm:$0xff] }
  0xc5   : > { %v3975_v14 = vpop.permute.xlu0 %3974  ;;  %v3981_v5 = vunpack.i.l.bf16 %v3980_v6  ;;  %v1581_v18 = vsel %vm1572_vm1, %v1548_v13, %v3971_v2  ;;  %v3982_v30 = vunpack.i.h.bf16 %v3980_v6  ;;  %v1582_v43 = vsel %vm1572_vm1, %v1549_v58, %v3972_v19  ;;  %v5094_v2 = vld [vmem:[%s4602_s26 + $0x170] sm:$0xff] }
  0xc6   : > { %v3976_v15 = vunpack.i.l.bf16 %v3975_v14  ;;  %1991 = vmatmul.mubr.f32.gmra.mrb[14].mxu0 %v1745_v10  ;;  %4269 = vrot.lane.b32.xlu1 %v4268_v36, %s4512_s25  ;;  %v3977_v52 = vunpack.i.h.bf16 %v3975_v14  ;;  %v4303_v36 = vpack.i.bf16 %v4964_v55, %v4772_v23 }
  0xc7   : > { %4264 = vrot.lane.b32.xlu0 %v4958_v46, %s4508_s15  ;;  %3552 = vmatprep.mubr.msk.f32.mxu0 %vm1539_vm0, %v4781_v27  ;;  %v4288_v46 = vpack.i.bf16 %v4950_v37, %v5054_v20 }
  0xc8   : > { %v1614_v21 = vsel %vm1605_vm2, %v1581_v18, %v3976_v15  ;;  %v3990_v24 = vpop.permute.xlu1 %3989  ;;  %v1615_v27 = vsel %vm1605_vm2, %v1582_v43, %v3977_v52  ;;  %v3412_v18 = vld [vmem:[%s4602_s26 + $0x171] sm:$0xff] }
  0xc9   : > { %v3985_v25 = vpop.permute.xlu0 %3984  ;;  %v3991_v32 = vunpack.i.l.bf16 %v3990_v24  ;;  %v1647_v59 = vsel %vm1638_vm3, %v1614_v21, %v3981_v5  ;;  %v3992_v39 = vunpack.i.h.bf16 %v3990_v24  ;;  %v1648_v41 = vsel %vm1638_vm3, %v1615_v27, %v3982_v30  ;;  %v3476_v27 = vld [vmem:[%s4602_s26 + $0x188] sm:$0xff] }
  0xca   : > { %v3986_v29 = vunpack.i.l.bf16 %v3985_v25  ;;  %4279 = vrot.lane.b32.xlu1 %v4278_v50, %s4511_s24  ;;  %v3987_v33 = vunpack.i.h.bf16 %v3985_v25  ;;  %v4313_v5 = vpack.i.bf16 %v4988_v61, %v5094_v2  ;;  %v4328_v61 = vpack.i.bf16 %v3412_v18, %v5054_v20  ;;  %v365_v20 = vld [vmem:[%s4602_s26 + $0x90] sm:$0xff] }
  0xcb   : > { %4274 = vrot.lane.b32.xlu0 %v4985_v16, %s4510_s19 }
  0xcc   : > { %v4000_v63 = vpop.permute.xlu1 %3999  ;;  %v1680_v4 = vsel %vm1671_vm4, %v1647_v59, %v3986_v29  ;;  %v1681_v54 = vsel %vm1671_vm4, %v1648_v41, %v3987_v33  ;;  %v3475_v59 = vld [vmem:[%s4602_s26 + $0x180] sm:$0xff] }
  0xcd   : > { %v4001_v35 = vunpack.i.l.bf16 %v4000_v63  ;;  %v3995_v47 = vpop.permute.xlu0 %3994  ;;  %v4002_v16 = vunpack.i.h.bf16 %v4000_v63  ;;  %v1713_v40 = vsel %vm1704_vm5, %v1680_v4, %v3991_v32  ;;  %v1714_v1 = vsel %vm1704_vm5, %v1681_v54, %v3992_v39  ;;  %v3522_v4 = vld [vmem:[%s4602_s26 + $0xb2] sm:$0xff]  ;;  %v3507_v54 = vld [vmem:[%s4602_s26 + $0x181] sm:$0xff] }
  0xce   : > { %v3996_v37 = vunpack.i.l.bf16 %v3995_v47  ;;  %4289 = vrot.lane.b32.xlu1 %v4288_v46, %s4513_s13  ;;  %v3997_v60 = vunpack.i.h.bf16 %v3995_v47  ;;  %v4323_v32 = vpack.i.bf16 %v5009_v12, %v3412_v18  ;;  %v5125_v47 = vld [vmem:[%s4602_s26 + $0x172] sm:$0xff] }
  0xcf   : > { %4284 = vrot.lane.b32.xlu0 %v5006_v34, %s4507_s12  ;;  %v1550_v26 = vsel %vm1539_vm0, %v363_v17, %v4001_v35  ;;  %v4308_v34 = vpack.i.bf16 %v4772_v23, %v5028_v48  ;;  %v1551_v9 = vsel %vm1539_vm0, %v364_v42, %v4002_v16  ;;  %v4318_v23 = vpack.i.bf16 %v5094_v2, %v5042_v7  ;;  %v5122_v35 = vld [vmem:[%s4602_s26 + $0x16a] sm:$0xff] }
  0xd0   : > { %v4010_v44 = vpop.permute.xlu1 %4009  ;;  %v1746_v49 = vsel %vm1737_vm6, %v1713_v40, %v3996_v37  ;;  %v1747_v48 = vsel %vm1737_vm6, %v1714_v1, %v3997_v60  ;;  %v4338_v40 = vpack.i.bf16 %v3476_v27, %v3475_v59  ;;  %v4333_v42 = vpack.i.bf16 %v5125_v47, %v5122_v35 }
  0xd1   : > { %v4005_v56 = vpop.permute.xlu0 %4004  ;;  %1996 = vmatmul.mubr.f32.gmra.mrb[16].mxu0 %v1746_v49  ;;  %v4011_v62 = vunpack.i.l.bf16 %v4010_v44  ;;  %v4012_v6 = vunpack.i.h.bf16 %v4010_v44 }
  0xd2   : > { %v4007_v31 = vunpack.i.h.bf16 %v4005_v56  ;;  %v4006_v57 = vunpack.i.l.bf16 %v4005_v56  ;;  %4299 = vrot.lane.b32.xlu1 %v4298_v38, %s4508_s15  ;;  %3553 = vmatprep.mubr.msk.f32.mxu0 %vm1539_vm0, %v4784_v28  ;;  %v3523_v56 = vld [vmem:[%s4602_s26 + $0xc2] sm:$0xff] }
  0xd3   : > { %4294 = vrot.lane.b32.xlu0 %v5025_v45, %s4509_s18 }
  0xd4   : > { %v1583_v13 = vsel %vm1572_vm1, %v1550_v26, %v4006_v57  ;;  %v4020_v28 = vpop.permute.xlu1 %4019  ;;  %v1584_v10 = vsel %vm1572_vm1, %v1551_v9, %v4007_v31  ;;  %v3508_v26 = vld [vmem:[%s4602_s26 + $0x189] sm:$0xff]  ;;  %v366_v31 = vld [vmem:[%s4602_s26 + $0x98] sm:$0xff] }
  0xd5   : > { %v4015_v14 = vpop.permute.xlu0 %4014  ;;  %2001 = vmatmul.mubr.f32.gmra.mrb[18].mxu0 %v1747_v48  ;;  %v4021_v50 = vunpack.i.l.bf16 %v4020_v28  ;;  %v1616_v19 = vsel %vm1605_vm2, %v1583_v13, %v4011_v62  ;;  %v4022_v21 = vunpack.i.h.bf16 %v4020_v28  ;;  %v1617_v7 = vsel %vm1605_vm2, %v1584_v10, %v4012_v6 }
  0xd6   : > { %v4017_v45 = vunpack.i.h.bf16 %v4015_v14  ;;  %v4016_v15 = vunpack.i.l.bf16 %v4015_v14  ;;  %4309 = vrot.lane.b32.xlu1 %v4308_v34, %s4510_s19  ;;  %3554 = vmatprep.mubr.msk.f32.mxu0 %vm1539_vm0, %v3521_v8  ;;  %v4343_v8 = vpack.i.bf16 %v3508_v26, %v3507_v54 }
  0xd7   : > { %4304 = vrot.lane.b32.xlu0 %v4303_v36, %s4512_s25 }
  0xd8   : > { %v1649_v58 = vsel %vm1638_vm3, %v1616_v19, %v4016_v15  ;;  %v4030_v52 = vpop.permute.xlu1 %4029  ;;  %v1650_v29 = vsel %vm1638_vm3, %v1617_v7, %v4017_v45  ;;  %v367_v7 = vld [vmem:[%s4602_s26 + $0xa8] sm:$0xff] }
  0xd9   : > { %v4031_v24 = vunpack.i.l.bf16 %v4030_v52  ;;  %v4025_v25 = vpop.permute.xlu0 %4024  ;;  %v1682_v43 = vsel %vm1671_vm4, %v1649_v58, %v4021_v50  ;;  %v4032_v17 = vunpack.i.h.bf16 %v4030_v52  ;;  %v1683_v12 = vsel %vm1671_vm4, %v1650_v29, %v4022_v21 }
  0xda   : > { %v4027_v46 = vunpack.i.h.bf16 %v4025_v25  ;;  %v4026_v30 = vunpack.i.l.bf16 %v4025_v25  ;;  %4319 = vrot.lane.b32.xlu1 %v4318_v23, %s4507_s12 }
  0xdb   : > { %4314 = vrot.lane.b32.xlu0 %v4313_v5, %s4511_s24 }
  0xdc   : > { %v4040_v33 = vpop.permute.xlu1 %4039  ;;  %v1715_v63 = vsel %vm1704_vm5, %v1682_v43, %v4026_v30  ;;  %v1716_v16 = vsel %vm1704_vm5, %v1683_v12, %v4027_v46  ;;  %v5159_v30 = vld [vmem:[%s4602_s26 + $0x182] sm:$0xff] }
  0xdd   : > { %v4035_v37 = vpop.permute.xlu0 %4034  ;;  %v1748_v38 = vsel %vm1737_vm6, %v1715_v63, %v4031_v24  ;;  %v4041_v41 = vunpack.i.l.bf16 %v4040_v33  ;;  %v1749_v34 = vsel %vm1737_vm6, %v1716_v16, %v4032_v17  ;;  %v4042_v62 = vunpack.i.h.bf16 %v4040_v33  ;;  %v3509_v16 = vld [vmem:[%s4602_s26 + $0x199] sm:$0xff] }
  0xde   : > { %v4036_v39 = vunpack.i.l.bf16 %v4035_v37  ;;  %2006 = vmatmul.mubr.f32.gmra.mrb[20].mxu0 %v1748_v38  ;;  %4329 = vrot.lane.b32.xlu1 %v4328_v61, %s4509_s18  ;;  %v4037_v60 = vunpack.i.h.bf16 %v4035_v37 }
  0xdf   : > { %4324 = vrot.lane.b32.xlu0 %v4323_v32, %s4513_s13  ;;  %3555 = vmatprep.mubr.msk.f32.mxu0 %vm1539_vm0, %v3522_v4  ;;  %v368_v32 = vld [vmem:[%s4602_s26 + $0xb0] sm:$0xff] }
  0xe0   : > { %v1552_v44 = vsel %vm1539_vm0, %v365_v20, %v4036_v39  ;;  %v4050_v49 = vpop.permute.xlu1 %4049  ;;  %v1553_v13 = vsel %vm1539_vm0, %v366_v31, %v4037_v60 }
  0xe1   : > { %v4045_v57 = vpop.permute.xlu0 %4044  ;;  %v4051_v1 = vunpack.i.l.bf16 %v4050_v49  ;;  %v1585_v36 = vsel %vm1572_vm1, %v1552_v44, %v4041_v41  ;;  %v4052_v45 = vunpack.i.h.bf16 %v4050_v49  ;;  %v1586_v15 = vsel %vm1572_vm1, %v1553_v13, %v4042_v62  ;;  %v3477_v44 = vld [vmem:[%s4602_s26 + $0x198] sm:$0xff] }
  0xe2   : > { %v4046_v9 = vunpack.i.l.bf16 %v4045_v57  ;;  %2011 = vmatmul.mubr.f32.gmra.mrb[22].mxu0 %v1749_v34  ;;  %4339 = vrot.lane.b32.xlu1 %v4338_v40, %s4511_s24  ;;  %v4047_v28 = vunpack.i.h.bf16 %v4045_v57 }
  0xe3   : > { %4334 = vrot.lane.b32.xlu0 %v4333_v42, %s4512_s25  ;;  %3556 = vmatprep.mubr.msk.f32.mxu0 %vm1539_vm0, %v3523_v56 }
  0xe4   : > { %v1618_v48 = vsel %vm1605_vm2, %v1585_v36, %v4046_v9  ;;  %v4060_v6 = vpop.permute.xlu1 %4059  ;;  %v1619_v19 = vsel %vm1605_vm2, %v1586_v15, %v4047_v28  ;;  %v3478_v9 = vld [vmem:[%s4602_s26 + $0x1a0] sm:$0xff]  ;;  %v5186_v36 = vld [vmem:[%s4602_s26 + $0x18a] sm:$0xff] }
  0xe5   : > { %v4055_v14 = vpop.permute.xlu0 %4054  ;;  %v4061_v23 = vunpack.i.l.bf16 %v4060_v6  ;;  %v1651_v50 = vsel %vm1638_vm3, %v1618_v48, %v4051_v1  ;;  %v4062_v25 = vunpack.i.h.bf16 %v4060_v6  ;;  %v1652_v43 = vsel %vm1638_vm3, %v1619_v19, %v4052_v45  ;;  %v3526_v19 = vld [vmem:[%s4602_s26 + $0xe2] sm:$0xff] }
  0xe6   : > { %v4056_v10 = vunpack.i.l.bf16 %v4055_v14  ;;  %4349 = vrot.lane.b32.xlu1 %v4328_v61, %s4508_s15  ;;  %v4057_v5 = vunpack.i.h.bf16 %v4055_v14  ;;  %v3524_v61 = vld [vmem:[%s4602_s26 + $0xca] sm:$0xff] }
  0xe7   : > { %4344 = vrot.lane.b32.xlu0 %v4343_v8, %s4513_s13 }
  0xe8   : > { %v4070_v18 = vpop.permute.xlu1 %4069  ;;  %v1684_v58 = vsel %vm1671_vm4, %v1651_v50, %v4056_v10  ;;  %v1685_v63 = vsel %vm1671_vm4, %v1652_v43, %v4057_v5  ;;  %v3510_v50 = vld [vmem:[%s4602_s26 + $0x1a1] sm:$0xff]  ;;  %v3527_v43 = vld [vmem:[%s4602_s26 + $0xf2] sm:$0xff] }
  0xe9   : > { %v4071_v52 = vunpack.i.l.bf16 %v4070_v18  ;;  %v4065_v21 = vpop.permute.xlu0 %4064  ;;  %v4072_v29 = vunpack.i.h.bf16 %v4070_v18  ;;  %v1717_v46 = vsel %vm1704_vm5, %v1684_v58, %v4061_v23  ;;  %v1718_v39 = vsel %vm1704_vm5, %v1685_v63, %v4062_v25  ;;  %v369_v58 = vld [vmem:[%s4602_s26 + $0xc0] sm:$0xff] }
  0xea   : > { %v4066_v24 = vunpack.i.l.bf16 %v4065_v21  ;;  %4359 = vrot.lane.b32.xlu1 %v4338_v40, %s4507_s12  ;;  %v4067_v59 = vunpack.i.h.bf16 %v4065_v21  ;;  %v3525_v40 = vld [vmem:[%s4602_s26 + $0xda] sm:$0xff]  ;;  %s6144_s12 = scalar_lea.vmem %s6390_s9, %s3648_s29 }
  0xeb   : > { %4354 = vrot.lane.b32.xlu0 %v4333_v42, %s4510_s19  ;;  %v1554_v4 = vsel %vm1539_vm0, %v367_v7, %v4071_v52  ;;  %v1555_v38 = vsel %vm1539_vm0, %v368_v32, %v4072_v29  ;;  %v370_v32 = vld [vmem:[%s4602_s26 + $0xc8] sm:$0xff] }
  0xec   : > { %v4080_v27 = vpop.permute.xlu1 %4079  ;;  %v1750_v33 = vsel %vm1737_vm6, %v1717_v46, %v4066_v24  ;;  %v1751_v60 = vsel %vm1737_vm6, %v1718_v39, %v4067_v59 }
  0xed   : > { %v4075_v17 = vpop.permute.xlu0 %4074  ;;  %2016 = vmatmul.mubr.f32.gmra.mrb[24].mxu0 %v1750_v33  ;;  %v4081_v12 = vunpack.i.l.bf16 %v4080_v27  ;;  %v4082_v49 = vunpack.i.h.bf16 %v4080_v27 }
  0xee   : > { %v4077_v37 = vunpack.i.h.bf16 %v4075_v17  ;;  %v4076_v20 = vunpack.i.l.bf16 %v4075_v17  ;;  %1247 = vrot.lane.b32.xlu1 %v5159_v30, %s4512_s25  ;;  %3557 = vmatprep.mubr.msk.f32.mxu0 %vm1539_vm0, %v3524_v61 }
  0xef   : > { %4364 = vrot.lane.b32.xlu0 %v4343_v8, %s4509_s18 }
  0xf0   : > { %v1587_v41 = vsel %vm1572_vm1, %v1554_v4, %v4076_v20  ;;  %v4090_v42 = vpop.permute.xlu1 %4089  ;;  %v1588_v26 = vsel %vm1572_vm1, %v1555_v38, %v4077_v37 }
  0xf1   : > { %v4085_v54 = vpop.permute.xlu0 %4084  ;;  %2021 = vmatmul.mubr.f32.gmra.mrb[26].mxu0 %v1751_v60  ;;  %v4091_v57 = vunpack.i.l.bf16 %v4090_v42  ;;  %v1620_v34 = vsel %vm1605_vm2, %v1587_v41, %v4081_v12  ;;  %v4092_v8 = vunpack.i.h.bf16 %v4090_v42  ;;  %v1621_v13 = vsel %vm1605_vm2, %v1588_v26, %v4082_v49 }
  0xf2   : > { %v4087_v56 = vunpack.i.h.bf16 %v4085_v54  ;;  %v4086_v31 = vunpack.i.l.bf16 %v4085_v54  ;;  %1503 = vrot.lane.b32.xlu1 %v3509_v16, %s4513_s13  ;;  %3558 = vmatprep.mubr.msk.f32.mxu0 %vm1539_vm0, %v3525_v40 }
  0xf3   : > { %1375 = vrot.lane.b32.xlu0 %v3477_v44, %s4511_s24 }
  0xf4   : > { %v1653_v62 = vsel %vm1638_vm3, %v1620_v34, %v4086_v31  ;;  %v4100_v1 = vpop.permute.xlu1 %4099  ;;  %v1654_v6 = vsel %vm1638_vm3, %v1621_v13, %v4087_v56 }
  0xf5   : > { %v4101_v28 = vunpack.i.l.bf16 %v4100_v1  ;;  %v4095_v48 = vpop.permute.xlu0 %4094  ;;  %v1686_v45 = vsel %vm1671_vm4, %v1653_v62, %v4091_v57  ;;  %v4102_v5 = vunpack.i.h.bf16 %v4100_v1  ;;  %v1687_v21 = vsel %vm1671_vm4, %v1654_v6, %v4092_v8  ;;  %v371_v57 = vld [vmem:[%s4602_s26 + $0xd8] sm:$0xff] }
  0xf6   : > { %v4097_v14 = vunpack.i.h.bf16 %v4095_v48  ;;  %v4096_v10 = vunpack.i.l.bf16 %v4095_v48  ;;  %1377 = vrot.lane.b32.xlu1 %v3478_v9, %s4511_s24  ;;  %v3528_v8 = vld [vmem:[%s4602_s26 + $0xfa] sm:$0xff] }
  0xf7   : > { %1249 = vrot.lane.b32.xlu0 %v5186_v36, %s4512_s25 }
  0xf8   : > { %v4110_v15 = vpop.permute.xlu1 %4109  ;;  %v1719_v23 = vsel %vm1704_vm5, %v1686_v45, %v4096_v10  ;;  %v1720_v24 = vsel %vm1704_vm5, %v1687_v21, %v4097_v14 }
  0xf9   : > { %v4105_v18 = vpop.permute.xlu0 %4104  ;;  %v1752_v52 = vsel %vm1737_vm6, %v1719_v23, %v4101_v28  ;;  %v4111_v25 = vunpack.i.l.bf16 %v4110_v15  ;;  %v1753_v27 = vsel %vm1737_vm6, %v1720_v24, %v4102_v5  ;;  %v4112_v63 = vunpack.i.h.bf16 %v4110_v15  ;;  %v372_v28 = vld [vmem:[%s4602_s26 + $0xe0] sm:$0xff] }
  0xfa   : > { %v4106_v7 = vunpack.i.l.bf16 %v4105_v18  ;;  %2026 = vmatmul.mubr.f32.gmra.mrb[28].mxu0 %v1752_v52  ;;  %v4107_v29 = vunpack.i.h.bf16 %v4105_v18 }
  0xfb   : > { %1505 = vrot.lane.b32.xlu0 %v3510_v50, %s4513_s13  ;;  %3559 = vmatprep.mubr.msk.f32.mxu0 %vm1539_vm0, %v3526_v19 }
  0xfc   : > { %v1556_v46 = vsel %vm1539_vm0, %v369_v58, %v4106_v7  ;;  %v4120_v61 = vpop.permute.xlu1 %4119  ;;  %v1557_v37 = vsel %vm1539_vm0, %v370_v32, %v4107_v29 }
  0xfd   : > { %v4115_v59 = vpop.permute.xlu0 %4114  ;;  %v4121_v4 = vunpack.i.l.bf16 %v4120_v61  ;;  %v1589_v17 = vsel %vm1572_vm1, %v1556_v46, %v4111_v25  ;;  %v4122_v40 = vunpack.i.h.bf16 %v4120_v61  ;;  %v1590_v41 = vsel %vm1572_vm1, %v1557_v37, %v4112_v63 }
  0xfe   : > { %v4116_v33 = vunpack.i.l.bf16 %v4115_v59  ;;  %2031 = vmatmul.mubr.f32.gmra.mrb[30].mxu0 %v1753_v27  ;;  %v4117_v20 = vunpack.i.h.bf16 %v4115_v59 }
  0xff   : > { %3560 = vmatprep.mubr.msk.f32.mxu0 %vm1539_vm0, %v3527_v43 }
 0x100   : > { %v1622_v38 = vsel %vm1605_vm2, %v1589_v17, %v4116_v33  ;;  %v4130_v12 = vpop.permute.xlu1 %4129  ;;  %v1623_v44 = vsel %vm1605_vm2, %v1590_v41, %v4117_v20 }
 0x101   : > { %v4125_v39 = vpop.permute.xlu0 %4124  ;;  %v4131_v42 = vunpack.i.l.bf16 %v4130_v12  ;;  %v1655_v60 = vsel %vm1638_vm3, %v1622_v38, %v4121_v4  ;;  %v4132_v9 = vunpack.i.h.bf16 %v4130_v12  ;;  %v1656_v13 = vsel %vm1638_vm3, %v1623_v44, %v4122_v40  ;;  %v373_v40 = vld [vmem:[%s4602_s26 + $0xf0] sm:$0xff] }
 0x102   : > { %v4126_v16 = vunpack.i.l.bf16 %v4125_v39  ;;  %v4127_v49 = vunpack.i.h.bf16 %v4125_v39 }
 0x104   : > { %v4140_v54 = vpop.permute.xlu1 %4139  ;;  %v1688_v26 = vsel %vm1671_vm4, %v1655_v60, %v4126_v16  ;;  %v1689_v10 = vsel %vm1671_vm4, %v1656_v13, %v4127_v49 }
 0x105   : > { %v4141_v56 = vunpack.i.l.bf16 %v4140_v54  ;;  %v4135_v31 = vpop.permute.xlu0 %4134  ;;  %v4142_v62 = vunpack.i.h.bf16 %v4140_v54  ;;  %v1721_v1 = vsel %vm1704_vm5, %v1688_v26, %v4131_v42  ;;  %v1722_v18 = vsel %vm1704_vm5, %v1689_v10, %v4132_v9  ;;  %v374_v26 = vld [vmem:[%s4602_s26 + $0xf8] sm:$0xff] }
 0x106   : > { %v4136_v34 = vunpack.i.l.bf16 %v4135_v31  ;;  %v4137_v48 = vunpack.i.h.bf16 %v4135_v31 }
 0x107   : > { %v1558_v45 = vsel %vm1539_vm0, %v371_v57, %v4141_v56  ;;  %v1559_v19 = vsel %vm1539_vm0, %v372_v28, %v4142_v62 }
 0x108   : > { %v4150_v6 = vpop.permute.xlu1 %4149  ;;  %v1754_v14 = vsel %vm1737_vm6, %v1721_v1, %v4136_v34  ;;  %v1755_v21 = vsel %vm1737_vm6, %v1722_v18, %v4137_v48 }
 0x109   : > { %v4145_v15 = vpop.permute.xlu0 %4144  ;;  %2036 = vmatmul.mubr.f32.gmra.mrb[32].mxu0 %v1754_v14  ;;  %v4151_v5 = vunpack.i.l.bf16 %v4150_v6  ;;  %v4152_v7 = vunpack.i.h.bf16 %v4150_v6 }
 0x10a   : > { %v4147_v23 = vunpack.i.h.bf16 %v4145_v15  ;;  %v4146_v50 = vunpack.i.l.bf16 %v4145_v15  ;;  %3561 = vmatprep.mubr.msk.f32.mxu0 %vm1539_vm0, %v3528_v8 }
 0x10c   : > { %v1591_v58 = vsel %vm1572_vm1, %v1558_v45, %v4146_v50  ;;  %v4160_v52 = vpop.permute.xlu1 %4159  ;;  %v1592_v25 = vsel %vm1572_vm1, %v1559_v19, %v4147_v23 }
 0x10d   : > { %v4155_v24 = vpop.permute.xlu0 %4154  ;;  %2041 = vmatmul.mubr.f32.gmra.mrb[34].mxu0 %v1755_v21  ;;  %v4161_v61 = vunpack.i.l.bf16 %v4160_v52  ;;  %v1624_v43 = vsel %vm1605_vm2, %v1591_v58, %v4151_v5  ;;  %v4162_v27 = vunpack.i.h.bf16 %v4160_v52  ;;  %v1625_v33 = vsel %vm1605_vm2, %v1592_v25, %v4152_v7 }
 0x10e   : > { %v4157_v29 = vunpack.i.h.bf16 %v4155_v24  ;;  %v4156_v46 = vunpack.i.l.bf16 %v4155_v24  ;;  %3562 = vmatprep.mubr.msk.f32.mxu0 %vm1539_vm0, %v4900_v51 }
 0x110   : > { %v1657_v32 = vsel %vm1638_vm3, %v1624_v43, %v4156_v46  ;;  %v4170_v59 = vpop.permute.xlu1 %4169  ;;  %v1658_v17 = vsel %vm1638_vm3, %v1625_v33, %v4157_v29 }
 0x111   : > { %v4171_v63 = vunpack.i.l.bf16 %v4170_v59  ;;  %v4165_v4 = vpop.permute.xlu0 %4164  ;;  %v1690_v38 = vsel %vm1671_vm4, %v1657_v32, %v4161_v61  ;;  %v4172_v39 = vunpack.i.h.bf16 %v4170_v59  ;;  %v1691_v42 = vsel %vm1671_vm4, %v1658_v17, %v4162_v27  ;;  %v375_v17 = vld [vmem:[%s4602_s26 + $0x108] sm:$0xff] }
 0x112   : > { %v4167_v37 = vunpack.i.h.bf16 %v4165_v4  ;;  %v4166_v20 = vunpack.i.l.bf16 %v4165_v4 }
 0x114   : > { %v4180_v51 = vpop.permute.xlu1 %4179  ;;  %v1723_v12 = vsel %vm1704_vm5, %v1690_v38, %v4166_v20  ;;  %v1724_v44 = vsel %vm1704_vm5, %v1691_v42, %v4167_v37  ;;  %v378_v37 = vld [vmem:[%s4602_s26 + $0x128] sm:$0xff] }
 0x115   : > { %v4175_v16 = vpop.permute.xlu0 %4174  ;;  %v1756_v41 = vsel %vm1737_vm6, %v1723_v12, %v4171_v63  ;;  %v4181_v49 = vunpack.i.l.bf16 %v4180_v51  ;;  %v1757_v34 = vsel %vm1737_vm6, %v1724_v44, %v4172_v39  ;;  %v4182_v9 = vunpack.i.h.bf16 %v4180_v51 }
 0x116   : > { %v4176_v60 = vunpack.i.l.bf16 %v4175_v16  ;;  %2046 = vmatmul.mubr.f32.gmra.mrb[36].mxu0 %v1756_v41  ;;  %v4177_v54 = vunpack.i.h.bf16 %v4175_v16 }
 0x117   : > { %3563 = vmatprep.mubr.msk.f32.mxu0 %vm1539_vm0, %v4903_v53 }
 0x118   : > { %v1560_v56 = vsel %vm1539_vm0, %v373_v40, %v4176_v60  ;;  %v4190_v31 = vpop.permute.xlu1 %4189  ;;  %v1561_v1 = vsel %vm1539_vm0, %v374_v26, %v4177_v54 }
 0x119   : > { %v4185_v57 = vpop.permute.xlu0 %4184  ;;  %v4191_v8 = vunpack.i.l.bf16 %v4190_v31  ;;  %v1593_v28 = vsel %vm1572_vm1, %v1560_v56, %v4181_v49  ;;  %v4192_v14 = vunpack.i.h.bf16 %v4190_v31  ;;  %v1594_v10 = vsel %vm1572_vm1, %v1561_v1, %v4182_v9 }
 0x11a   : > { %v4186_v62 = vunpack.i.l.bf16 %v4185_v57  ;;  %2051 = vmatmul.mubr.f32.gmra.mrb[38].mxu0 %v1757_v34  ;;  %v4187_v13 = vunpack.i.h.bf16 %v4185_v57 }
 0x11b   : > { %3564 = vmatprep.mubr.msk.f32.mxu0 %vm1539_vm0, %v4969_v0 }
 0x11c   : > { %v1626_v53 = vsel %vm1605_vm2, %v1593_v28, %v4186_v62  ;;  %v4200_v48 = vpop.permute.xlu1 %4199  ;;  %v1627_v23 = vsel %vm1605_vm2, %v1594_v10, %v4187_v13 }
 0x11d   : > { %v4195_v6 = vpop.permute.xlu0 %4194  ;;  %v4201_v45 = vunpack.i.l.bf16 %v4200_v48  ;;  %v1659_v19 = vsel %vm1638_vm3, %v1626_v53, %v4191_v8  ;;  %v4202_v0 = vunpack.i.h.bf16 %v4200_v48  ;;  %v1660_v7 = vsel %vm1638_vm3, %v1627_v23, %v4192_v14 }
 0x11e   : > { %v4196_v15 = vunpack.i.l.bf16 %v4195_v6  ;;  %v4197_v50 = vunpack.i.h.bf16 %v4195_v6 }
 0x120   : > { %v4210_v5 = vpop.permute.xlu1 %4209  ;;  %v1692_v18 = vsel %vm1671_vm4, %v1659_v19, %v4196_v15  ;;  %v1693_v29 = vsel %vm1671_vm4, %v1660_v7, %v4197_v50  ;;  %v376_v15 = vld [vmem:[%s4602_s26 + $0x110] sm:$0xff] }
 0x121   : > { %v4211_v58 = vunpack.i.l.bf16 %v4210_v5  ;;  %v4205_v52 = vpop.permute.xlu0 %4204  ;;  %v1725_v21 = vsel %vm1704_vm5, %v1692_v18, %v4201_v45  ;;  %v4212_v24 = vunpack.i.h.bf16 %v4210_v5  ;;  %v1726_v43 = vsel %vm1704_vm5, %v1693_v29, %v4202_v0  ;;  %v3534_v45 = vld [vmem:[%s4602_s26 + $0x142] sm:$0xff] }
 0x122   : > { %v4207_v33 = vunpack.i.h.bf16 %v4205_v52  ;;  %v4206_v63 = vunpack.i.l.bf16 %v4205_v52 }
 0x123   : > { %v1758_v25 = vsel %vm1737_vm6, %v1725_v21, %v4211_v58  ;;  %v1759_v32 = vsel %vm1737_vm6, %v1726_v43, %v4212_v24 }
 0x124   : > { %v4220_v46 = vpop.permute.xlu1 %4219  ;;  %2056 = vmatmul.mubr.f32.gmra.mrb[40].mxu0 %v1758_v25  ;;  %v1565_v12 = vsel %vm1539_vm0, %v378_v37, %v4206_v63 }
 0x125   : > { %v4215_v61 = vpop.permute.xlu0 %4214  ;;  %3565 = vmatprep.mubr.msk.f32.mxu0 %vm1539_vm0, %v4932_v22  ;;  %v1562_v22 = vsel %vm1539_vm0, %v375_v17, %v4207_v33  ;;  %v4222_v39 = vunpack.i.h.bf16 %v4220_v46  ;;  %v4221_v16 = vunpack.i.l.bf16 %v4220_v46 }
 0x126   : > { %v4217_v20 = vunpack.i.h.bf16 %v4215_v61  ;;  %v4216_v38 = vunpack.i.l.bf16 %v4215_v61 }
 0x128   : > { %v4230_v59 = vpop.permute.xlu1 %4229  ;;  %2061 = vmatmul.mubr.f32.gmra.mrb[42].mxu0 %v1759_v32  ;;  %v1595_v41 = vsel %vm1572_vm1, %v1562_v22, %v4217_v20  ;;  %v1598_v42 = vsel %vm1572_vm1, %v1565_v12, %v4216_v38 }
 0x129   : > { %v4225_v27 = vpop.permute.xlu0 %4224  ;;  %3566 = vmatprep.mubr.msk.f32.mxu0 %vm1539_vm0, %v4964_v55  ;;  %v1628_v31 = vsel %vm1605_vm2, %v1595_v41, %v4222_v39  ;;  %v1631_v57 = vsel %vm1605_vm2, %v1598_v42, %v4221_v16  ;;  %v4232_v48 = vunpack.i.h.bf16 %v4230_v59  ;;  %v4231_v6 = vunpack.i.l.bf16 %v4230_v59  ;;  %v3535_v16 = vld [vmem:[%s4602_s26 + $0x152] sm:$0xff] }
 0x12a   : > { %v4227_v55 = vunpack.i.h.bf16 %v4225_v27  ;;  %v4226_v60 = vunpack.i.l.bf16 %v4225_v27 }
 0x12b   : > { %v1563_v52 = vsel %vm1539_vm0, %v376_v15, %v4232_v48  ;;  %v1566_v0 = vsel %vm1539_vm0, %v4993_v11, %v4231_v6 }
 0x12c   : > { %v4240_v4 = vpop.permute.xlu1 %4239  ;;  %v1661_v9 = vsel %vm1638_vm3, %v1628_v31, %v4227_v55  ;;  %v1664_v62 = vsel %vm1638_vm3, %v1631_v57, %v4226_v60  ;;  %v380_v31 = vld [vmem:[%s4602_s26 + $0x140] sm:$0xff] }
 0x12d   : > { %v4235_v51 = vpop.permute.xlu0 %4234  ;;  %v4242_v18 = vunpack.i.h.bf16 %v4240_v4  ;;  %v4241_v58 = vunpack.i.l.bf16 %v4240_v4 }
 0x12e   : > { %v4237_v49 = vunpack.i.h.bf16 %v4235_v51  ;;  %v4236_v54 = vunpack.i.l.bf16 %v4235_v51 }
 0x12f   : > { %v1596_v32 = vsel %vm1572_vm1, %v1563_v52, %v4242_v18  ;;  %v1599_v59 = vsel %vm1572_vm1, %v1566_v0, %v4241_v58 }
 0x130   : > { %v4250_v40 = vpop.permute.xlu1 %4249  ;;  %v1694_v28 = vsel %vm1671_vm4, %v1661_v9, %v4237_v49  ;;  %v1697_v53 = vsel %vm1671_vm4, %v1664_v62, %v4236_v54 }
 0x131   : > { %v4245_v44 = vpop.permute.xlu0 %4244  ;;  %v4252_v21 = vunpack.i.h.bf16 %v4250_v40  ;;  %v4251_v7 = vunpack.i.l.bf16 %v4250_v40 }
 0x132   : > { %v4247_v26 = vunpack.i.h.bf16 %v4245_v44  ;;  %v4246_v56 = vunpack.i.l.bf16 %v4245_v44 }
 0x133   : > { %v1629_v33 = vsel %vm1605_vm2, %v1596_v32, %v4252_v21  ;;  %v1632_v63 = vsel %vm1605_vm2, %v1599_v59, %v4251_v7 }
 0x134   : > { %v4260_v34 = vpop.permute.xlu1 %4259  ;;  %v1727_v14 = vsel %vm1704_vm5, %v1694_v28, %v4247_v26  ;;  %v1730_v10 = vsel %vm1704_vm5, %v1697_v53, %v4246_v56  ;;  %v377_v26 = vld [vmem:[%s4602_s26 + $0x120] sm:$0xff] }
 0x135   : > { %v4255_v1 = vpop.permute.xlu0 %4254  ;;  %v4262_v24 = vunpack.i.h.bf16 %v4260_v34  ;;  %v4261_v25 = vunpack.i.l.bf16 %v4260_v34 }
 0x136   : > { %v4257_v8 = vunpack.i.h.bf16 %v4255_v1  ;;  %v4256_v13 = vunpack.i.l.bf16 %v4255_v1 }
 0x137   : > { %v1662_v11 = vsel %vm1638_vm3, %v1629_v33, %v4262_v24  ;;  %v1665_v4 = vsel %vm1638_vm3, %v1632_v63, %v4261_v25 }
 0x138   : > { %v4270_v23 = vpop.permute.xlu1 %4269  ;;  %v1760_v50 = vsel %vm1737_vm6, %v1727_v14, %v4257_v8  ;;  %v1763_v19 = vsel %vm1737_vm6, %v1730_v10, %v4256_v13  ;;  %v381_v14 = vld [vmem:[%s4602_s26 + $0x150] sm:$0xff] }
 0x139   : > { %v4265_v5 = vpop.permute.xlu0 %4264  ;;  %2066 = vmatmul.mubr.f32.gmra.mrb[44].mxu0 %v1760_v50  ;;  %2081 = vmatmul.mubr.f32.vlgmr.msra.gmra.mrb[0].mxu1 %v1763_v19  ;;  %v4272_v46 = vunpack.i.h.bf16 %v4270_v23  ;;  %v4271_v61 = vunpack.i.l.bf16 %v4270_v23 }
 0x13a   : > { %3567 = vmatprep.mubr.msk.f32.mxu0 %vm1539_vm0, %v3534_v45  ;;  %3570 = vmatprep.mubr.msk.f32.mxu1 %vm1539_vm0, %v5122_v35  ;;  %v4267_v44 = vunpack.i.h.bf16 %v4265_v5  ;;  %v4266_v54 = vunpack.i.l.bf16 %v4265_v5 }
 0x13b   : > { %v1695_v51 = vsel %vm1671_vm4, %v1662_v11, %v4272_v46  ;;  %v1698_v22 = vsel %vm1671_vm4, %v1665_v4, %v4271_v61 }
 0x13c   : > { %v4280_v29 = vpop.permute.xlu1 %4279  ;;  %v1564_v8 = vsel %vm1539_vm0, %v377_v26, %v4267_v44  ;;  %v1567_v48 = vsel %vm1539_vm0, %v380_v31, %v4266_v54  ;;  %v383_v54 = vld [vmem:[%s4602_s26 + $0x168] sm:$0xff] }
 0x13d   : > { %v4275_v43 = vpop.permute.xlu0 %4274  ;;  %v4282_v27 = vunpack.i.h.bf16 %v4280_v29  ;;  %v4281_v35 = vunpack.i.l.bf16 %v4280_v29 }
 0x13e   : > { %v4277_v56 = vunpack.i.h.bf16 %v4275_v43  ;;  %v4276_v57 = vunpack.i.l.bf16 %v4275_v43  ;;  %v382_v43 = vld [vmem:[%s4602_s26 + $0x158] sm:$0xff] }
 0x13f   : > { %v1728_v12 = vsel %vm1704_vm5, %v1695_v51, %v4282_v27  ;;  %v1731_v39 = vsel %vm1704_vm5, %v1698_v22, %v4281_v35 }
 0x140   : > { %v4290_v17 = vpop.permute.xlu1 %4289  ;;  %v1597_v6 = vsel %vm1572_vm1, %v1564_v8, %v4277_v56  ;;  %v1600_v45 = vsel %vm1572_vm1, %v1567_v48, %v4276_v57 }
 0x141   : > { %v4292_v37 = vunpack.i.h.bf16 %v4290_v17  ;;  %v4291_v20 = vunpack.i.l.bf16 %v4290_v17  ;;  %v4285_v38 = vpop.permute.xlu0 %4284 }
 0x142   : > { %v4287_v34 = vunpack.i.h.bf16 %v4285_v38  ;;  %v4286_v9 = vunpack.i.l.bf16 %v4285_v38 }
 0x143   : > { %v1761_v40 = vsel %vm1737_vm6, %v1728_v12, %v4292_v37  ;;  %v1764_v41 = vsel %vm1737_vm6, %v1731_v39, %v4291_v20 }
 0x144   : > { %v4300_v42 = vpop.permute.xlu1 %4299  ;;  %2071 = vmatmul.mubr.f32.gmra.mrb[46].mxu0 %v1761_v40  ;;  %2086 = vmatmul.mubr.f32.gmra.mrb[2].mxu1 %v1764_v41  ;;  %v1630_v15 = vsel %vm1605_vm2, %v1597_v6, %v4287_v34  ;;  %v1633_v19 = vsel %vm1605_vm2, %v1600_v45, %v4286_v9 }
 0x145   : > { %v4295_v55 = vpop.permute.xlu0 %4294  ;;  %3568 = vmatprep.mubr.msk.f32.mxu0 %vm1539_vm0, %v3535_v16  ;;  %3571 = vmatprep.mubr.msk.f32.mxu1 %vm1539_vm0, %v5125_v47  ;;  %v4301_v13 = vunpack.i.l.bf16 %v4300_v42  ;;  %v4302_v5 = vunpack.i.h.bf16 %v4300_v42 }
 0x146   : > { %v4297_v62 = vunpack.i.h.bf16 %v4295_v55  ;;  %v4296_v28 = vunpack.i.l.bf16 %v4295_v55 }
 0x147   : > { %v1568_v52 = vsel %vm1539_vm0, %v381_v14, %v4301_v13  ;;  %v1569_v37 = vsel %vm1539_vm0, %v382_v43, %v4302_v5 }
 0x148   : > { %v5305_v60 = vpop.permute.xlu1 %4309  ;;  %v1663_v18 = vsel %vm1638_vm3, %v1630_v15, %v4297_v62  ;;  %v1666_v0 = vsel %vm1638_vm3, %v1633_v19, %v4296_v28 }
 0x149   : > { %v4305_v49 = vpop.permute.xlu0 %4304  ;;  %v4311_v21 = vunpack.i.l.bf16 %v5305_v60  ;;  %v4312_v11 = vunpack.i.h.bf16 %v5305_v60 }
 0x14a   : > { %v4307_v53 = vunpack.i.h.bf16 %v4305_v49  ;;  %v4306_v10 = vunpack.i.l.bf16 %v4305_v49 }
 0x14b   : > { %v1601_v4 = vsel %vm1572_vm1, %v1568_v52, %v4311_v21  ;;  %v1602_v42 = vsel %vm1572_vm1, %v1569_v37, %v4312_v11 }
 0x14c   : > { %v4320_v1 = vpop.permute.xlu1 %4319  ;;  %v1696_v24 = vsel %vm1671_vm4, %v1663_v18, %v4307_v53  ;;  %v1699_v61 = vsel %vm1671_vm4, %v1666_v0, %v4306_v10 }
 0x14d   : > { %v4315_v47 = vpop.permute.xlu0 %4314  ;;  %v4321_v25 = vunpack.i.l.bf16 %v4320_v1  ;;  %v4322_v20 = vunpack.i.h.bf16 %v4320_v1 }
 0x14e   : > { %v4317_v23 = vunpack.i.h.bf16 %v4315_v47  ;;  %v4316_v50 = vunpack.i.l.bf16 %v4315_v47  ;;  %v3541_v47 = vld [vmem:[%s4602_s26 + $0x19a] sm:$0xff] }
 0x14f   : > { %v1634_v38 = vsel %vm1605_vm2, %v1601_v4, %v4321_v25  ;;  %v1635_v44 = vsel %vm1605_vm2, %v1602_v42, %v4322_v20 }
 0x150   : > { %v4330_v58 = vpop.permute.xlu1 %4329  ;;  %v1729_v59 = vsel %vm1704_vm5, %v1696_v24, %v4317_v23  ;;  %v1732_v27 = vsel %vm1704_vm5, %v1699_v61, %v4316_v50 }
 0x151   : > { %v4325_v7 = vpop.permute.xlu0 %4324  ;;  %v4331_v32 = vunpack.i.l.bf16 %v4330_v58  ;;  %v4332_v22 = vunpack.i.h.bf16 %v4330_v58 }
 0x152   : > { %v4327_v29 = vunpack.i.h.bf16 %v4325_v7  ;;  %v4326_v46 = vunpack.i.l.bf16 %v4325_v7  ;;  %v3542_v7 = vld [vmem:[%s4602_s26 + $0x1a2] sm:$0xff] }
 0x153   : > { %v1667_v12 = vsel %vm1638_vm3, %v1634_v38, %v4331_v32  ;;  %v1668_v26 = vsel %vm1638_vm3, %v1635_v44, %v4332_v22 }
 0x154   : > { %v1762_v35 = vsel %vm1737_vm6, %v1729_v59, %v4327_v29  ;;  %v1765_v33 = vsel %vm1737_vm6, %v1732_v27, %v4326_v46  ;;  %v4340_v63 = vpop.permute.xlu1 %4339 }
 0x155   : > { %v4335_v17 = vpop.permute.xlu0 %4334  ;;  %2076 = vmatmul.mubr.f32.gmra.mrb[48].mxu0 %v1762_v35  ;;  %2091 = vmatmul.mubr.f32.gmra.mrb[4].mxu1 %v1765_v33  ;;  %v4341_v39 = vunpack.i.l.bf16 %v4340_v63 }
 0x156   : > { %v4336_v51 = vunpack.i.l.bf16 %v4335_v17  ;;  %3572 = vmatprep.mubr.msk.f32.mxu1 %vm1539_vm0, %v5159_v30  ;;  %v4337_v16 = vunpack.i.h.bf16 %v4335_v17  ;;  %v4342_v30 = vunpack.i.h.bf16 %v4340_v63 }
 0x158   : > { %v4350_v40 = vpop.permute.xlu1 %4349  ;;  %v1700_v41 = vsel %vm1671_vm4, %v1667_v12, %v4336_v51  ;;  %v1701_v9 = vsel %vm1671_vm4, %v1668_v26, %v4337_v16 }
 0x159   : > { %v4345_v55 = vpop.permute.xlu0 %4344  ;;  %v4351_v60 = vunpack.i.l.bf16 %v4350_v40  ;;  %v1733_v56 = vsel %vm1704_vm5, %v1700_v41, %v4341_v39  ;;  %v4352_v8 = vunpack.i.h.bf16 %v4350_v40  ;;  %v1734_v53 = vsel %vm1704_vm5, %v1701_v9, %v4342_v30  ;;  %v2185_v30 = vld [vmem:[%s6386_s5] sm:$0xff] }
 0x15a   : > { %v4346_v49 = vunpack.i.l.bf16 %v4345_v55  ;;  %v4347_v31 = vunpack.i.h.bf16 %v4345_v55 }
 0x15b   : > { %v1570_v62 = vsel %vm1539_vm0, %v383_v54, %v4351_v60  ;;  %v1571_v15 = vsel %vm1539_vm0, %v5094_v2, %v4352_v8 }
 0x15c   : > { %v1766_v57 = vsel %vm1737_vm6, %v1733_v56, %v4346_v49  ;;  %v4360_v34 = vpop.permute.xlu1 %4359  ;;  %v1767_v6 = vsel %vm1737_vm6, %v1734_v53, %v4347_v31  ;;  %v2186_v56 = vld [vmem:[%s6386_s5 + $0x8] sm:$0xff]  ;;  %v4515_v53 = vmov 0.0  }
 0x15d   : > { %v4355_v1 = vpop.permute.xlu0 %4354  ;;  %2096 = vmatmul.mubr.f32.gmra.mrb[6].mxu1 %v1766_v57  ;;  %v4361_v28 = vunpack.i.l.bf16 %v4360_v34  ;;  %v4362_v50 = vunpack.i.h.bf16 %v4360_v34  ;;  %v5373_v31 = vpack.c.bf16 %v2186_v56, %v2185_v30 }
 0x15e   : > { %v4356_v13 = vunpack.i.l.bf16 %v4355_v1  ;;  %3573 = vmatprep.mubr.msk.f32.mxu1 %vm1539_vm0, %v5186_v36  ;;  %v4357_v10 = vunpack.i.h.bf16 %v4355_v1 }
 0x15f   : > { %3782 = vmatpush3.bf16.msra.mxu1 %v5373_v31 }
 0x160   : > { %v1603_v48 = vsel %vm1572_vm1, %v1570_v62, %v4356_v13  ;;  %v1248_v14 = vpop.permute.xlu1 %1247  ;;  %v1604_v18 = vsel %vm1572_vm1, %v1571_v15, %v4357_v10  ;;  %3783 = vmatprep.subr.bf16.mxu1 %v4506_v3 }
 0x161   : > { %v4365_v45 = vpop.permute.xlu0 %4364  ;;  %2101 = vmatmul.mubr.f32.gmra.mrb[8].mxu1 %v1767_v6  ;;  %v1636_v36 = vsel %vm1605_vm2, %v1603_v48, %v4361_v28  ;;  %v1637_v24 = vsel %vm1605_vm2, %v1604_v18, %v4362_v50  ;;  %v5392_v50 = vld [vmem:[%s6383_s2] ss:$0 sm:$0xff] }
 0x162   : > { %v4366_v23 = vunpack.i.l.bf16 %v4365_v45  ;;  %3574 = vmatprep.mubr.msk.f32.mxu1 %vm1539_vm0, %v3541_v47  ;;  %v4367_v58 = vunpack.i.h.bf16 %v4365_v45 }
 0x164   : > { %v1669_v19 = vsel %vm1638_vm3, %v1636_v36, %v4366_v23  ;;  %v1504_v5 = vpop.permute.xlu1 %1503  ;;  %v1670_v29 = vsel %vm1638_vm3, %v1637_v24, %v4367_v58 }
 0x165   : > { %v1702_v52 = vsel %vm1671_vm4, %v1669_v19, %v1248_v14  ;;  %v1376_v0 = vpop.permute.xlu0 %1375 }
 0x166   : > { %v1735_v21 = vsel %vm1704_vm5, %v1702_v52, %v1376_v0 }
 0x167   : > { %v1768_v2 = vsel %vm1737_vm6, %v1735_v21, %v1504_v5 }
 0x168   : > { %2106 = vmatmul.mubr.f32.gmra.mrb[10].mxu1 %v1768_v2  ;;  %v1378_v61 = vpop.permute.xlu1 %1377 }
 0x169   : > { %v1250_v25 = vpop.permute.xlu0 %1249  ;;  %3575 = vmatprep.mubr.msk.f32.mxu1 %vm1539_vm0, %v3542_v7 }
 0x16a   : > { %v1703_v46 = vsel %vm1671_vm4, %v1670_v29, %v1250_v25 }
 0x16b   : > { %v1736_v32 = vsel %vm1704_vm5, %v1703_v46, %v1378_v61 }
 0x16c   : > { %v1957_v43 = vpop.f32.mrb[0].mxu0 }
 0x16d   : > { %v1506_v59 = vpop.permute.xlu0 %1505  ;;  %v1959_v27 = vpop.f32.mrb[1].mxu0  ;;  %v5400_v58 = vadd.f32 %v5392_v50, %v1957_v43 }
 0x16e   : > { %v1769_v35 = vsel %vm1737_vm6, %v1736_v32, %v1506_v59 }
 0x16f   : > { %2111 = vmatmul.mubr.f32.gmra.mrb[12].mxu1 %v1769_v35  ;;  %v2116_v7 = vsel %vm1539_vm0, %v5400_v58, 0.0 }
 0x170   : > { %v1962_v33 = vpop.f32.mrb[2].mxu0  ;;  %3693 = vmatprep.mubr.msk.f32.mxu1 %vm4514_vm7, %v4515_v53 }
 0x171   : > { %v1964_v63 = vpop.f32.mrb[3].mxu0  ;;  %v5395_v19 = vadd.f32 %v5392_v50, %v1962_v33 }
 0x173   : > { %v2117_v0 = vsel %vm1539_vm0, %v5395_v19, 0.0 }
 0x174   : > { %v2118_v25 = vadd.f32 %v2117_v0, %v2116_v7 }
 0x179   : > { %v1967_v11 = vpop.f32.mrb[4].mxu0 }
 0x17a   : > { %v1969_v4 = vpop.f32.mrb[5].mxu0  ;;  %v5403_v52 = vadd.f32 %v5392_v50, %v1967_v11 }
 0x17c   : > { %v2119_v2 = vsel %vm1539_vm0, %v5403_v52, 0.0 }
 0x17d   : > { %v1972_v17 = vpop.f32.mrb[6].mxu0  ;;  %v2120_v61 = vadd.f32 %v2119_v2, %v2118_v25 }
 0x17e   : > { %v1974_v37 = vpop.f32.mrb[7].mxu0  ;;  %v5408_v21 = vadd.f32 %v5392_v50, %v1972_v17 }
 0x180   : > { %v2121_v29 = vsel %vm1539_vm0, %v5408_v21, 0.0 }
 0x181   : > { %v2122_v59 = vadd.f32 %v2121_v29, %v2120_v61 }
 0x188   : > { %v1977_v20 = vpop.f32.mrb[8].mxu0 }
 0x189   : > { %v1979_v38 = vpop.f32.mrb[9].mxu0  ;;  %v5415_v24 = vadd.f32 %v5392_v50, %v1977_v20 }
 0x18b   : > { %v2123_v43 = vsel %vm1539_vm0, %v5415_v24, 0.0 }
 0x18c   : > { %v1982_v51 = vpop.f32.mrb[10].mxu0  ;;  %v2124_v33 = vadd.f32 %v2123_v43, %v2122_v59 }
 0x18d   : > { %v1984_v22 = vpop.f32.mrb[11].mxu0  ;;  %v5420_v46 = vadd.f32 %v5392_v50, %v1982_v51 }
 0x18f   : > { %v2125_v27 = vsel %vm1539_vm0, %v5420_v46, 0.0 }
 0x190   : > { %v2126_v4 = vadd.f32 %v2125_v27, %v2124_v33 }
 0x195   : > { %v1987_v12 = vpop.f32.mrb[12].mxu0 }
 0x196   : > { %v1989_v39 = vpop.f32.mrb[13].mxu0  ;;  %v5425_v32 = vadd.f32 %v5392_v50, %v1987_v12 }
 0x198   : > { %v2127_v63 = vsel %vm1539_vm0, %v5425_v32, 0.0 }
 0x199   : > { %v1992_v16 = vpop.f32.mrb[14].mxu0  ;;  %v2128_v20 = vadd.f32 %v2127_v63, %v2126_v4 }
 0x19a   : > { %v1994_v40 = vpop.f32.mrb[15].mxu0  ;;  %v5430_v35 = vadd.f32 %v5392_v50, %v1992_v16 }
 0x19c   : > { %v2129_v17 = vsel %vm1539_vm0, %v5430_v35, 0.0 }
 0x19d   : > { %v2130_v40 = vadd.f32 %v2129_v17, %v2128_v20 }
 0x1a4   : > { %v1997_v41 = vpop.f32.mrb[16].mxu0 }
 0x1a5   : > { %v1999_v42 = vpop.f32.mrb[17].mxu0  ;;  %v5435_v11 = vadd.f32 %v5392_v50, %v1997_v41 }
 0x1a7   : > { %v2131_v22 = vsel %vm1539_vm0, %v5435_v11, 0.0 }
 0x1a8   : > { %v2002_v55 = vpop.f32.mrb[18].mxu0 }
 0x1a9   : > { %v2004_v60 = vpop.f32.mrb[19].mxu0  ;;  %v5440_v37 = vadd.f32 %v5392_v50, %v2002_v55  ;;  %v2132_v55 = vadd.f32 %v2131_v22, %v2130_v40 }
 0x1ab   : > { %v2133_v41 = vsel %vm1539_vm0, %v5440_v37, 0.0 }
 0x1b1   : > { %v2007_v44 = vpop.f32.mrb[20].mxu0 }
 0x1b2   : > { %v2009_v49 = vpop.f32.mrb[21].mxu0  ;;  %v5445_v12 = vadd.f32 %v5392_v50, %v2007_v44 }
 0x1b4   : > { %v2135_v60 = vsel %vm1539_vm0, %v5445_v12, 0.0 }
 0x1b5   : > { %v5365_v54 = vpop.f32.mrb[22].mxu0 }
 0x1b6   : > { %v2014_v26 = vpop.f32.mrb[23].mxu0  ;;  %v5451_v42 = vadd.f32 %v5392_v50, %v5365_v54 }
 0x1b7   : > { %v2134_v26 = vadd.f32 %v2133_v41, %v2132_v55 }
 0x1b8   : > { %v2137_v44 = vsel %vm1539_vm0, %v5451_v42, 0.0 }
 0x1b9   : > { %v2136_v56 = vadd.f32 %v2135_v60, %v2134_v26 }
 0x1c0   : > { %v2017_v57 = vpop.f32.mrb[24].mxu0 }
 0x1c1   : > { %v2019_v34 = vpop.f32.mrb[25].mxu0  ;;  %v5456_v49 = vadd.f32 %v5392_v50, %v2017_v57 }
 0x1c3   : > { %v2139_v34 = vsel %vm1539_vm0, %v5456_v49, 0.0 }
 0x1c4   : > { %v2022_v9 = vpop.f32.mrb[26].mxu0 }
 0x1c5   : > { %v2024_v62 = vpop.f32.mrb[27].mxu0  ;;  %v5461_v30 = vadd.f32 %v5392_v50, %v2022_v9 }
 0x1c6   : > { %v2138_v62 = vadd.f32 %v2137_v44, %v2136_v56 }
 0x1cd   : > { %v2027_v1 = vpop.f32.mrb[28].mxu0 }
 0x1ce   : > { %v2029_v8 = vpop.f32.mrb[29].mxu0  ;;  %v5466_v54 = vadd.f32 %v5392_v50, %v2027_v1 }
 0x1cf   : > { %v2141_v8 = vsel %vm1539_vm0, %v5461_v30, 0.0 }
 0x1d1   : > { %v2032_v13 = vpop.f32.mrb[30].mxu0 }
 0x1d2   : > { %v2034_v28 = vpop.f32.mrb[31].mxu0  ;;  %v5471_v57 = vadd.f32 %v5392_v50, %v2032_v13 }
 0x1dc   : > { %v5379_v47 = vpop.f32.mrb[32].mxu0 }
 0x1dd   : > { %v2039_v48 = vpop.f32.mrb[33].mxu0 }
 0x1e0   : > { %v5381_v6 = vpop.f32.mrb[34].mxu0 }
 0x1e1   : > { %v2044_v14 = vpop.f32.mrb[35].mxu0  ;;  %v5483_v13 = vadd.f32 %v5392_v50, %v5381_v6 }
 0x1e2   : > { %v2140_v14 = vadd.f32 %v2139_v34, %v2138_v62 }
 0x1e4   : > { %v2142_v1 = vadd.f32 %v2141_v8, %v2140_v14 }
 0x1e9   : > { %v5383_v3 = vpop.f32.mrb[36].mxu0 }
 0x1ea   : > { %v2049_v10 = vpop.f32.mrb[37].mxu0  ;;  %v5489_v2 = vadd.f32 %v5392_v50, %v5383_v3 }
 0x1ec   : > { %v2151_v6 = vsel %vm1539_vm0, %v5489_v2, 0.0 }
 0x1ed   : > { %v5385_v45 = vpop.f32.mrb[38].mxu0 }
 0x1ee   : > { %v2054_v15 = vpop.f32.mrb[39].mxu0  ;;  %v5495_v29 = vadd.f32 %v5392_v50, %v5385_v45 }
 0x1ef   : > { %v2143_v15 = vsel %vm1539_vm0, %v5466_v54, 0.0 }
 0x1f0   : > { %v2144_v0 = vadd.f32 %v2143_v15, %v2142_v1  ;;  %v2153_v3 = vsel %vm1539_vm0, %v5495_v29, 0.0 }
 0x1f7   : > { %v5387_v23 = vpop.f32.mrb[40].mxu0 }
 0x1f8   : > { %v2059_v36 = vpop.f32.mrb[41].mxu0  ;;  %v5501_v43 = vadd.f32 %v5392_v50, %v5387_v23 }
 0x1f9   : > { %v5477_v36 = vadd.f32 %v5392_v50, %v5379_v47  ;;  %v2149_v47 = vsel %vm1539_vm0, %v5483_v13, 0.0 }
 0x1fa   : > { %v2155_v45 = vsel %vm1539_vm0, %v5501_v43, 0.0 }
 0x1fb   : > { %v5397_v5 = vpop.f32.mrb[42].mxu0  ;;  %v2147_v7 = vsel %vm1539_vm0, %v5477_v36, 0.0 }
 0x1fc   : > { %v2064_v18 = vpop.f32.mrb[43].mxu0  ;;  %v5507_v27 = vadd.f32 %v5392_v50, %v5397_v5 }
 0x1fd   : > { %v2145_v18 = vsel %vm1539_vm0, %v5471_v57, 0.0 }
 0x1fe   : > { %v2146_v25 = vadd.f32 %v2145_v18, %v2144_v0  ;;  %v2157_v23 = vsel %vm1539_vm0, %v5507_v27, 0.0 }
 0x200   : > { %v2148_v61 = vadd.f32 %v2147_v7, %v2146_v25 }
 0x202   : > { %v2150_v59 = vadd.f32 %v2149_v47, %v2148_v61 }
 0x204   : > { %v2152_v33 = vadd.f32 %v2151_v6, %v2150_v59 }
 0x206   : > { %v2154_v4 = vadd.f32 %v2153_v3, %v2152_v33 }
 0x208   : > { %v2156_v20 = vadd.f32 %v2155_v45, %v2154_v4 }
 0x20c   : > { %v2067_v38 = vpop.f32.mrb[44].mxu0  ;;  %v2082_v51 = vpop.f32.mrb[0].mxu1 }
 0x20d   : > { %v2069_v39 = vpop.f32.mrb[45].mxu0  ;;  %v2084_v16 = vpop.f32.mrb[1].mxu1  ;;  %v5512_v63 = vadd.f32 %v5392_v50, %v2067_v38  ;;  %v2158_v38 = vadd.f32 %v2157_v23, %v2156_v20  ;;  %v5529_v56 = vadd.f32 %v5392_v50, %v2082_v51 }
 0x20f   : > { %v2159_v5 = vsel %vm1539_vm0, %v5512_v63, 0.0 }
 0x210   : > { %v2160_v60 = vadd.f32 %v2159_v5, %v2158_v38 }
 0x217   : > { %v2072_v28 = vpop.f32.mrb[46].mxu0  ;;  %v2087_v48 = vpop.f32.mrb[2].mxu1 }
 0x218   : > { %v2074_v10 = vpop.f32.mrb[47].mxu0  ;;  %v2089_v9 = vpop.f32.mrb[3].mxu1  ;;  %v5517_v17 = vadd.f32 %v5392_v50, %v2072_v28  ;;  %v2165_v28 = vsel %vm1539_vm0, %v5529_v56, 0.0  ;;  %v5534_v14 = vadd.f32 %v5392_v50, %v2087_v48 }
 0x21a   : > { %v2161_v55 = vsel %vm1539_vm0, %v5517_v17, 0.0  ;;  %v2167_v1 = vsel %vm1539_vm0, %v5534_v14, 0.0 }
 0x21b   : > { %v2162_v44 = vadd.f32 %v2161_v55, %v2160_v60 }
 0x228   : > { %v2077_v22 = vpop.f32.mrb[48].mxu0  ;;  %v2092_v39 = vpop.f32.mrb[4].mxu1 }
 0x229   : > { %v5522_v16 = vadd.f32 %v5392_v50, %v2077_v22  ;;  %v2079_v40 = vpop.f32.mrb[49].mxu0  ;;  %v2094_v41 = vpop.f32.mrb[5].mxu1  ;;  %v5539_v18 = vadd.f32 %v5392_v50, %v2092_v39 }
 0x22b   : > { %v2163_v26 = vsel %vm1539_vm0, %v5522_v16, 0.0  ;;  %v2169_v7 = vsel %vm1539_vm0, %v5539_v18, 0.0 }
 0x22c   : > { %v2164_v34 = vadd.f32 %v2163_v26, %v2162_v44 }
 0x22e   : > { %v2166_v10 = vadd.f32 %v2165_v28, %v2164_v34  ;;  %v2261_v34 = vlaneseq }
 0x230   : > { %v2097_v62 = vpop.f32.mrb[6].mxu1  ;;  %v2168_v51 = vadd.f32 %v2167_v1, %v2166_v10 }
 0x231   : > { %v2099_v8 = vpop.f32.mrb[7].mxu1  ;;  %v5542_v0 = vadd.f32 %v5392_v50, %v2097_v62 }
 0x232   : > { %v2170_v47 = vadd.f32 %v2169_v7, %v2168_v51  ;;  %v5574_v8 = vshrl.u32 %v2261_v34, 7 }
 0x233   : > { %v2171_v6 = vsel %vm1539_vm0, %v5542_v0, 0.0 }
 0x234   : > { %v2102_v9 = vpop.f32.mrb[8].mxu1  ;;  %v2172_v33 = vadd.f32 %v2171_v6, %v2170_v47 }
 0x235   : > { %v2104_v15 = vpop.f32.mrb[9].mxu1  ;;  %v5547_v25 = vadd.f32 %v5392_v50, %v2102_v9 }
 0x237   : > { %v2173_v3 = vsel %vm1539_vm0, %v5547_v25, 0.0 }
 0x238   : > { %v2174_v4 = vadd.f32 %v2173_v3, %v2172_v33 }
 0x23b   : > { %v2107_v48 = vpop.f32.mrb[10].mxu1 }
 0x23c   : > { %v2109_v61 = vpop.f32.mrb[11].mxu1  ;;  %v5552_v59 = vadd.f32 %v5392_v50, %v2107_v48 }
 0x23e   : > { %v2175_v45 = vsel %vm1539_vm0, %v5552_v59, 0.0 }
 0x23f   : > { %v2176_v39 = vadd.f32 %v2175_v45, %v2174_v4 }
 0x242   : > { %v2112_v23 = vpop.f32.mrb[12].mxu1 }
 0x243   : > { %v5559_v20 = vadd.f32 %v5392_v50, %v2112_v23  ;;  %v2114_v22 = vpop.f32.mrb[13].mxu1  ;;  %v5570_v50 = vld [vmem:[%s6388_s7] sm:$0xf] }
 0x245   : > { %v2177_v5 = vsel %vm1539_vm0, %v5559_v20, 0.0 }
 0x246   : > { %v2178_v40 = vadd.f32 %v2177_v5, %v2176_v39 }
 0x248   : > { %v2179_v41 = vrot.slane %v2178_v40, 4 }
 0x24a   : > { %v2180_v38 = vadd.f32 %v2179_v41, %v2178_v40 }
 0x24c   : > { %v2181_v55 = vrot.slane %v2180_v38, 2 }
 0x24e   : > { %v2182_v60 = vadd.f32 %v2181_v55, %v2180_v38 }
 0x250   : > { %v2183_v26 = vrot.slane %v2182_v60, 1 }
 0x252   : > { %v2184_v44 = vadd.f32 %v2183_v26, %v2182_v60 }
 0x254   : > { %3694 = vmatmul.mubr.msk.f32.vlgmr.msra.gmra.mrb[14].mxu1 %vm1539_vm0, %v2184_v44 }
 0x255   : > { %3785 = vmatpush3.bf16.msra.mxu1 %v5373_v31  ;;  %3700 = vmatprep.mubr.msk.f32.mxu1 %vm4514_vm7, %v4515_v53  ;;  %v2263_v31 = vsub.s32 0, %v5574_v8 }
 0x256   : > { %3703 = vmatprep.subr.msk.mxu1 %vm2942_vm8, %v5570_v50 }
 0x327   : > { %v2256_v62 = vpop.f32.mrb[14].mxu1 }
 0x328   : > { %v3695_v28 = vpop.f32.mrb[15].mxu1  ;;  %v2260_v10 = vmul.f32 0.001953125, %v2256_v62 }
 0x32a   : > { %v5579_v53 = vrot.slane %v2260_v10, %v2263_v31 }
 0x32c   : > { %v5583_v9 = vsub.f32 %v5400_v58, %v5579_v53  ;;  %v5587_v15 = vsub.f32 %v5395_v19, %v5579_v53  ;;  %v5591_v1 = vsub.f32 %v5403_v52, %v5579_v53  ;;  %v5595_v51 = vsub.f32 %v5408_v21, %v5579_v53 }
 0x32d   : > { %v5603_v58 = vsub.f32 %v5415_v24, %v5579_v53  ;;  %v5609_v52 = vsub.f32 %v5420_v46, %v5579_v53  ;;  %v5617_v3 = vsub.f32 %v5425_v32, %v5579_v53  ;;  %v5624_v46 = vsub.f32 %v5430_v35, %v5579_v53 }
 0x32e   : > { %v2297_v7 = vmul.f32 %v5583_v9, %v5583_v9  ;;  %v2298_v48 = vmul.f32 %v5587_v15, %v5587_v15  ;;  %v2299_v19 = vmul.f32 %v5591_v1, %v5591_v1  ;;  %v2300_v21 = vmul.f32 %v5595_v51, %v5595_v51 }
 0x32f   : > { %v2301_v24 = vmul.f32 %v5603_v58, %v5603_v58  ;;  %v2302_v4 = vmul.f32 %v5609_v52, %v5609_v52  ;;  %v5631_v32 = vsub.f32 %v5435_v11, %v5579_v53  ;;  %v2303_v39 = vmul.f32 %v5617_v3, %v5617_v3 }
 0x330   : > { %v2329_v47 = vsel %vm1539_vm0, %v2297_v7, 0.0  ;;  %v2330_v61 = vsel %vm1539_vm0, %v2298_v48, 0.0  ;;  %v2332_v33 = vsel %vm1539_vm0, %v2299_v19, 0.0  ;;  %v2334_v23 = vsel %vm1539_vm0, %v2300_v21, 0.0 }
 0x331   : > { %v2331_v6 = vadd.f32 %v2330_v61, %v2329_v47  ;;  %v2336_v5 = vsel %vm1539_vm0, %v2301_v24, 0.0  ;;  %v5638_v35 = vsub.f32 %v5440_v37, %v5579_v53  ;;  %v2304_v41 = vmul.f32 %v5624_v46, %v5624_v46 }
 0x332   : > { %v2338_v38 = vsel %vm1539_vm0, %v2302_v4, 0.0  ;;  %v5645_v11 = vsub.f32 %v5445_v12, %v5579_v53  ;;  %v2305_v60 = vmul.f32 %v5631_v32, %v5631_v32  ;;  %v2340_v26 = vsel %vm1539_vm0, %v2303_v39, 0.0 }
 0x333   : > { %v2333_v45 = vadd.f32 %v2332_v33, %v2331_v6  ;;  %v5652_v37 = vsub.f32 %v5451_v42, %v5579_v53  ;;  %v2306_v34 = vmul.f32 %v5638_v35, %v5638_v35  ;;  %v2342_v62 = vsel %vm1539_vm0, %v2304_v41, 0.0 }
 0x334   : > { %v5659_v12 = vsub.f32 %v5456_v49, %v5579_v53  ;;  %v2307_v10 = vmul.f32 %v5645_v11, %v5645_v11  ;;  %v2344_v7 = vsel %vm1539_vm0, %v2305_v60, 0.0  ;;  %v5666_v42 = vsub.f32 %v5461_v30, %v5579_v53 }
 0x335   : > { %v2335_v22 = vadd.f32 %v2334_v23, %v2333_v45  ;;  %v2308_v19 = vmul.f32 %v5652_v37, %v5652_v37  ;;  %v2346_v21 = vsel %vm1539_vm0, %v2306_v34, 0.0  ;;  %v5673_v49 = vsub.f32 %v5466_v54, %v5579_v53 }
 0x336   : > { %v2309_v61 = vmul.f32 %v5659_v12, %v5659_v12  ;;  %v2348_v6 = vsel %vm1539_vm0, %v2307_v10, 0.0  ;;  %v5680_v30 = vsub.f32 %v5471_v57, %v5579_v53  ;;  %v2310_v33 = vmul.f32 %v5666_v42, %v5666_v42 }
 0x337   : > { %v2337_v40 = vadd.f32 %v2336_v5, %v2335_v22  ;;  %v2350_v45 = vsel %vm1539_vm0, %v2308_v19, 0.0  ;;  %v5687_v54 = vsub.f32 %v5477_v36, %v5579_v53  ;;  %v2311_v23 = vmul.f32 %v5673_v49, %v5673_v49 }
 0x338   : > { %v2352_v22 = vsel %vm1539_vm0, %v2309_v61, 0.0  ;;  %v5694_v57 = vsub.f32 %v5483_v13, %v5579_v53  ;;  %v2312_v5 = vmul.f32 %v5680_v30, %v5680_v30  ;;  %v5701_v36 = vsub.f32 %v5489_v2, %v5579_v53 }
 0x339   : > { %v2339_v55 = vadd.f32 %v2338_v38, %v2337_v40  ;;  %v2354_v40 = vsel %vm1539_vm0, %v2310_v33, 0.0  ;;  %v2313_v38 = vmul.f32 %v5687_v54, %v5687_v54  ;;  %v5708_v13 = vsub.f32 %v5495_v29, %v5579_v53 }
 0x33a   : > { %v5715_v2 = vsub.f32 %v5501_v43, %v5579_v53  ;;  %v5722_v29 = vsub.f32 %v5507_v27, %v5579_v53  ;;  %v5729_v43 = vsub.f32 %v5512_v63, %v5579_v53  ;;  %v5736_v27 = vsub.f32 %v5517_v17, %v5579_v53 }
 0x33b   : > { %v2341_v44 = vadd.f32 %v2340_v26, %v2339_v55  ;;  %v2356_v55 = vsel %vm1539_vm0, %v2311_v23, 0.0  ;;  %v2314_v26 = vmul.f32 %v5694_v57, %v5694_v57  ;;  %v5743_v63 = vsub.f32 %v5522_v16, %v5579_v53 }
 0x33c   : > { %v5750_v17 = vsub.f32 %v5529_v56, %v5579_v53  ;;  %v5757_v16 = vsub.f32 %v5534_v14, %v5579_v53  ;;  %v5764_v56 = vsub.f32 %v5539_v18, %v5579_v53  ;;  %v5771_v14 = vsub.f32 %v5542_v0, %v5579_v53 }
 0x33d   : > { %v2343_v28 = vadd.f32 %v2342_v62, %v2341_v44  ;;  %v2358_v44 = vsel %vm1539_vm0, %v2312_v5, 0.0  ;;  %v2315_v62 = vmul.f32 %v5701_v36, %v5701_v36  ;;  %v5778_v18 = vsub.f32 %v5547_v25, %v5579_v53 }
 0x33e   : > { %v5785_v0 = vsub.f32 %v5552_v59, %v5579_v53  ;;  %v5792_v25 = vsub.f32 %v5559_v20, %v5579_v53 }
 0x33f   : > { %v2345_v48 = vadd.f32 %v2344_v7, %v2343_v28  ;;  %v2360_v28 = vsel %vm1539_vm0, %v2313_v38, 0.0  ;;  %v2316_v7 = vmul.f32 %v5708_v13, %v5708_v13 }
 0x340   : > { %v2327_v59 = vmul.f32 %v5785_v0, %v5785_v0 }
 0x341   : > { %v2347_v47 = vadd.f32 %v2346_v21, %v2345_v48  ;;  %v2362_v48 = vsel %vm1539_vm0, %v2314_v26, 0.0  ;;  %v2317_v21 = vmul.f32 %v5715_v2, %v5715_v2 }
 0x343   : > { %v2349_v24 = vadd.f32 %v2348_v6, %v2347_v47  ;;  %v2364_v47 = vsel %vm1539_vm0, %v2315_v62, 0.0  ;;  %v2318_v6 = vmul.f32 %v5722_v29, %v5722_v29 }
 0x345   : > { %v2351_v4 = vadd.f32 %v2350_v45, %v2349_v24  ;;  %v2366_v24 = vsel %vm1539_vm0, %v2316_v7, 0.0  ;;  %v2319_v45 = vmul.f32 %v5729_v43, %v5729_v43 }
 0x347   : > { %v2353_v39 = vadd.f32 %v2352_v22, %v2351_v4  ;;  %v2368_v4 = vsel %vm1539_vm0, %v2317_v21, 0.0  ;;  %v2320_v22 = vmul.f32 %v5736_v27, %v5736_v27 }
 0x349   : > { %v2355_v41 = vadd.f32 %v2354_v40, %v2353_v39  ;;  %v2370_v39 = vsel %vm1539_vm0, %v2318_v6, 0.0  ;;  %v2321_v40 = vmul.f32 %v5743_v63, %v5743_v63 }
 0x34b   : > { %v2357_v60 = vadd.f32 %v2356_v55, %v2355_v41  ;;  %v2372_v41 = vsel %vm1539_vm0, %v2319_v45, 0.0  ;;  %v2322_v55 = vmul.f32 %v5750_v17, %v5750_v17  ;;  %v2328_v45 = vmul.f32 %v5792_v25, %v5792_v25 }
 0x34d   : > { %v2359_v34 = vadd.f32 %v2358_v44, %v2357_v60  ;;  %v2374_v60 = vsel %vm1539_vm0, %v2320_v22, 0.0  ;;  %v2323_v44 = vmul.f32 %v5757_v16, %v5757_v16  ;;  %v2390_v22 = vsel %vm1539_vm0, %v2328_v45, 0.0  ;;  %v2829_v45 = vld [vmem:[%s5811_s14 + $0x88] sm:$0xff] }
 0x34f   : > { %v2361_v10 = vadd.f32 %v2360_v28, %v2359_v34  ;;  %v2376_v34 = vsel %vm1539_vm0, %v2321_v40, 0.0  ;;  %v2324_v28 = vmul.f32 %v5764_v56, %v5764_v56 }
 0x351   : > { %v2363_v19 = vadd.f32 %v2362_v48, %v2361_v10  ;;  %v2378_v10 = vsel %vm1539_vm0, %v2322_v55, 0.0  ;;  %v2325_v48 = vmul.f32 %v5771_v14, %v5771_v14 }
 0x353   : > { %v2365_v61 = vadd.f32 %v2364_v47, %v2363_v19  ;;  %v2380_v19 = vsel %vm1539_vm0, %v2323_v44, 0.0  ;;  %v2326_v47 = vmul.f32 %v5778_v18, %v5778_v18  ;;  %v2813_v44 = vld [vmem:[%s5811_s14 + $0x8] sm:$0xff] }
 0x355   : > { %v2367_v33 = vadd.f32 %v2366_v24, %v2365_v61  ;;  %v2382_v61 = vsel %vm1539_vm0, %v2324_v28, 0.0  ;;  %v2384_v24 = vsel %vm1539_vm0, %v2325_v48, 0.0  ;;  %v2386_v20 = vsel %vm1539_vm0, %v2326_v47, 0.0  ;;  %v2816_v28 = vld [vmem:[%s5811_s14 + $0x20] sm:$0xff]  ;;  %v2823_v47 = vld [vmem:[%s5811_s14 + $0x58] sm:$0xff] }
 0x356   : > { %v2820_v48 = vld [vmem:[%s5811_s14 + $0x40] sm:$0xff] }
 0x357   : > { %v2369_v23 = vadd.f32 %v2368_v4, %v2367_v33  ;;  %v2388_v4 = vsel %vm1539_vm0, %v2327_v59, 0.0  ;;  %v2826_v59 = vld [vmem:[%s5811_s14 + $0x70] sm:$0xff] }
 0x359   : > { %v2371_v5 = vadd.f32 %v2370_v39, %v2369_v23 }
 0x35b   : > { %v2373_v38 = vadd.f32 %v2372_v41, %v2371_v5 }
 0x35d   : > { %v2375_v26 = vadd.f32 %v2374_v60, %v2373_v38 }
 0x35f   : > { %v2377_v62 = vadd.f32 %v2376_v34, %v2375_v26  ;;  %v2812_v26 = vld [vmem:[%s5811_s14] sm:$0xff]  ;;  %v2814_v34 = vld [vmem:[%s5811_s14 + $0x10] sm:$0xff] }
 0x361   : > { %v2379_v7 = vadd.f32 %v2378_v10, %v2377_v62  ;;  %v2815_v62 = vld [vmem:[%s5811_s14 + $0x18] sm:$0xff]  ;;  %v2817_v10 = vld [vmem:[%s5811_s14 + $0x28] sm:$0xff] }
 0x363   : > { %v2381_v21 = vadd.f32 %v2380_v19, %v2379_v7  ;;  %v2819_v7 = vld [vmem:[%s5811_s14 + $0x38] sm:$0xff]  ;;  %v2821_v19 = vld [vmem:[%s5811_s14 + $0x48] sm:$0xff] }
 0x365   : > { %v2383_v6 = vadd.f32 %v2382_v61, %v2381_v21  ;;  %v2822_v21 = vld [vmem:[%s5811_s14 + $0x50] sm:$0xff]  ;;  %v2824_v61 = vld [vmem:[%s5811_s14 + $0x60] sm:$0xff] }
 0x367   : > { %v2385_v33 = vadd.f32 %v2384_v24, %v2383_v6  ;;  %v2825_v6 = vld [vmem:[%s5811_s14 + $0x68] sm:$0xff]  ;;  %v2827_v24 = vld [vmem:[%s5811_s14 + $0x78] sm:$0xff] }
 0x369   : > { %v2387_v53 = vadd.f32 %v2386_v20, %v2385_v33  ;;  %v2828_v33 = vld [vmem:[%s5811_s14 + $0x80] sm:$0xff]  ;;  %v2830_v20 = vld [vmem:[%s5811_s14 + $0x90] sm:$0xff] }
 0x36b   : > { %v2389_v23 = vadd.f32 %v2388_v4, %v2387_v53  ;;  %v2831_v53 = vld [vmem:[%s5811_s14 + $0x98] sm:$0xff]  ;;  %v2832_v4 = vld [vmem:[%s5811_s14 + $0xa0] sm:$0xff] }
 0x36d   : > { %v2391_v39 = vadd.f32 %v2390_v22, %v2389_v23  ;;  %v2833_v23 = vld [vmem:[%s5811_s14 + $0xa8] sm:$0xff]  ;;  %v2834_v22 = vld [vmem:[%s5811_s14 + $0xb0] sm:$0xff] }
 0x36f   : > { %v2392_v5 = vrot.slane %v2391_v39, 4 }
 0x371   : > { %v2393_v40 = vadd.f32 %v2392_v5, %v2391_v39  ;;  %v2835_v39 = vld [vmem:[%s5811_s14 + $0xb8] sm:$0xff]  ;;  %v2836_v5 = vld [vmem:[%s5811_s14 + $0xc0] sm:$0xff] }
 0x373   : > { %v2394_v41 = vrot.slane %v2393_v40, 2 }
 0x375   : > { %v2395_v38 = vadd.f32 %v2394_v41, %v2393_v40  ;;  %v2837_v40 = vld [vmem:[%s5811_s14 + $0xc8] sm:$0xff]  ;;  %v2838_v41 = vld [vmem:[%s5811_s14 + $0xd0] sm:$0xff] }
 0x377   : > { %v2396_v55 = vrot.slane %v2395_v38, 1 }
 0x379   : > { %v2397_v60 = vadd.f32 %v2396_v55, %v2395_v38  ;;  %v2839_v38 = vld [vmem:[%s5811_s14 + $0xd8] sm:$0xff]  ;;  %v2840_v55 = vld [vmem:[%s5811_s14 + $0xe0] sm:$0xff] }
 0x37b   : > { %3701 = vmatmul.mubr.msk.f32.vlgmr.msra.gmra.mrb[16].mxu1 %vm1539_vm0, %v2397_v60  ;;  %v2841_v60 = vld [vmem:[%s5811_s14 + $0xe8] sm:$0xff] }
 0x37c   : > { %3704 = vmatpush3.msk.msra.mxu1 %vm2942_vm8, %v5570_v50  ;;  %3705 = vmatprep.mubr.msk.f32.mxu1 %vm2845_vm9, %v2812_v26  ;;  %v2818_v50 = vld [vmem:[%s5811_s14 + $0x30] sm:$0xff] }
 0x37d   : > { %v2842_v26 = vld [vmem:[%s5811_s14 + $0xf0] sm:$0xff] }
 0x37f   : > { %3706 = vmatmul.mubr.msk.f32.vlgmr.msra.gmra.mrb[18].mxu1 %vm2845_vm9, %v2813_v44  ;;  %v2843_v44 = vld [vmem:[%s5811_s14 + $0xf8] sm:$0xff] }
 0x380   : > { %3708 = vmatprep.mubr.msk.f32.mxu1 %vm2845_vm9, %v2814_v34 }
 0x383   : > { %3709 = vmatmul.mubr.msk.f32.gmra.mrb[20].mxu1 %vm2845_vm9, %v2815_v62 }
 0x384   : > { %3711 = vmatprep.mubr.msk.f32.mxu1 %vm2845_vm9, %v2816_v28 }
 0x387   : > { %3712 = vmatmul.mubr.msk.f32.gmra.mrb[22].mxu1 %vm2845_vm9, %v2817_v10 }
 0x388   : > { %3714 = vmatprep.mubr.msk.f32.mxu1 %vm2845_vm9, %v2818_v50 }
 0x38b   : > { %3715 = vmatmul.mubr.msk.f32.gmra.mrb[24].mxu1 %vm2845_vm9, %v2819_v7 }
 0x38c   : > { %3717 = vmatprep.mubr.msk.f32.mxu1 %vm2845_vm9, %v2820_v48 }
 0x38f   : > { %3718 = vmatmul.mubr.msk.f32.gmra.mrb[26].mxu1 %vm2845_vm9, %v2821_v19 }
 0x390   : > { %3720 = vmatprep.mubr.msk.f32.mxu1 %vm2845_vm9, %v2822_v21 }
 0x393   : > { %3721 = vmatmul.mubr.msk.f32.gmra.mrb[28].mxu1 %vm2845_vm9, %v2823_v47 }
 0x394   : > { %3723 = vmatprep.mubr.msk.f32.mxu1 %vm2845_vm9, %v2824_v61 }
 0x397   : > { %3724 = vmatmul.mubr.msk.f32.gmra.mrb[30].mxu1 %vm2845_vm9, %v2825_v6 }
 0x398   : > { %3726 = vmatprep.mubr.msk.f32.mxu1 %vm2845_vm9, %v2826_v59 }
 0x39b   : > { %3727 = vmatmul.mubr.msk.f32.gmra.mrb[32].mxu1 %vm2845_vm9, %v2827_v24  ;;  %v5901_v24 = vld [vmem:[%s6384_s3] ss:$0 sm:$0xff] }
 0x39c   : > { %3729 = vmatprep.mubr.msk.f32.mxu1 %vm2845_vm9, %v2828_v33 }
 0x39f   : > { %3730 = vmatmul.mubr.msk.f32.gmra.mrb[34].mxu1 %vm2845_vm9, %v2829_v45 }
 0x3a0   : > { %3732 = vmatprep.mubr.msk.f32.mxu1 %vm2845_vm9, %v2830_v20 }
 0x3a3   : > { %3733 = vmatmul.mubr.msk.f32.gmra.mrb[36].mxu1 %vm2845_vm9, %v2831_v53  ;;  %v5916_v53 = vld [vmem:[%s6385_s4] ss:$0 sm:$0xff] }
 0x3a4   : > { %3735 = vmatprep.mubr.msk.f32.mxu1 %vm2845_vm9, %v2832_v4 }
 0x3a7   : > { %3736 = vmatmul.mubr.msk.f32.gmra.mrb[38].mxu1 %vm2845_vm9, %v2833_v23 }
 0x3a8   : > { %3738 = vmatprep.mubr.msk.f32.mxu1 %vm2845_vm9, %v2834_v22 }
 0x3ab   : > { %3739 = vmatmul.mubr.msk.f32.gmra.mrb[40].mxu1 %vm2845_vm9, %v2835_v39 }
 0x3ac   : > { %3741 = vmatprep.mubr.msk.f32.mxu1 %vm2845_vm9, %v2836_v5 }
 0x3af   : > { %3742 = vmatmul.mubr.msk.f32.gmra.mrb[42].mxu1 %vm2845_vm9, %v2837_v40 }
 0x3b0   : > { %3744 = vmatprep.mubr.msk.f32.mxu1 %vm2845_vm9, %v2838_v41 }
 0x3b3   : > { %3745 = vmatmul.mubr.msk.f32.gmra.mrb[44].mxu1 %vm2845_vm9, %v2839_v38 }
 0x3b4   : > { %3747 = vmatprep.mubr.msk.f32.mxu1 %vm2845_vm9, %v2840_v55 }
 0x3b7   : > { %3748 = vmatmul.mubr.msk.f32.gmra.mrb[46].mxu1 %vm2845_vm9, %v2841_v60 }
 0x3b8   : > { %3750 = vmatprep.mubr.msk.f32.mxu1 %vm2845_vm9, %v2842_v26 }
 0x3bb   : > { %3751 = vmatmul.mubr.msk.f32.gmra.mrb[48].mxu1 %vm2845_vm9, %v2843_v44 }
 0x44e   : > { %v2467_v34 = vpop.f32.mrb[16].mxu1 }
 0x44f   : > { %v2471_v62 = vmul.f32 0.001953125, %v2467_v34  ;;  %v3702_v28 = vpop.f32.mrb[17].mxu1 }
 0x451   : > { %v2472_v10 = vadd.f32 1e-05, %v2471_v62 }
 0x452   : > { %v5880_v50 = vpop.f32.mrb[18].mxu1 }
 0x453   : > { %4368 = vrsqrt.f32 %v2472_v10  ;;  %v5882_v7 = vpop.f32.mrb[19].mxu1 }
 0x456   : > { %v5884_v48 = vpop.f32.mrb[20].mxu1 }
 0x457   : > { %v5886_v19 = vpop.f32.mrb[21].mxu1 }
 0x45a   : > { %v5888_v21 = vpop.f32.mrb[22].mxu1 }
 0x45b   : > { %v5890_v47 = vpop.f32.mrb[23].mxu1 }
 0x45d   : > { %v4369_v61 = vpop.eup %4368 }
 0x45e   : > { %v5894_v6 = vrot.slane %v4369_v61, %v2263_v31  ;;  %v5896_v59 = vpop.f32.mrb[24].mxu1 }
 0x45f   : > { %v5903_v33 = vpop.f32.mrb[25].mxu1 }
 0x460   : > { %v2479_v45 = vmul.f32 %v5894_v6, %v5587_v15  ;;  %v2478_v20 = vmul.f32 %v5894_v6, %v5583_v9  ;;  %v2481_v8 = vmul.f32 %v5894_v6, %v5595_v51  ;;  %v2480_v31 = vmul.f32 %v5894_v6, %v5591_v1 }
 0x461   : > { %v2483_v4 = vmul.f32 %v5894_v6, %v5609_v52  ;;  %v2482_v15 = vmul.f32 %v5894_v6, %v5603_v58  ;;  %v2485_v9 = vmul.f32 %v5894_v6, %v5624_v46  ;;  %v2484_v51 = vmul.f32 %v5894_v6, %v5617_v3 }
 0x462   : > { %v2518_v23 = vmul.f32 %v5901_v24, %v2479_v45  ;;  %v2517_v1 = vmul.f32 %v5901_v24, %v2478_v20  ;;  %v2520_v22 = vmul.f32 %v5901_v24, %v2481_v8  ;;  %v2519_v39 = vmul.f32 %v5901_v24, %v2480_v31  ;;  %v5930_v5 = vpop.f32.mrb[26].mxu1 }
 0x463   : > { %v2522_v52 = vmul.f32 %v5901_v24, %v2483_v4  ;;  %v2521_v58 = vmul.f32 %v5901_v24, %v2482_v15  ;;  %v2524_v40 = vmul.f32 %v5901_v24, %v2485_v9  ;;  %v2523_v46 = vmul.f32 %v5901_v24, %v2484_v51  ;;  %v5936_v41 = vpop.f32.mrb[27].mxu1 }
 0x464   : > { %v5939_v3 = vadd.f32 %v5916_v53, %v2518_v23  ;;  %v5942_v38 = vadd.f32 %v5916_v53, %v2517_v1  ;;  %v5945_v55 = vadd.f32 %v5916_v53, %v2520_v22  ;;  %v5948_v60 = vadd.f32 %v5916_v53, %v2519_v39 }
 0x465   : > { %v5951_v26 = vadd.f32 %v5916_v53, %v2522_v52  ;;  %v5954_v44 = vadd.f32 %v5916_v53, %v2521_v58  ;;  %v5957_v34 = vadd.f32 %v5916_v53, %v2524_v40  ;;  %v5960_v62 = vadd.f32 %v5916_v53, %v2523_v46 }
 0x466   : > { %v3581_v28 = vmul.f32 -1.442695, %v5939_v3  ;;  %v3580_v10 = vmul.f32 -1.442695, %v5942_v38  ;;  %v3583_v61 = vmul.f32 -1.442695, %v5945_v55  ;;  %v2487_v45 = vmul.f32 %v5894_v6, %v5638_v35 }
 0x467   : > { %v3582_v20 = vmul.f32 -1.442695, %v5948_v60  ;;  %v3585_v8 = vmul.f32 -1.442695, %v5951_v26  ;;  %v3584_v31 = vmul.f32 -1.442695, %v5954_v44  ;;  %v2486_v4 = vmul.f32 %v5894_v6, %v5631_v32 }
 0x468   : > { %4370 = vpow2.f32 %v3581_v28  ;;  %v3587_v15 = vmul.f32 -1.442695, %v5957_v34  ;;  %v3586_v9 = vmul.f32 -1.442695, %v5960_v62  ;;  %v2526_v51 = vmul.f32 %v5901_v24, %v2487_v45  ;;  %v5975_v23 = vpop.f32.mrb[28].mxu1 }
 0x469   : > { %4372 = vpow2.f32 %v3580_v10  ;;  %v2525_v35 = vmul.f32 %v5901_v24, %v2486_v4  ;;  %v2489_v1 = vmul.f32 %v5894_v6, %v5652_v37  ;;  %v2488_v22 = vmul.f32 %v5894_v6, %v5645_v11  ;;  %v5982_v39 = vpop.f32.mrb[29].mxu1 }
 0x46a   : > { %4374 = vpow2.f32 %v3583_v61  ;;  %v5985_v32 = vadd.f32 %v5916_v53, %v2526_v51  ;;  %v2491_v52 = vmul.f32 %v5894_v6, %v5666_v42  ;;  %v5989_v58 = vpop.f32.mrb[30].mxu1  ;;  %v2490_v40 = vmul.f32 %v5894_v6, %v5659_v12 }
 0x46b   : > { %4376 = vpow2.f32 %v3582_v20  ;;  %v5994_v37 = vadd.f32 %v5916_v53, %v2525_v35  ;;  %v2528_v11 = vmul.f32 %v5901_v24, %v2489_v1  ;;  %v2527_v46 = vmul.f32 %v5901_v24, %v2488_v22  ;;  %v5998_v28 = vpop.f32.mrb[31].mxu1 }
 0x46c   : > { %6396 = vst [vmem:[#allocation2_spill] sm:$0xff] %v5998_v28  ;;  %4378 = vpow2.f32 %v3585_v8  ;;  %v3589_v10 = vmul.f32 -1.442695, %v5985_v32  ;;  %v2530_v42 = vmul.f32 %v5901_v24, %v2491_v52  ;;  %v2529_v61 = vmul.f32 %v5901_v24, %v2490_v40 }
 0x46d   : > { %4380 = vpow2.f32 %v3584_v31  ;;  %v3588_v12 = vmul.f32 -1.442695, %v5994_v37  ;;  %v6005_v45 = vadd.f32 %v5916_v53, %v2528_v11  ;;  %v6008_v20 = vadd.f32 %v5916_v53, %v2527_v46 }
 0x46e   : > { %4382 = vpow2.f32 %v3587_v15  ;;  %v6011_v4 = vadd.f32 %v5916_v53, %v2530_v42  ;;  %v6014_v8 = vadd.f32 %v5916_v53, %v2529_v61  ;;  %v2493_v51 = vmul.f32 %v5894_v6, %v5680_v30  ;;  %v6018_v35 = vpop.f32.mrb[32].mxu1 }
 0x46f   : > { %6397 = vst [vmem:[#allocation3_spill] sm:$0xff] %v6018_v35  ;;  %4384 = vpow2.f32 %v3586_v9  ;;  %v3591_v31 = vmul.f32 -1.442695, %v6005_v45  ;;  %v3590_v1 = vmul.f32 -1.442695, %v6008_v20  ;;  %v2492_v22 = vmul.f32 %v5894_v6, %v5673_v49  ;;  %v6024_v15 = vpop.f32.mrb[33].mxu1 }
 0x470   : > { %6398 = vst [vmem:[#allocation4_spill] sm:$0xff] %v6024_v15  ;;  %4386 = vpow2.f32 %v3589_v10  ;;  %v3593_v52 = vmul.f32 -1.442695, %v6011_v4  ;;  %v6028_v40 = vmul.f32 -1.442695, %v6014_v8  ;;  %v2532_v30 = vmul.f32 %v5901_v24, %v2493_v51 }
 0x471   : > { %4388 = vpow2.f32 %v3588_v12  ;;  %v2531_v9 = vmul.f32 %v5901_v24, %v2492_v22  ;;  %v2495_v11 = vmul.f32 %v5894_v6, %v5694_v57  ;;  %v2494_v46 = vmul.f32 %v5894_v6, %v5687_v54 }
 0x472   : > { %v4371_v49 = vpop.eup %4370  ;;  %4390 = vpow2.f32 %v3591_v31  ;;  %v6037_v10 = vadd.f32 %v5916_v53, %v2532_v30  ;;  %v6039_v42 = vpop.f32.mrb[34].mxu1  ;;  %v2497_v61 = vmul.f32 %v5894_v6, %v5708_v13  ;;  %v2496_v12 = vmul.f32 %v5894_v6, %v5701_v36 }
 0x473   : > { %6399 = vst [vmem:[#allocation5_spill] sm:$0xff] %v6039_v42  ;;  %v4373_v51 = vpop.eup %4372  ;;  %v2685_v22 = vadd.f32 1.0, %v4371_v49  ;;  %4392 = vpow2.f32 %v3590_v1  ;;  %v6046_v57 = vadd.f32 %v5916_v53, %v2531_v9  ;;  %v2534_v54 = vmul.f32 %v5901_v24, %v2495_v11  ;;  %v6049_v31 = vpop.f32.mrb[35].mxu1 }
 0x474   : > { %6401 = vst [vmem:[#allocation7_spill] sm:$0xff] %v6049_v31  ;;  %v4375_v30 = vpop.eup %4374  ;;  %v2684_v15 = vadd.f32 1.0, %v4373_v51  ;;  %4394 = vpow2.f32 %v3593_v52  ;;  %v6052_v42 = vmul.f32 -1.442695, %v6037_v10  ;;  %v2533_v13 = vmul.f32 %v5901_v24, %v2494_v46 }
 0x475   : > { %6400 = vst [vmem:[#allocation6_spill] sm:$0xff] %v6046_v57  ;;  %v4377_v35 = vpop.eup %4376  ;;  %4396 = vrcp.f32 %v2685_v22  ;;  %v2687_v36 = vadd.f32 1.0, %v4375_v30  ;;  %v6056_v1 = vmul.f32 -1.442695, %v6046_v57  ;;  %v6059_v9 = vadd.f32 %v5916_v53, %v2534_v54 }
 0x476   : > { %v4379_v11 = vpop.eup %4378  ;;  %4398 = vrcp.f32 %v2684_v15  ;;  %v2686_v49 = vadd.f32 1.0, %v4377_v35  ;;  %v6062_v51 = vadd.f32 %v5916_v53, %v2533_v13  ;;  %v2536_v52 = vmul.f32 %v5901_v24, %v2497_v61  ;;  %v6065_v31 = vpop.f32.mrb[36].mxu1 }
 0x477   : > { %6402 = vst [vmem:[#allocation8_spill] sm:$0xff] %v6059_v9  ;;  %6404 = vst [vmem:[#allocation10_spill] sm:$0xff] %v6065_v31  ;;  %v4381_v46 = vpop.eup %4380  ;;  %4400 = vrcp.f32 %v2687_v36  ;;  %v2689_v22 = vadd.f32 1.0, %v4379_v11  ;;  %v6068_v30 = vmul.f32 -1.442695, %v6059_v9  ;;  %v2535_v57 = vmul.f32 %v5901_v24, %v2496_v12  ;;  %v6071_v54 = vpop.f32.mrb[37].mxu1 }
 0x478   : > { %6403 = vst [vmem:[#allocation9_spill] sm:$0xff] %v6062_v51  ;;  %6405 = vst [vmem:[#allocation11_spill] sm:$0xff] %v6071_v54  ;;  %v4383_v28 = vpop.eup %4382  ;;  %4402 = vrcp.f32 %v2686_v49  ;;  %v2688_v35 = vadd.f32 1.0, %v4381_v46  ;;  %v6074_v15 = vmul.f32 -1.442695, %v6062_v51  ;;  %v6077_v61 = vadd.f32 %v5916_v53, %v2536_v52 }
 0x479   : > { %v4385_v13 = vpop.eup %4384  ;;  %4404 = vrcp.f32 %v2689_v22  ;;  %v2691_v36 = vadd.f32 1.0, %v4383_v28  ;;  %v6080_v11 = vadd.f32 %v5916_v53, %v2535_v57  ;;  %v2499_v12 = vmul.f32 %v5894_v6, %v5722_v29 }
 0x47a   : > { %6406 = vst [vmem:[#allocation12_spill] sm:$0xff] %v6077_v61  ;;  %v4387_v31 = vpop.eup %4386  ;;  %4406 = vrcp.f32 %v2688_v35  ;;  %v2690_v54 = vadd.f32 1.0, %v4385_v13  ;;  %v6085_v49 = vmul.f32 -1.442695, %v6077_v61  ;;  %v6087_v46 = vpop.f32.mrb[38].mxu1  ;;  %v2498_v52 = vmul.f32 %v5894_v6, %v5715_v2 }
 0x47b   : > { %6407 = vst [vmem:[#allocation13_spill] sm:$0xff] %v6080_v11  ;;  %6408 = vst [vmem:[#allocation14_spill] sm:$0xff] %v6087_v46  ;;  %v4389_v51 = vpop.eup %4388  ;;  %4408 = vrcp.f32 %v2691_v36  ;;  %v2693_v28 = vadd.f32 1.0, %v4387_v31  ;;  %v6092_v57 = vmul.f32 -1.442695, %v6080_v11  ;;  %v2538_v22 = vmul.f32 %v5901_v24, %v2499_v12  ;;  %v6095_v29 = vpop.f32.mrb[39].mxu1 }
 0x47c   : > { %6409 = vst [vmem:[#allocation15_spill] sm:$0xff] %v6095_v29  ;;  %v4391_v35 = vpop.eup %4390  ;;  %4410 = vrcp.f32 %v2690_v54  ;;  %v2692_v13 = vadd.f32 1.0, %v4389_v51  ;;  %v2537_v61 = vmul.f32 %v5901_v24, %v2498_v52  ;;  %v2501_v46 = vmul.f32 %v5894_v6, %v5736_v27 }
 0x47d   : > { %v4393_v9 = vpop.eup %4392  ;;  %4412 = vrcp.f32 %v2693_v28  ;;  %v2695_v2 = vadd.f32 1.0, %v4391_v35  ;;  %v6101_v31 = vadd.f32 %v5916_v53, %v2538_v22  ;;  %v2500_v36 = vmul.f32 %v5894_v6, %v5729_v43 }
 0x47e   : > { %v4395_v12 = vpop.eup %4394  ;;  %4414 = vrcp.f32 %v2692_v13  ;;  %v2694_v29 = vadd.f32 1.0, %v4393_v9  ;;  %v6106_v54 = vadd.f32 %v5916_v53, %v2537_v61  ;;  %v2540_v51 = vmul.f32 %v5901_v24, %v2501_v46  ;;  %v6109_v52 = vpop.f32.mrb[40].mxu1 }
 0x47f   : > { %6410 = vst [vmem:[#allocation16_spill] sm:$0xff] %v6109_v52  ;;  %v4397_v27 = vpop.eup %4396  ;;  %4416 = vrcp.f32 %v2695_v2  ;;  %v2697_v28 = vadd.f32 1.0, %v4395_v12  ;;  %v3601_v35 = vmul.f32 -1.442695, %v6101_v31  ;;  %v2539_v22 = vmul.f32 %v5901_v24, %v2500_v36  ;;  %v6113_v11 = vpop.f32.mrb[41].mxu1 }
 0x480   : > { %6411 = vst [vmem:[#allocation17_spill] sm:$0xff] %v6113_v11  ;;  %v4399_v43 = vpop.eup %4398  ;;  %v2781_v13 = vmul.f32 %v4397_v27, %v5939_v3  ;;  %4418 = vrcp.f32 %v2694_v29  ;;  %v3600_v9 = vmul.f32 -1.442695, %v6106_v54  ;;  %v6118_v61 = vadd.f32 %v5916_v53, %v2540_v51  ;;  %v6123_v2 = vld [vmem:[%s6389_s8] ss:$0 sm:$0xff] }
 0x481   : > { %v4401_v46 = vpop.eup %4400  ;;  %v2780_v36 = vmul.f32 %v4399_v43, %v5942_v38  ;;  %4420 = vrcp.f32 %v2697_v28  ;;  %v6127_v12 = vadd.f32 %v5916_v53, %v2539_v22  ;;  %v6131_v3 = vmul.f32 %v5894_v6, %v5750_v17 }
 0x482   : > { %v4403_v29 = vpop.eup %4402  ;;  %v3172_v51 = vadd.f32 %v5880_v50, %v2781_v13  ;;  %v2783_v27 = vmul.f32 %v4401_v46, %v5945_v55  ;;  %4422 = vpow2.f32 %v6028_v40  ;;  %v3603_v11 = vmul.f32 -1.442695, %v6118_v61  ;;  %v6137_v52 = vpop.f32.mrb[42].mxu1 }
 0x483   : > { %v4405_v38 = vpop.eup %4404  ;;  %v3171_v17 = vadd.f32 %v5882_v7, %v2780_v36  ;;  %v2782_v50 = vmul.f32 %v4403_v29, %v5948_v60  ;;  %4424 = vpow2.f32 %v6052_v42  ;;  %v3602_v55 = vmul.f32 -1.442695, %v6127_v12  ;;  %v6150_v40 = vpop.f32.mrb[43].mxu1 }
 0x484   : > { %v4407_v28 = vpop.eup %4406  ;;  %v3211_v22 = vadd.f32 %v6123_v2, %v3172_v51  ;;  %v3174_v43 = vadd.f32 %v5884_v48, %v2783_v27  ;;  %v2785_v13 = vmul.f32 %v4405_v38, %v5951_v26  ;;  %4426 = vpow2.f32 %v6056_v1 }
 0x485   : > { %v4409_v7 = vpop.eup %4408  ;;  %v3210_v46 = vadd.f32 %v6123_v2, %v3171_v17  ;;  %v3173_v60 = vadd.f32 %v5886_v19, %v2782_v50  ;;  %v2784_v42 = vmul.f32 %v4407_v28, %v5954_v44  ;;  %4428 = vpow2.f32 %v6068_v30 }
 0x486   : > { %v4411_v36 = vpop.eup %4410  ;;  %3243 = vst.msk [vmem:[%s6144_s12 + $0x8] sm:$0xff] %vm1539_vm0, %v3211_v22  ;;  %v3213_v48 = vadd.f32 %v6123_v2, %v3174_v43  ;;  %v3176_v29 = vadd.f32 %v5888_v21, %v2785_v13  ;;  %v2787_v26 = vmul.f32 %v4409_v7, %v5957_v34  ;;  %4430 = vpow2.f32 %v6074_v15  ;;  %v6166_v1 = vpop.f32.mrb[44].mxu1 }
 0x487   : > { %v4413_v19 = vpop.eup %4412  ;;  %3242 = vst.msk [vmem:[%s6144_s12] sm:$0xff] %vm1539_vm0, %v3210_v46  ;;  %v3212_v44 = vadd.f32 %v6123_v2, %v3173_v60  ;;  %v3175_v30 = vadd.f32 %v5890_v47, %v2784_v42  ;;  %v2786_v51 = vmul.f32 %v4411_v36, %v5960_v62  ;;  %4432 = vpow2.f32 %v6085_v49  ;;  %v6174_v21 = vpop.f32.mrb[45].mxu1 }
 0x488   : > { %v4415_v34 = vpop.eup %4414  ;;  %3245 = vst.msk [vmem:[%s6144_s12 + $0x18] sm:$0xff] %vm1539_vm0, %v3213_v48  ;;  %v3215_v15 = vadd.f32 %v6123_v2, %v3176_v29  ;;  %v3178_v27 = vadd.f32 %v5896_v59, %v2787_v26  ;;  %v2789_v38 = vmul.f32 %v4413_v19, %v5985_v32  ;;  %4434 = vpow2.f32 %v6092_v57 }
 0x489   : > { %v4417_v47 = vpop.eup %4416  ;;  %3244 = vst.msk [vmem:[%s6144_s12 + $0x10] sm:$0xff] %vm1539_vm0, %v3212_v44  ;;  %v3214_v62 = vadd.f32 %v6123_v2, %v3175_v30  ;;  %v3177_v49 = vadd.f32 %v5903_v33, %v2786_v51  ;;  %v2788_v17 = vmul.f32 %v4415_v34, %v5994_v37  ;;  %4436 = vpow2.f32 %v3601_v35 }
 0x48a   : > { %v4419_v50 = vpop.eup %4418  ;;  %3247 = vst.msk [vmem:[%s6144_s12 + $0x28] sm:$0xff] %vm1539_vm0, %v3215_v15  ;;  %v3217_v59 = vadd.f32 %v6123_v2, %v3178_v27  ;;  %v3180_v32 = vadd.f32 %v5930_v5, %v2789_v38  ;;  %v2791_v57 = vmul.f32 %v4417_v47, %v6005_v45  ;;  %4438 = vpow2.f32 %v3600_v9  ;;  %v6192_v28 = vpop.f32.mrb[46].mxu1 }
 0x48b   : > { %v4421_v22 = vpop.eup %4420  ;;  %3246 = vst.msk [vmem:[%s6144_s12 + $0x20] sm:$0xff] %vm1539_vm0, %v3214_v62  ;;  %v3216_v33 = vadd.f32 %v6123_v2, %v3177_v49  ;;  %v3179_v37 = vadd.f32 %v5936_v41, %v2788_v17  ;;  %v2790_v35 = vmul.f32 %v4419_v50, %v6008_v20  ;;  %4440 = vpow2.f32 %v3603_v11  ;;  %v6199_v43 = vpop.f32.mrb[47].mxu1 }
 0x48c   : > { %v4423_v5 = vpop.eup %4422  ;;  %3249 = vst.msk [vmem:[%s6144_s12 + $0x38] sm:$0xff] %vm1539_vm0, %v3217_v59  ;;  %v3219_v45 = vadd.f32 %v6123_v2, %v3180_v32  ;;  %v3182_v9 = vadd.f32 %v5975_v23, %v2791_v57  ;;  %v2793_v13 = vmul.f32 %v4421_v22, %v6011_v4  ;;  %4442 = vpow2.f32 %v3602_v55 }
 0x48d   : > { %v4425_v7 = vpop.eup %4424  ;;  %3248 = vst.msk [vmem:[%s6144_s12 + $0x30] sm:$0xff] %vm1539_vm0, %v3216_v33  ;;  %v3218_v41 = vadd.f32 %v6123_v2, %v3179_v37  ;;  %v3181_v20 = vadd.f32 %v5982_v39, %v2790_v35  ;;  %v2696_v11 = vadd.f32 1.0, %v4423_v5  ;;  %v2542_v46 = vmul.f32 %v5901_v24, %v6131_v3 }
 0x48e   : > { %v4427_v60 = vpop.eup %4426  ;;  %3251 = vst.msk [vmem:[%s6144_s12 + $0x48] sm:$0xff] %vm1539_vm0, %v3219_v45  ;;  %v3221_v23 = vadd.f32 %v6123_v2, %v3182_v9  ;;  %v3184_v4 = vadd.f32 %v5989_v58, %v2793_v13  ;;  %v2699_v55 = vadd.f32 1.0, %v4425_v7  ;;  %v2502_v42 = vmul.f32 %v5894_v6, %v5743_v63  ;;  %v6218_v36 = vpop.f32.mrb[48].mxu1 }
 0x48f   : > { %v4429_v39 = vpop.eup %4428  ;;  %3250 = vst.msk [vmem:[%s6144_s12 + $0x40] sm:$0xff] %vm1539_vm0, %v3218_v41  ;;  %v3220_v3 = vadd.f32 %v6123_v2, %v3181_v20  ;;  %4444 = vrcp.f32 %v2696_v11  ;;  %v2698_v48 = vadd.f32 1.0, %v4427_v60  ;;  %v6224_v29 = vadd.f32 %v5916_v53, %v2542_v46  ;;  %v6226_v26 = vpop.f32.mrb[49].mxu1 }
 0x490   : > { %v4431_v58 = vpop.eup %4430  ;;  %3253 = vst.msk [vmem:[%s6144_s12 + $0x58] sm:$0xff] %vm1539_vm0, %v3221_v23  ;;  %v3223_v63 = vadd.f32 %v6123_v2, %v3184_v4  ;;  %4446 = vrcp.f32 %v2699_v55  ;;  %v2701_v19 = vadd.f32 1.0, %v4429_v39  ;;  %v2541_v44 = vmul.f32 %v5901_v24, %v2502_v42 }
 0x491   : > { %v4433_v30 = vpop.eup %4432  ;;  %3252 = vst.msk [vmem:[%s6144_s12 + $0x50] sm:$0xff] %vm1539_vm0, %v3220_v3  ;;  %4448 = vrcp.f32 %v2698_v48  ;;  %v2700_v51 = vadd.f32 1.0, %v4431_v58  ;;  %v2505_v34 = vmul.f32 %v5894_v6, %v5764_v56  ;;  %v2504_v47 = vmul.f32 %v5894_v6, %v5757_v16 }
 0x492   : > { %v4435_v15 = vpop.eup %4434  ;;  %3255 = vst.msk [vmem:[%s6144_s12 + $0x68] sm:$0xff] %vm1539_vm0, %v3223_v63  ;;  %4450 = vrcp.f32 %v2701_v19  ;;  %v2703_v27 = vadd.f32 1.0, %v4433_v30  ;;  %v6239_v38 = vadd.f32 %v5916_v53, %v2541_v44  ;;  %v2507_v50 = vmul.f32 %v5894_v6, %v5778_v18  ;;  %v6412_v63 = vld [vmem:[#allocation2_spill] sm:$0xff]  ;;  %v6414_v30 = vld [vmem:[#allocation3_spill] sm:$0xff] }
 0x493   : > { %v4437_v62 = vpop.eup %4436  ;;  %4452 = vrcp.f32 %v2700_v51  ;;  %v2702_v49 = vadd.f32 1.0, %v4435_v15  ;;  %v2544_v17 = vmul.f32 %v5901_v24, %v2505_v34  ;;  %v3605_v32 = vmul.f32 -1.442695, %v6224_v29  ;;  %v6413_v44 = vld [vmem:[#allocation6_spill] sm:$0xff]  ;;  %v6415_v34 = vld [vmem:[#allocation8_spill] sm:$0xff] }
 0x494   : > { %v4439_v56 = vpop.eup %4438  ;;  %4454 = vrcp.f32 %v2703_v27  ;;  %v2705_v59 = vadd.f32 1.0, %v4437_v62  ;;  %v2543_v57 = vmul.f32 %v5901_v24, %v2504_v47  ;;  %v2546_v37 = vmul.f32 %v5901_v24, %v2507_v50  ;;  %v6416_v47 = vld [vmem:[#allocation4_spill] sm:$0xff] }
 0x495   : > { %v4441_v22 = vpop.eup %4440  ;;  %4456 = vrcp.f32 %v2702_v49  ;;  %v2704_v33 = vadd.f32 1.0, %v4439_v56  ;;  %v6249_v16 = vadd.f32 %v5916_v53, %v2544_v17  ;;  %v2506_v45 = vmul.f32 %v5894_v6, %v5771_v14  ;;  %v6417_v49 = vld [vmem:[#allocation9_spill] sm:$0xff] }
 0x496   : > { %v4443_v35 = vpop.eup %4442  ;;  %4458 = vrcp.f32 %v2705_v59  ;;  %v2707_v5 = vadd.f32 1.0, %v4441_v22  ;;  %v6253_v18 = vadd.f32 %v5916_v53, %v2543_v57  ;;  %v3604_v13 = vmul.f32 -1.442695, %v6239_v38  ;;  %v6418_v59 = vld [vmem:[#allocation5_spill] sm:$0xff]  ;;  %v6419_v57 = vld [vmem:[#allocation12_spill] sm:$0xff] }
 0x497   : > { %4460 = vrcp.f32 %v2704_v33  ;;  %v2706_v9 = vadd.f32 1.0, %v4443_v35  ;;  %v6259_v7 = vadd.f32 %v5916_v53, %v2546_v37  ;;  %v3607_v41 = vmul.f32 -1.442695, %v6249_v16  ;;  %v6420_v35 = vld [vmem:[#allocation7_spill] sm:$0xff] }
 0x498   : > { %4462 = vrcp.f32 %v2707_v5  ;;  %v2545_v20 = vmul.f32 %v5901_v24, %v2506_v45  ;;  %v2509_v11 = vmul.f32 %v5894_v6, %v5792_v25  ;;  %v3606_v60 = vmul.f32 -1.442695, %v6253_v18  ;;  %v6421_v45 = vld [vmem:[#allocation13_spill] sm:$0xff] }
 0x499   : > { %v4445_v46 = vpop.eup %4444  ;;  %4464 = vrcp.f32 %v2706_v9  ;;  %v3609_v14 = vmul.f32 -1.442695, %v6259_v7  ;;  %v2508_v23 = vmul.f32 %v5894_v6, %v5785_v0 }
 0x49a   : > { %v4447_v4 = vpop.eup %4446  ;;  %v2792_v55 = vmul.f32 %v4445_v46, %v6014_v8  ;;  %4466 = vpow2.f32 %v3605_v32  ;;  %v6271_v42 = vadd.f32 %v5916_v53, %v2545_v20  ;;  %v2548_v39 = vmul.f32 %v5901_v24, %v2509_v11  ;;  %v6422_v11 = vld [vmem:[#allocation10_spill] sm:$0xff] }
 0x49b   : > { %v4449_v3 = vpop.eup %4448  ;;  %v2795_v25 = vmul.f32 %v4447_v4, %v6037_v10  ;;  %4468 = vpow2.f32 %v3604_v13  ;;  %v2547_v48 = vmul.f32 %v5901_v24, %v2508_v23 }
 0x49c   : > { %v4451_v58 = vpop.eup %4450  ;;  %v3183_v19 = vadd.f32 %v6412_v63, %v2792_v55  ;;  %v2794_v0 = vmul.f32 %v4449_v3, %v6413_v44  ;;  %4470 = vpow2.f32 %v3607_v41  ;;  %v3608_v6 = vmul.f32 -1.442695, %v6271_v42  ;;  %v6423_v55 = vld [vmem:[#allocation11_spill] sm:$0xff] }
 0x49d   : > { %v4453_v8 = vpop.eup %4452  ;;  %v3186_v51 = vadd.f32 %v6414_v30, %v2795_v25  ;;  %v2797_v15 = vmul.f32 %v4451_v58, %v6415_v34  ;;  %4472 = vpow2.f32 %v3606_v60  ;;  %v6282_v10 = vadd.f32 %v5916_v53, %v2548_v39 }
 0x49e   : > { %v4455_v27 = vpop.eup %4454  ;;  %v3222_v24 = vadd.f32 %v6123_v2, %v3183_v19  ;;  %v3185_v62 = vadd.f32 %v6416_v47, %v2794_v0  ;;  %v2796_v17 = vmul.f32 %v4453_v8, %v6417_v49  ;;  %4474 = vpow2.f32 %v3609_v14 }
 0x49f   : > { %v4457_v50 = vpop.eup %4456  ;;  %v3225_v56 = vadd.f32 %v6123_v2, %v3186_v51  ;;  %v3188_v32 = vadd.f32 %v6418_v59, %v2797_v15  ;;  %v2799_v22 = vmul.f32 %v4455_v27, %v6419_v57  ;;  %4476 = vpow2.f32 %v3608_v6  ;;  %v6426_v51 = vld [vmem:[#allocation16_spill] sm:$0xff] }
 0x4a0   : > { %v4459_v33 = vpop.eup %4458  ;;  %3254 = vst.msk [vmem:[%s6144_s12 + $0x60] sm:$0xff] %vm1539_vm0, %v3222_v24  ;;  %v3224_v37 = vadd.f32 %v6123_v2, %v3185_v62  ;;  %v3187_v5 = vadd.f32 %v6420_v35, %v2796_v17  ;;  %v2798_v9 = vmul.f32 %v4457_v50, %v6421_v45  ;;  %v3611_v13 = vmul.f32 -1.442695, %v6282_v10  ;;  %v6427_v24 = vld [vmem:[#allocation17_spill] sm:$0xff] }
 0x4a1   : > { %v4461_v41 = vpop.eup %4460  ;;  %3257 = vst.msk [vmem:[%s6144_s12 + $0x78] sm:$0xff] %vm1539_vm0, %v3225_v56  ;;  %v3227_v20 = vadd.f32 %v6123_v2, %v3188_v32  ;;  %v3190_v46 = vadd.f32 %v6422_v11, %v2799_v22  ;;  %v2801_v60 = vmul.f32 %v4459_v33, %v6101_v31  ;;  %v6302_v14 = vadd.f32 %v5916_v53, %v2547_v48  ;;  %v6424_v31 = vld [vmem:[#allocation14_spill] sm:$0xff] }
 0x4a2   : > { %v4463_v23 = vpop.eup %4462  ;;  %3256 = vst.msk [vmem:[%s6144_s12 + $0x70] sm:$0xff] %vm1539_vm0, %v3224_v37  ;;  %v3226_v4 = vadd.f32 %v6123_v2, %v3187_v5  ;;  %v3189_v39 = vadd.f32 %v6423_v55, %v2798_v9  ;;  %v2800_v3 = vmul.f32 %v4461_v41, %v6106_v54  ;;  %4478 = vpow2.f32 %v3611_v13  ;;  %v6425_v54 = vld [vmem:[#allocation15_spill] sm:$0xff] }
 0x4a3   : > { %v4465_v25 = vpop.eup %4464  ;;  %3259 = vst.msk [vmem:[%s6144_s12 + $0x88] sm:$0xff] %vm1539_vm0, %v3227_v20  ;;  %v3229_v58 = vadd.f32 %v6123_v2, %v3190_v46  ;;  %v3192_v53 = vadd.f32 %v6424_v31, %v2801_v60  ;;  %v2803_v48 = vmul.f32 %v4463_v23, %v6118_v61  ;;  %v3610_v63 = vmul.f32 -1.442695, %v6302_v14 }
 0x4a4   : > { %v4467_v19 = vpop.eup %4466  ;;  %3258 = vst.msk [vmem:[%s6144_s12 + $0x80] sm:$0xff] %vm1539_vm0, %v3226_v4  ;;  %v3228_v44 = vadd.f32 %v6123_v2, %v3189_v39  ;;  %v3191_v0 = vadd.f32 %v6425_v54, %v2800_v3  ;;  %v2802_v6 = vmul.f32 %v4465_v25, %v6127_v12 }
 0x4a5   : > { %v4469_v8 = vpop.eup %4468  ;;  %3261 = vst.msk [vmem:[%s6144_s12 + $0x98] sm:$0xff] %vm1539_vm0, %v3229_v58  ;;  %v3231_v30 = vadd.f32 %v6123_v2, %v3192_v53  ;;  %v3194_v61 = vadd.f32 %v6426_v51, %v2803_v48  ;;  %v2709_v34 = vadd.f32 1.0, %v4467_v19  ;;  %4480 = vpow2.f32 %v3610_v63 }
 0x4a6   : > { %v4471_v15 = vpop.eup %4470  ;;  %3260 = vst.msk [vmem:[%s6144_s12 + $0x90] sm:$0xff] %vm1539_vm0, %v3228_v44  ;;  %v3230_v27 = vadd.f32 %v6123_v2, %v3191_v0  ;;  %v3193_v47 = vadd.f32 %v6427_v24, %v2802_v6  ;;  %v2708_v12 = vadd.f32 1.0, %v4469_v8 }
 0x4a7   : > { %v4473_v62 = vpop.eup %4472  ;;  %3263 = vst.msk [vmem:[%s6144_s12 + $0xa8] sm:$0xff] %vm1539_vm0, %v3231_v30  ;;  %v3233_v49 = vadd.f32 %v6123_v2, %v3194_v61  ;;  %4482 = vrcp.f32 %v2709_v34  ;;  %v2711_v17 = vadd.f32 1.0, %v4471_v15 }
 0x4a8   : > { %v4475_v50 = vpop.eup %4474  ;;  %3262 = vst.msk [vmem:[%s6144_s12 + $0xa0] sm:$0xff] %vm1539_vm0, %v3230_v27  ;;  %v3232_v56 = vadd.f32 %v6123_v2, %v3193_v47  ;;  %4484 = vrcp.f32 %v2708_v12  ;;  %v2710_v59 = vadd.f32 1.0, %v4473_v62 }
 0x4a9   : > { %v4477_v32 = vpop.eup %4476  ;;  %3265 = vst.msk [vmem:[%s6144_s12 + $0xb8] sm:$0xff] %vm1539_vm0, %v3233_v49  ;;  %4486 = vrcp.f32 %v2711_v17  ;;  %v2713_v57 = vadd.f32 1.0, %v4475_v50 }
 0x4aa   : > { %3264 = vst.msk [vmem:[%s6144_s12 + $0xb0] sm:$0xff] %vm1539_vm0, %v3232_v56  ;;  %4488 = vrcp.f32 %v2710_v59  ;;  %v2712_v22 = vadd.f32 1.0, %v4477_v32 }
 0x4ab   : > { %4490 = vrcp.f32 %v2713_v57 }
 0x4ac   : > { %v4479_v33 = vpop.eup %4478  ;;  %4492 = vrcp.f32 %v2712_v22 }
 0x4ad   : > { %v2715_v37 = vadd.f32 1.0, %v4479_v33 }
 0x4af   : > { %v4481_v35 = vpop.eup %4480  ;;  %4494 = vrcp.f32 %v2715_v37 }
 0x4b0   : > { %v2714_v5 = vadd.f32 1.0, %v4481_v35 }
 0x4b1   : > { %v4483_v45 = vpop.eup %4482 }
 0x4b2   : > { %v4485_v9 = vpop.eup %4484  ;;  %v2805_v13 = vmul.f32 %v4483_v45, %v6224_v29  ;;  %4496 = vrcp.f32 %v2714_v5 }
 0x4b3   : > { %v4487_v41 = vpop.eup %4486  ;;  %v2804_v20 = vmul.f32 %v4485_v9, %v6239_v38 }
 0x4b4   : > { %v4489_v11 = vpop.eup %4488  ;;  %v3196_v46 = vadd.f32 %v6137_v52, %v2805_v13  ;;  %v2807_v60 = vmul.f32 %v4487_v41, %v6249_v16 }
 0x4b5   : > { %v4491_v23 = vpop.eup %4490  ;;  %v3195_v4 = vadd.f32 %v6150_v40, %v2804_v20  ;;  %v2806_v55 = vmul.f32 %v4489_v11, %v6253_v18 }
 0x4b6   : > { %v4493_v39 = vpop.eup %4492  ;;  %v3235_v29 = vadd.f32 %v6123_v2, %v3196_v46  ;;  %v3198_v3 = vadd.f32 %v6166_v1, %v2807_v60  ;;  %v2809_v38 = vmul.f32 %v4491_v23, %v6259_v7 }
 0x4b7   : > { %v3234_v25 = vadd.f32 %v6123_v2, %v3195_v4  ;;  %v3197_v52 = vadd.f32 %v6174_v21, %v2806_v55  ;;  %v2808_v16 = vmul.f32 %v4493_v39, %v6271_v42 }
 0x4b8   : > { %3267 = vst.msk [vmem:[%s6144_s12 + $0xc8] sm:$0xff] %vm1539_vm0, %v3235_v29  ;;  %v3237_v40 = vadd.f32 %v6123_v2, %v3198_v3  ;;  %v3200_v18 = vadd.f32 %v6192_v28, %v2809_v38 }
 0x4b9   : > { %v4495_v58 = vpop.eup %4494  ;;  %3266 = vst.msk [vmem:[%s6144_s12 + $0xc0] sm:$0xff] %vm1539_vm0, %v3234_v25  ;;  %v3236_v1 = vadd.f32 %v6123_v2, %v3197_v52  ;;  %v3199_v7 = vadd.f32 %v6199_v43, %v2808_v16 }
 0x4ba   : > { %3269 = vst.msk [vmem:[%s6144_s12 + $0xd8] sm:$0xff] %vm1539_vm0, %v3237_v40  ;;  %v3239_v21 = vadd.f32 %v6123_v2, %v3200_v18  ;;  %v2811_v42 = vmul.f32 %v4495_v58, %v6282_v10 }
 0x4bb   : > { %3268 = vst.msk [vmem:[%s6144_s12 + $0xd0] sm:$0xff] %vm1539_vm0, %v3236_v1  ;;  %v3238_v31 = vadd.f32 %v6123_v2, %v3199_v7 }
 0x4bc   : > { %v4497_v28 = vpop.eup %4496  ;;  %3271 = vst.msk [vmem:[%s6144_s12 + $0xe8] sm:$0xff] %vm1539_vm0, %v3239_v21  ;;  %v3202_v53 = vadd.f32 %v6218_v36, %v2811_v42 }
 0x4bd   : > { %3270 = vst.msk [vmem:[%s6144_s12 + $0xe0] sm:$0xff] %vm1539_vm0, %v3238_v31  ;;  %v2810_v48 = vmul.f32 %v4497_v28, %v6302_v14 }
 0x4be   : > { %v3241_v43 = vadd.f32 %v6123_v2, %v3202_v53 }
 0x4bf   : > { %v3201_v63 = vadd.f32 %v6226_v26, %v2810_v48 }
 0x4c0   : > { %3273 = vst.msk [vmem:[%s6144_s12 + $0xf8] sm:$0xff] %vm1539_vm0, %v3241_v43 }
 0x4c1   : > { %v3240_v10 = vadd.f32 %v6123_v2, %v3201_v63 }
 0x4c3   : > { %3272 = vst.msk [vmem:[%s6144_s12 + $0xf0] sm:$0xff] %vm1539_vm0, %v3240_v10 }
 0x4c4 PF: > { %s19_s30 = sadd.s32 1, %s4504_s30  }
 0x4c5   : > { %p16_p4 = scmp.ge.s32.totalorder %s19_s30, 4  }
 0x4c7   :  { %18 = sbr.rel (!%p16_p4) target bundleno = 1 (0x1), region = 91 }

</bundles_post_ra>
